<compile_context>
chip_gen: v6e
topology: v6e:2x2x1
jax: 0.10.0
libtpu: 0.0.40
codegen_flags: <defaults>
</compile_context>

<pallas_src>
import functools
import math

import numpy as np

import jax
import jax.numpy as jnp
from jax.experimental import pallas as pl
from jax.experimental.pallas import tpu as pltpu

BN_EPS = 1e-5


# ----------------------------------------------------------------------------
# Fused kernel: conv1+bn1+prelu -> conv2+bn2 -> + x, one (image, row-block)
# per grid step.  All spatial indexing is done on flattened padded pixels.
# ----------------------------------------------------------------------------
def _residual_block_kernel(x_ref, m_ref, w1_ref, b1_ref, a1_ref, w2_ref,
                           b2_ref, o_ref, act_ref, *, H, W, TH, C):
    """
    x_ref  : (1, (H+6)*(W+2), C)  zero-padded input, flattened pixel-major
                                  (3 pad rows top/bottom, 1 pad col each side)
    m_ref  : ((H+6)*(W+2), 1)     1.0 at real-image positions, 0.0 on padding
    w1_ref : (9, C, C)            conv1 weight (BN1 folded), tap-major
    b1_ref : (1, C)  f32          conv1 bias (BN1 folded)
    a1_ref : (1, C)  f32          PReLU slope (broadcast per channel)
    w2_ref : (9, C, C)            conv2 weight (BN2 folded)
    b2_ref : (1, C)  f32          conv2 bias (BN2 folded)
    o_ref  : (1, TH*(W+2), C)     output row-block (pad columns = garbage,
                                  sliced off in the wrapper)
    act_ref: ((TH+4)*(W+2), C)    VMEM scratch: conv1 activation + 1-row halo
    """
    Wp = W + 2
    BM1 = (TH + 2) * Wp          # conv1 centers: TH rows + 1-row halo each side
    BM2 = TH * Wp                # conv2 centers: the TH output rows
    b = pl.program_id(1)         # row-block index

    # Flattened offsets of the 9 taps (row-major over (dr, dc) in {-1,0,1}^2);
    # matches the (kh, kw) ordering of the folded weights.
    offs = tuple(dr * Wp + dc for dr in (-1, 0, 1) for dc in (-1, 0, 1))

    # ---- conv1 (+ folded BN1) + PReLU --------------------------------------
    # Centers = padded rows [b*TH+2, b*TH+TH+4): the TH output rows plus one
    # halo row above/below (recomputed per block so grid steps are independent).
    c1 = (b * TH + 2) * Wp
    acc = jnp.dot(x_ref[0, pl.ds(c1 + offs[0], BM1), :], w1_ref[0],
                  preferred_element_type=jnp.float32)
    for t in range(1, 9):
        acc = acc + jnp.dot(x_ref[0, pl.ds(c1 + offs[t], BM1), :], w1_ref[t],
                            preferred_element_type=jnp.float32)
    acc = acc + b1_ref[...]                                  # f32 epilogue
    acc = jnp.where(acc >= 0.0, acc, a1_ref[...] * acc)      # PReLU
    # Zero everything that is conv2's zero padding (pad rows/cols): one cheap
    # VPU multiply by a precomputed 0/1 mask -- no buffer zeroing needed.
    acc = acc * m_ref[pl.ds(c1, BM1), :]
    act_ref[pl.ds(Wp, BM1), :] = acc.astype(act_ref.dtype)

    # ---- conv2 (+ folded BN2) + residual add -------------------------------
    # act_ref local layout: row 0 / row TH+3 are never-written safety rows
    # (only ever read for discarded pad-column outputs), rows 1..TH+2 hold the
    # freshly written activation (halo included).  Centers start at local row 2.
    c2 = 2 * Wp                                               # static offset
    acc2 = jnp.dot(act_ref[pl.ds(c2 + offs[0], BM2), :], w2_ref[0],
                   preferred_element_type=jnp.float32)
    for t in range(1, 9):
        acc2 = acc2 + jnp.dot(act_ref[pl.ds(c2 + offs[t], BM2), :], w2_ref[t],
                              preferred_element_type=jnp.float32)
    acc2 = acc2 + b2_ref[...]
    resid = x_ref[0, pl.ds(c1 + Wp, BM2), :].astype(jnp.float32)
    o_ref[0, :, :] = (acc2 + resid).astype(o_ref.dtype)


# ----------------------------------------------------------------------------
# Wrapper: BN folding, row-block picking, pallas_call over (batch, row-block)
# ----------------------------------------------------------------------------
def _fold_conv_bn(w_hwio, b, gamma, beta, mean, var, compute_dtype, eps=BN_EPS):
    """Fold inference-mode BatchNorm into conv weight/bias.

    Returns (w_taps: (9, Cin, Cout) compute_dtype, bias: (1, Cout) f32)."""
    scale = gamma / jnp.sqrt(var + eps)                      # (Cout,)
    w_f = w_hwio * scale[None, None, None, :]
    b_f = (b - mean) * scale + beta
    kh, kw, cin, cout = w_hwio.shape
    return (w_f.reshape(kh * kw, cin, cout).astype(compute_dtype),
            b_f.reshape(1, cout).astype(jnp.float32))


def _pick_row_block(H, Wp, target_rows=512):
    """Largest divisor TH of H with TH*Wp <= target_rows and TH*Wp % 8 == 0
    (TH == H is always legal since the block then spans the full extent)."""
    best = None
    for th in range(1, H + 1):
        if H % th:
            continue
        if (th * Wp) % 8 != 0 and th != H:
            continue
        if best is None or th * Wp <= target_rows:
            best = th
    return best


def residual_block_forward(x_nchw, params, *, compute_dtype=jnp.bfloat16,
                           row_block=None):
    """ResidualBlock forward.  x_nchw: (N, C, H, W) -> (N, C, H, W).

    BatchNorm is applied in inference mode (running statistics folded into the
    convs).  compute_dtype is the MXU operand dtype (bf16 by default, f32
    accumulation and epilogues either way)."""
    x = jnp.transpose(x_nchw, (0, 2, 3, 1))                  # NCHW -> NHWC
    N, H, W, C = x.shape
    Wp = W + 2
    Pp = (H + 6) * Wp

    TH = _pick_row_block(H, Wp) if row_block is None else row_block
    if H % TH != 0 or ((TH * Wp) % 8 != 0 and TH != H):
        raise ValueError(f"invalid row_block={TH} for H={H}, W={W}")
    nb = H // TH
    BM2 = TH * Wp

    # Zero-pad: 1 real conv-pad row/col plus 2 extra safety rows top/bottom so
    # every flattened tap slice stays in bounds; then flatten (rows, cols).
    xp = jnp.pad(x, ((0, 0), (3, 3), (1, 1), (0, 0)))
    xp = xp.reshape(N, Pp, C).astype(compute_dtype)

    w1, b1 = _fold_conv_bn(params["conv1_w"], params["conv1_b"],
                           params["bn1_gamma"], params["bn1_beta"],
                           params["bn1_mean"], params["bn1_var"], compute_dtype)
    w2, b2 = _fold_conv_bn(params["conv2_w"], params["conv2_b"],
                           params["bn2_gamma"], params["bn2_beta"],
                           params["bn2_mean"], params["bn2_var"], compute_dtype)
    a1 = jnp.broadcast_to(params["prelu_a"].reshape(1, -1),
                          (1, C)).astype(jnp.float32)

    # 0/1 validity mask over flattened padded positions (real pixel vs padding).
    rows_ok = (np.arange(H + 6) >= 3) & (np.arange(H + 6) <= H + 2)
    cols_ok = (np.arange(Wp) >= 1) & (np.arange(Wp) <= W)
    gmask = jnp.asarray((rows_ok[:, None] & cols_ok[None, :])
                        .astype(np.float32).reshape(Pp, 1))

    kernel = functools.partial(_residual_block_kernel, H=H, W=W, TH=TH, C=C)

    out_flat = pl.pallas_call(
        kernel,
        out_shape=jax.ShapeDtypeStruct((N, H * Wp, C), x.dtype),
        grid=(N, nb),
        in_specs=[
            # Padded image: constant over the row-block axis -> DMA'd once per
            # image and kept VMEM-resident across its row blocks.
            pl.BlockSpec((1, Pp, C), lambda n, b: (n, 0, 0)),
            pl.BlockSpec((Pp, 1), lambda n, b: (0, 0)),      # validity mask
            pl.BlockSpec((9, C, C), lambda n, b: (0, 0, 0)),  # w1 (resident)
            pl.BlockSpec((1, C), lambda n, b: (0, 0)),        # b1
            pl.BlockSpec((1, C), lambda n, b: (0, 0)),        # PReLU slope
            pl.BlockSpec((9, C, C), lambda n, b: (0, 0, 0)),  # w2 (resident)
            pl.BlockSpec((1, C), lambda n, b: (0, 0)),        # b2
        ],
        out_specs=pl.BlockSpec((1, BM2, C), lambda n, b: (n, b, 0)),
        scratch_shapes=[pltpu.VMEM(((TH + 4) * Wp, C), compute_dtype)],
        compiler_params=pltpu.CompilerParams(
            dimension_semantics=("parallel", "parallel"),
            # Explicit scoped-VMEM limit (default is 16/32 MiB); 56 MiB is
            # valid on v5e/v6e (128 MiB) and leaves headroom on v7x (64 MiB).
            vmem_limit_bytes=56 * 1024 * 1024),
    )(xp, gmask, w1, b1, a1, w2, b2)

    # Drop the pad columns and go back to NCHW; this slice fuses with the
    # transpose XLA must perform anyway for the NCHW interface.
    out = out_flat.reshape(N, H, Wp, C)[:, :, 1:W + 1, :]
    return jnp.transpose(out, (0, 3, 1, 2))


# ----------------------------------------------------------------------------
# Deterministic parameter init (kaiming-ish conv weights, nontrivial BN stats)
# ----------------------------------------------------------------------------
def init_params(key, channels):
    ks = jax.random.split(key, 12)
    std = math.sqrt(2.0 / (channels * 9))
    return {
        "conv1_w": jax.random.normal(ks[0], (3, 3, channels, channels),
                                     jnp.float32) * std,
        "conv1_b": 0.01 * jax.random.normal(ks[1], (channels,), jnp.float32),
        "bn1_gamma": 1.0 + 0.1 * jax.random.normal(ks[2], (channels,), jnp.float32),
        "bn1_beta": 0.1 * jax.random.normal(ks[3], (channels,), jnp.float32),
        "bn1_mean": 0.1 * jax.random.normal(ks[4], (channels,), jnp.float32),
        "bn1_var": jax.random.uniform(ks[5], (channels,), jnp.float32, 0.5, 1.5),
        "prelu_a": jnp.full((1,), 0.25, jnp.float32),         # nn.PReLU() default
        "conv2_w": jax.random.normal(ks[6], (3, 3, channels, channels),
                                     jnp.float32) * std,
        "conv2_b": 0.01 * jax.random.normal(ks[7], (channels,), jnp.float32),
        "bn2_gamma": 1.0 + 0.1 * jax.random.normal(ks[8], (channels,), jnp.float32),
        "bn2_beta": 0.1 * jax.random.normal(ks[9], (channels,), jnp.float32),
        "bn2_mean": 0.1 * jax.random.normal(ks[10], (channels,), jnp.float32),
        "bn2_var": jax.random.uniform(ks[11], (channels,), jnp.float32, 0.5, 1.5),
    }


# ----------------------------------------------------------------------------
# Pure-JAX reference (f32) for correctness checks
# ----------------------------------------------------------------------------
def _ref_forward(x_nchw, params, eps=BN_EPS):
    x = jnp.transpose(x_nchw, (0, 2, 3, 1))

    def conv(v, w, b):
        return jax.lax.conv_general_dilated(
            v, w, window_strides=(1, 1), padding=((1, 1), (1, 1)),
            dimension_numbers=("NHWC", "HWIO", "NHWC")) + b

    def bn(v, g, bta, m, var):
        return (v - m) / jnp.sqrt(var + eps) * g + bta

    r = bn(conv(x, params["conv1_w"], params["conv1_b"]),
           params["bn1_gamma"], params["bn1_beta"],
           params["bn1_mean"], params["bn1_var"])
    a = params["prelu_a"].reshape(1, 1, 1, -1)
    r = jnp.where(r >= 0, r, a * r)
    r = bn(conv(r, params["conv2_w"], params["conv2_b"]),
           params["bn2_gamma"], params["bn2_beta"],
           params["bn2_mean"], params["bn2_var"])
    out = x + r
    return jnp.transpose(out, (0, 3, 1, 2))


# ----------------------------------------------------------------------------
if __name__ == "__main__":
    N, C, H, W = 2, 4, 16, 16

    key = jax.random.PRNGKey(0)
    key_x, key_p = jax.random.split(key)
    x = jax.random.normal(key_x, (N, C, H, W), jnp.float32)   # NCHW like PyTorch
    params = init_params(key_p, C)

    ref = jax.block_until_ready(_ref_forward(x, params))

    # 1) f32 compute path with explicit row-block tiling (2 images x 2 row
    #    blocks = 4 grid steps) -- exercises the halo-recompute path; tight tol.
    out_f32 = jax.block_until_ready(
        residual_block_forward(x, params, compute_dtype=jnp.float32,
                               row_block=8))
    assert out_f32.shape == (N, C, H, W) and out_f32.dtype == jnp.float32
    err32 = float(jnp.max(jnp.abs(out_f32 - ref)))
    assert jnp.allclose(out_f32, ref, rtol=1e-4, atol=1e-4), \
        f"f32 path mismatch vs ref: max abs err {err32}"

    # 2) default bf16-operand MXU path (auto row block).  bf16 rounding of the
    #    inputs/weights and the VMEM-resident intermediate activation through
    #    two chained 3x3 convs => loosen the tolerance accordingly.
    out_bf16 = jax.block_until_ready(residual_block_forward(x, params))
    assert out_bf16.shape == (N, C, H, W) and out_bf16.dtype == jnp.float32
    err16 = float(jnp.max(jnp.abs(out_bf16 - ref)))
    assert jnp.allclose(out_bf16, ref, rtol=5e-2, atol=2e-1), \
        f"bf16 path mismatch vs ref: max abs err {err16}"

    print("KERNEL_OK")
</pallas_src>

<mosaic_0001>
module attributes {stable_mosaic.version = 11 : i64} {
  func.func @_residual_block_kernel(%arg0: i32, %arg1: i32, %arg2: memref<1x396x4xf32, #tpu.memory_space<vmem>>, %arg3: memref<396x1xf32, #tpu.memory_space<vmem>>, %arg4: memref<9x4x4xf32, #tpu.memory_space<vmem>>, %arg5: memref<1x4xf32, #tpu.memory_space<vmem>>, %arg6: memref<1x4xf32, #tpu.memory_space<vmem>>, %arg7: memref<9x4x4xf32, #tpu.memory_space<vmem>>, %arg8: memref<1x4xf32, #tpu.memory_space<vmem>>, %arg9: memref<1x144x4xf32, #tpu.memory_space<vmem>>, %arg10: memref<216x4xf32, #tpu.memory_space<vmem>>) attributes {dimension_semantics = [#tpu.dimension_semantics<parallel>, #tpu.dimension_semantics<parallel>], iteration_bounds = array<i64: 2, 2>, scalar_prefetch = 0 : i64, scratch_operands = 1 : i64, tpu.core_type = #tpu.core_type<tc>, window_params = [{transform_indices = @transform_0, window_bounds = array<i64: 1, 396, 4>}, {pipeline_mode = #tpu.pipeline_mode<synchronous>, transform_indices = @transform_1, window_bounds = array<i64: 396, 1>}, {pipeline_mode = #tpu.pipeline_mode<synchronous>, transform_indices = @transform_2, window_bounds = array<i64: 9, 4, 4>}, {pipeline_mode = #tpu.pipeline_mode<synchronous>, transform_indices = @transform_3, window_bounds = array<i64: 1, 4>}, {pipeline_mode = #tpu.pipeline_mode<synchronous>, transform_indices = @transform_4, window_bounds = array<i64: 1, 4>}, {pipeline_mode = #tpu.pipeline_mode<synchronous>, transform_indices = @transform_5, window_bounds = array<i64: 9, 4, 4>}, {pipeline_mode = #tpu.pipeline_mode<synchronous>, transform_indices = @transform_6, window_bounds = array<i64: 1, 4>}, {transform_indices = @transform_7, window_bounds = array<i64: 1, 144, 4>}]} {
    %c8_i32 = arith.constant 8 : i32
    %0 = arith.muli %arg1, %c8_i32 : i32
    %c2_i32 = arith.constant 2 : i32
    %1 = arith.addi %0, %c2_i32 : i32
    %c18_i32 = arith.constant 18 : i32
    %2 = arith.muli %1, %c18_i32 : i32
    %c-19_i32 = arith.constant -19 : i32
    %3 = arith.addi %2, %c-19_i32 : i32
    %c0 = arith.constant 0 : index
    %4 = arith.index_cast %3 : i32 to index
    %c0_0 = arith.constant 0 : index
    %5 = vector.load %arg2[%c0, %4, %c0_0] : memref<1x396x4xf32, #tpu.memory_space<vmem>>, vector<1x180x4xf32>
    %6 = vector.shape_cast %5 : vector<1x180x4xf32> to vector<180x4xf32>
    %c0_1 = arith.constant 0 : index
    %c0_2 = arith.constant 0 : index
    %c0_3 = arith.constant 0 : index
    %7 = vector.load %arg4[%c0_1, %c0_2, %c0_3] : memref<9x4x4xf32, #tpu.memory_space<vmem>>, vector<1x4x4xf32>
    %8 = vector.shape_cast %7 : vector<1x4x4xf32> to vector<4x4xf32>
    %cst = arith.constant dense<0.000000e+00> : vector<180x4xf32>
    %9 = tpu.matmul %6, %8, %cst {dimension_numbers = #tpu.dot_dimension_numbers<[1], [0], [0], [1], [0, 0, 1, 1], [], []>} : vector<180x4xf32>, vector<4x4xf32>, vector<180x4xf32> -> vector<180x4xf32>
    %c-18_i32 = arith.constant -18 : i32
    %10 = arith.addi %2, %c-18_i32 : i32
    %c0_4 = arith.constant 0 : index
    %11 = arith.index_cast %10 : i32 to index
    %c0_5 = arith.constant 0 : index
    %12 = vector.load %arg2[%c0_4, %11, %c0_5] : memref<1x396x4xf32, #tpu.memory_space<vmem>>, vector<1x180x4xf32>
    %13 = vector.shape_cast %12 : vector<1x180x4xf32> to vector<180x4xf32>
    %c1 = arith.constant 1 : index
    %c0_6 = arith.constant 0 : index
    %c0_7 = arith.constant 0 : index
    %14 = vector.load %arg4[%c1, %c0_6, %c0_7] : memref<9x4x4xf32, #tpu.memory_space<vmem>>, vector<1x4x4xf32>
    %15 = vector.shape_cast %14 : vector<1x4x4xf32> to vector<4x4xf32>
    %cst_8 = arith.constant dense<0.000000e+00> : vector<180x4xf32>
    %16 = tpu.matmul %13, %15, %cst_8 {dimension_numbers = #tpu.dot_dimension_numbers<[1], [0], [0], [1], [0, 0, 1, 1], [], []>} : vector<180x4xf32>, vector<4x4xf32>, vector<180x4xf32> -> vector<180x4xf32>
    %17 = arith.addf %9, %16 : vector<180x4xf32>
    %c-17_i32 = arith.constant -17 : i32
    %18 = arith.addi %2, %c-17_i32 : i32
    %c0_9 = arith.constant 0 : index
    %19 = arith.index_cast %18 : i32 to index
    %c0_10 = arith.constant 0 : index
    %20 = vector.load %arg2[%c0_9, %19, %c0_10] : memref<1x396x4xf32, #tpu.memory_space<vmem>>, vector<1x180x4xf32>
    %21 = vector.shape_cast %20 : vector<1x180x4xf32> to vector<180x4xf32>
    %c2 = arith.constant 2 : index
    %c0_11 = arith.constant 0 : index
    %c0_12 = arith.constant 0 : index
    %22 = vector.load %arg4[%c2, %c0_11, %c0_12] : memref<9x4x4xf32, #tpu.memory_space<vmem>>, vector<1x4x4xf32>
    %23 = vector.shape_cast %22 : vector<1x4x4xf32> to vector<4x4xf32>
    %cst_13 = arith.constant dense<0.000000e+00> : vector<180x4xf32>
    %24 = tpu.matmul %21, %23, %cst_13 {dimension_numbers = #tpu.dot_dimension_numbers<[1], [0], [0], [1], [0, 0, 1, 1], [], []>} : vector<180x4xf32>, vector<4x4xf32>, vector<180x4xf32> -> vector<180x4xf32>
    %25 = arith.addf %17, %24 : vector<180x4xf32>
    %c-1_i32 = arith.constant -1 : i32
    %26 = arith.addi %2, %c-1_i32 : i32
    %c0_14 = arith.constant 0 : index
    %27 = arith.index_cast %26 : i32 to index
    %c0_15 = arith.constant 0 : index
    %28 = vector.load %arg2[%c0_14, %27, %c0_15] : memref<1x396x4xf32, #tpu.memory_space<vmem>>, vector<1x180x4xf32>
    %29 = vector.shape_cast %28 : vector<1x180x4xf32> to vector<180x4xf32>
    %c3 = arith.constant 3 : index
    %c0_16 = arith.constant 0 : index
    %c0_17 = arith.constant 0 : index
    %30 = vector.load %arg4[%c3, %c0_16, %c0_17] : memref<9x4x4xf32, #tpu.memory_space<vmem>>, vector<1x4x4xf32>
    %31 = vector.shape_cast %30 : vector<1x4x4xf32> to vector<4x4xf32>
    %cst_18 = arith.constant dense<0.000000e+00> : vector<180x4xf32>
    %32 = tpu.matmul %29, %31, %cst_18 {dimension_numbers = #tpu.dot_dimension_numbers<[1], [0], [0], [1], [0, 0, 1, 1], [], []>} : vector<180x4xf32>, vector<4x4xf32>, vector<180x4xf32> -> vector<180x4xf32>
    %33 = arith.addf %25, %32 : vector<180x4xf32>
    %c0_i32 = arith.constant 0 : i32
    %34 = arith.addi %2, %c0_i32 : i32
    %c0_19 = arith.constant 0 : index
    %35 = arith.index_cast %34 : i32 to index
    %c0_20 = arith.constant 0 : index
    %36 = vector.load %arg2[%c0_19, %35, %c0_20] : memref<1x396x4xf32, #tpu.memory_space<vmem>>, vector<1x180x4xf32>
    %37 = vector.shape_cast %36 : vector<1x180x4xf32> to vector<180x4xf32>
    %c4 = arith.constant 4 : index
    %c0_21 = arith.constant 0 : index
    %c0_22 = arith.constant 0 : index
    %38 = vector.load %arg4[%c4, %c0_21, %c0_22] : memref<9x4x4xf32, #tpu.memory_space<vmem>>, vector<1x4x4xf32>
    %39 = vector.shape_cast %38 : vector<1x4x4xf32> to vector<4x4xf32>
    %cst_23 = arith.constant dense<0.000000e+00> : vector<180x4xf32>
    %40 = tpu.matmul %37, %39, %cst_23 {dimension_numbers = #tpu.dot_dimension_numbers<[1], [0], [0], [1], [0, 0, 1, 1], [], []>} : vector<180x4xf32>, vector<4x4xf32>, vector<180x4xf32> -> vector<180x4xf32>
    %41 = arith.addf %33, %40 : vector<180x4xf32>
    %c1_i32 = arith.constant 1 : i32
    %42 = arith.addi %2, %c1_i32 : i32
    %c0_24 = arith.constant 0 : index
    %43 = arith.index_cast %42 : i32 to index
    %c0_25 = arith.constant 0 : index
    %44 = vector.load %arg2[%c0_24, %43, %c0_25] : memref<1x396x4xf32, #tpu.memory_space<vmem>>, vector<1x180x4xf32>
    %45 = vector.shape_cast %44 : vector<1x180x4xf32> to vector<180x4xf32>
    %c5 = arith.constant 5 : index
    %c0_26 = arith.constant 0 : index
    %c0_27 = arith.constant 0 : index
    %46 = vector.load %arg4[%c5, %c0_26, %c0_27] : memref<9x4x4xf32, #tpu.memory_space<vmem>>, vector<1x4x4xf32>
    %47 = vector.shape_cast %46 : vector<1x4x4xf32> to vector<4x4xf32>
    %cst_28 = arith.constant dense<0.000000e+00> : vector<180x4xf32>
    %48 = tpu.matmul %45, %47, %cst_28 {dimension_numbers = #tpu.dot_dimension_numbers<[1], [0], [0], [1], [0, 0, 1, 1], [], []>} : vector<180x4xf32>, vector<4x4xf32>, vector<180x4xf32> -> vector<180x4xf32>
    %49 = arith.addf %41, %48 : vector<180x4xf32>
    %c17_i32 = arith.constant 17 : i32
    %50 = arith.addi %2, %c17_i32 : i32
    %c0_29 = arith.constant 0 : index
    %51 = arith.index_cast %50 : i32 to index
    %c0_30 = arith.constant 0 : index
    %52 = vector.load %arg2[%c0_29, %51, %c0_30] : memref<1x396x4xf32, #tpu.memory_space<vmem>>, vector<1x180x4xf32>
    %53 = vector.shape_cast %52 : vector<1x180x4xf32> to vector<180x4xf32>
    %c6 = arith.constant 6 : index
    %c0_31 = arith.constant 0 : index
    %c0_32 = arith.constant 0 : index
    %54 = vector.load %arg4[%c6, %c0_31, %c0_32] : memref<9x4x4xf32, #tpu.memory_space<vmem>>, vector<1x4x4xf32>
    %55 = vector.shape_cast %54 : vector<1x4x4xf32> to vector<4x4xf32>
    %cst_33 = arith.constant dense<0.000000e+00> : vector<180x4xf32>
    %56 = tpu.matmul %53, %55, %cst_33 {dimension_numbers = #tpu.dot_dimension_numbers<[1], [0], [0], [1], [0, 0, 1, 1], [], []>} : vector<180x4xf32>, vector<4x4xf32>, vector<180x4xf32> -> vector<180x4xf32>
    %57 = arith.addf %49, %56 : vector<180x4xf32>
    %c18_i32_34 = arith.constant 18 : i32
    %58 = arith.addi %2, %c18_i32_34 : i32
    %c0_35 = arith.constant 0 : index
    %59 = arith.index_cast %58 : i32 to index
    %c0_36 = arith.constant 0 : index
    %60 = vector.load %arg2[%c0_35, %59, %c0_36] : memref<1x396x4xf32, #tpu.memory_space<vmem>>, vector<1x180x4xf32>
    %61 = vector.shape_cast %60 : vector<1x180x4xf32> to vector<180x4xf32>
    %c7 = arith.constant 7 : index
    %c0_37 = arith.constant 0 : index
    %c0_38 = arith.constant 0 : index
    %62 = vector.load %arg4[%c7, %c0_37, %c0_38] : memref<9x4x4xf32, #tpu.memory_space<vmem>>, vector<1x4x4xf32>
    %63 = vector.shape_cast %62 : vector<1x4x4xf32> to vector<4x4xf32>
    %cst_39 = arith.constant dense<0.000000e+00> : vector<180x4xf32>
    %64 = tpu.matmul %61, %63, %cst_39 {dimension_numbers = #tpu.dot_dimension_numbers<[1], [0], [0], [1], [0, 0, 1, 1], [], []>} : vector<180x4xf32>, vector<4x4xf32>, vector<180x4xf32> -> vector<180x4xf32>
    %65 = arith.addf %57, %64 : vector<180x4xf32>
    %c19_i32 = arith.constant 19 : i32
    %66 = arith.addi %2, %c19_i32 : i32
    %c0_40 = arith.constant 0 : index
    %67 = arith.index_cast %66 : i32 to index
    %c0_41 = arith.constant 0 : index
    %68 = vector.load %arg2[%c0_40, %67, %c0_41] : memref<1x396x4xf32, #tpu.memory_space<vmem>>, vector<1x180x4xf32>
    %69 = vector.shape_cast %68 : vector<1x180x4xf32> to vector<180x4xf32>
    %c8 = arith.constant 8 : index
    %c0_42 = arith.constant 0 : index
    %c0_43 = arith.constant 0 : index
    %70 = vector.load %arg4[%c8, %c0_42, %c0_43] : memref<9x4x4xf32, #tpu.memory_space<vmem>>, vector<1x4x4xf32>
    %71 = vector.shape_cast %70 : vector<1x4x4xf32> to vector<4x4xf32>
    %cst_44 = arith.constant dense<0.000000e+00> : vector<180x4xf32>
    %72 = tpu.matmul %69, %71, %cst_44 {dimension_numbers = #tpu.dot_dimension_numbers<[1], [0], [0], [1], [0, 0, 1, 1], [], []>} : vector<180x4xf32>, vector<4x4xf32>, vector<180x4xf32> -> vector<180x4xf32>
    %73 = arith.addf %65, %72 : vector<180x4xf32>
    %c0_45 = arith.constant 0 : index
    %c0_46 = arith.constant 0 : index
    %74 = vector.load %arg5[%c0_45, %c0_46] : memref<1x4xf32, #tpu.memory_space<vmem>>, vector<1x4xf32>
    %75 = vector.broadcast %74 : vector<1x4xf32> to vector<180x4xf32>
    %76 = arith.addf %73, %75 : vector<180x4xf32>
    %cst_47 = arith.constant 0.000000e+00 : f32
    %77 = vector.broadcast %cst_47 : f32 to vector<180x4xf32>
    %78 = arith.cmpf oge, %76, %77 : vector<180x4xf32>
    %c0_48 = arith.constant 0 : index
    %c0_49 = arith.constant 0 : index
    %79 = vector.load %arg6[%c0_48, %c0_49] : memref<1x4xf32, #tpu.memory_space<vmem>>, vector<1x4xf32>
    %80 = vector.broadcast %79 : vector<1x4xf32> to vector<180x4xf32>
    %81 = arith.mulf %80, %76 : vector<180x4xf32>
    %82 = arith.select %78, %76, %81 : vector<180x4xi1>, vector<180x4xf32>
    %83 = arith.index_cast %2 : i32 to index
    %c0_50 = arith.constant 0 : index
    %84 = vector.load %arg3[%83, %c0_50] : memref<396x1xf32, #tpu.memory_space<vmem>>, vector<180x1xf32>
    %85 = vector.broadcast %84 : vector<180x1xf32> to vector<180x4xf32>
    %86 = arith.mulf %82, %85 : vector<180x4xf32>
    %c18 = arith.constant 18 : index
    %c0_51 = arith.constant 0 : index
    %87 = vector.load %arg10[%c18, %c0_51] : memref<216x4xf32, #tpu.memory_space<vmem>>, vector<180x4xf32>
    tpu.vector_store %arg10[%c18, %c0_51], %86 {strides = array<i32>} : memref<216x4xf32, #tpu.memory_space<vmem>>, vector<180x4xf32>,
    %c17 = arith.constant 17 : index
    %c0_52 = arith.constant 0 : index
    %88 = vector.load %arg10[%c17, %c0_52] : memref<216x4xf32, #tpu.memory_space<vmem>>, vector<144x4xf32>
    %c0_53 = arith.constant 0 : index
    %c0_54 = arith.constant 0 : index
    %c0_55 = arith.constant 0 : index
    %89 = vector.load %arg7[%c0_53, %c0_54, %c0_55] : memref<9x4x4xf32, #tpu.memory_space<vmem>>, vector<1x4x4xf32>
    %90 = vector.shape_cast %89 : vector<1x4x4xf32> to vector<4x4xf32>
    %cst_56 = arith.constant dense<0.000000e+00> : vector<144x4xf32>
    %91 = tpu.matmul %88, %90, %cst_56 {dimension_numbers = #tpu.dot_dimension_numbers<[1], [0], [0], [1], [0, 0, 1, 1], [], []>} : vector<144x4xf32>, vector<4x4xf32>, vector<144x4xf32> -> vector<144x4xf32>
    %c18_57 = arith.constant 18 : index
    %c0_58 = arith.constant 0 : index
    %92 = vector.load %arg10[%c18_57, %c0_58] : memref<216x4xf32, #tpu.memory_space<vmem>>, vector<144x4xf32>
    %c1_59 = arith.constant 1 : index
    %c0_60 = arith.constant 0 : index
    %c0_61 = arith.constant 0 : index
    %93 = vector.load %arg7[%c1_59, %c0_60, %c0_61] : memref<9x4x4xf32, #tpu.memory_space<vmem>>, vector<1x4x4xf32>
    %94 = vector.shape_cast %93 : vector<1x4x4xf32> to vector<4x4xf32>
    %cst_62 = arith.constant dense<0.000000e+00> : vector<144x4xf32>
    %95 = tpu.matmul %92, %94, %cst_62 {dimension_numbers = #tpu.dot_dimension_numbers<[1], [0], [0], [1], [0, 0, 1, 1], [], []>} : vector<144x4xf32>, vector<4x4xf32>, vector<144x4xf32> -> vector<144x4xf32>
    %96 = arith.addf %91, %95 : vector<144x4xf32>
    %c19 = arith.constant 19 : index
    %c0_63 = arith.constant 0 : index
    %97 = vector.load %arg10[%c19, %c0_63] : memref<216x4xf32, #tpu.memory_space<vmem>>, vector<144x4xf32>
    %c2_64 = arith.constant 2 : index
    %c0_65 = arith.constant 0 : index
    %c0_66 = arith.constant 0 : index
    %98 = vector.load %arg7[%c2_64, %c0_65, %c0_66] : memref<9x4x4xf32, #tpu.memory_space<vmem>>, vector<1x4x4xf32>
    %99 = vector.shape_cast %98 : vector<1x4x4xf32> to vector<4x4xf32>
    %cst_67 = arith.constant dense<0.000000e+00> : vector<144x4xf32>
    %100 = tpu.matmul %97, %99, %cst_67 {dimension_numbers = #tpu.dot_dimension_numbers<[1], [0], [0], [1], [0, 0, 1, 1], [], []>} : vector<144x4xf32>, vector<4x4xf32>, vector<144x4xf32> -> vector<144x4xf32>
    %101 = arith.addf %96, %100 : vector<144x4xf32>
    %c35 = arith.constant 35 : index
    %c0_68 = arith.constant 0 : index
    %102 = vector.load %arg10[%c35, %c0_68] : memref<216x4xf32, #tpu.memory_space<vmem>>, vector<144x4xf32>
    %c3_69 = arith.constant 3 : index
    %c0_70 = arith.constant 0 : index
    %c0_71 = arith.constant 0 : index
    %103 = vector.load %arg7[%c3_69, %c0_70, %c0_71] : memref<9x4x4xf32, #tpu.memory_space<vmem>>, vector<1x4x4xf32>
    %104 = vector.shape_cast %103 : vector<1x4x4xf32> to vector<4x4xf32>
    %cst_72 = arith.constant dense<0.000000e+00> : vector<144x4xf32>
    %105 = tpu.matmul %102, %104, %cst_72 {dimension_numbers = #tpu.dot_dimension_numbers<[1], [0], [0], [1], [0, 0, 1, 1], [], []>} : vector<144x4xf32>, vector<4x4xf32>, vector<144x4xf32> -> vector<144x4xf32>
    %106 = arith.addf %101, %105 : vector<144x4xf32>
    %c36 = arith.constant 36 : index
    %c0_73 = arith.constant 0 : index
    %107 = vector.load %arg10[%c36, %c0_73] : memref<216x4xf32, #tpu.memory_space<vmem>>, vector<144x4xf32>
    %c4_74 = arith.constant 4 : index
    %c0_75 = arith.constant 0 : index
    %c0_76 = arith.constant 0 : index
    %108 = vector.load %arg7[%c4_74, %c0_75, %c0_76] : memref<9x4x4xf32, #tpu.memory_space<vmem>>, vector<1x4x4xf32>
    %109 = vector.shape_cast %108 : vector<1x4x4xf32> to vector<4x4xf32>
    %cst_77 = arith.constant dense<0.000000e+00> : vector<144x4xf32>
    %110 = tpu.matmul %107, %109, %cst_77 {dimension_numbers = #tpu.dot_dimension_numbers<[1], [0], [0], [1], [0, 0, 1, 1], [], []>} : vector<144x4xf32>, vector<4x4xf32>, vector<144x4xf32> -> vector<144x4xf32>
    %111 = arith.addf %106, %110 : vector<144x4xf32>
    %c37 = arith.constant 37 : index
    %c0_78 = arith.constant 0 : index
    %112 = vector.load %arg10[%c37, %c0_78] : memref<216x4xf32, #tpu.memory_space<vmem>>, vector<144x4xf32>
    %c5_79 = arith.constant 5 : index
    %c0_80 = arith.constant 0 : index
    %c0_81 = arith.constant 0 : index
    %113 = vector.load %arg7[%c5_79, %c0_80, %c0_81] : memref<9x4x4xf32, #tpu.memory_space<vmem>>, vector<1x4x4xf32>
    %114 = vector.shape_cast %113 : vector<1x4x4xf32> to vector<4x4xf32>
    %cst_82 = arith.constant dense<0.000000e+00> : vector<144x4xf32>
    %115 = tpu.matmul %112, %114, %cst_82 {dimension_numbers = #tpu.dot_dimension_numbers<[1], [0], [0], [1], [0, 0, 1, 1], [], []>} : vector<144x4xf32>, vector<4x4xf32>, vector<144x4xf32> -> vector<144x4xf32>
    %116 = arith.addf %111, %115 : vector<144x4xf32>
    %c53 = arith.constant 53 : index
    %c0_83 = arith.constant 0 : index
    %117 = vector.load %arg10[%c53, %c0_83] : memref<216x4xf32, #tpu.memory_space<vmem>>, vector<144x4xf32>
    %c6_84 = arith.constant 6 : index
    %c0_85 = arith.constant 0 : index
    %c0_86 = arith.constant 0 : index
    %118 = vector.load %arg7[%c6_84, %c0_85, %c0_86] : memref<9x4x4xf32, #tpu.memory_space<vmem>>, vector<1x4x4xf32>
    %119 = vector.shape_cast %118 : vector<1x4x4xf32> to vector<4x4xf32>
    %cst_87 = arith.constant dense<0.000000e+00> : vector<144x4xf32>
    %120 = tpu.matmul %117, %119, %cst_87 {dimension_numbers = #tpu.dot_dimension_numbers<[1], [0], [0], [1], [0, 0, 1, 1], [], []>} : vector<144x4xf32>, vector<4x4xf32>, vector<144x4xf32> -> vector<144x4xf32>
    %121 = arith.addf %116, %120 : vector<144x4xf32>
    %c54 = arith.constant 54 : index
    %c0_88 = arith.constant 0 : index
    %122 = vector.load %arg10[%c54, %c0_88] : memref<216x4xf32, #tpu.memory_space<vmem>>, vector<144x4xf32>
    %c7_89 = arith.constant 7 : index
    %c0_90 = arith.constant 0 : index
    %c0_91 = arith.constant 0 : index
    %123 = vector.load %arg7[%c7_89, %c0_90, %c0_91] : memref<9x4x4xf32, #tpu.memory_space<vmem>>, vector<1x4x4xf32>
    %124 = vector.shape_cast %123 : vector<1x4x4xf32> to vector<4x4xf32>
    %cst_92 = arith.constant dense<0.000000e+00> : vector<144x4xf32>
    %125 = tpu.matmul %122, %124, %cst_92 {dimension_numbers = #tpu.dot_dimension_numbers<[1], [0], [0], [1], [0, 0, 1, 1], [], []>} : vector<144x4xf32>, vector<4x4xf32>, vector<144x4xf32> -> vector<144x4xf32>
    %126 = arith.addf %121, %125 : vector<144x4xf32>
    %c55 = arith.constant 55 : index
    %c0_93 = arith.constant 0 : index
    %127 = vector.load %arg10[%c55, %c0_93] : memref<216x4xf32, #tpu.memory_space<vmem>>, vector<144x4xf32>
    %c8_94 = arith.constant 8 : index
    %c0_95 = arith.constant 0 : index
    %c0_96 = arith.constant 0 : index
    %128 = vector.load %arg7[%c8_94, %c0_95, %c0_96] : memref<9x4x4xf32, #tpu.memory_space<vmem>>, vector<1x4x4xf32>
    %129 = vector.shape_cast %128 : vector<1x4x4xf32> to vector<4x4xf32>
    %cst_97 = arith.constant dense<0.000000e+00> : vector<144x4xf32>
    %130 = tpu.matmul %127, %129, %cst_97 {dimension_numbers = #tpu.dot_dimension_numbers<[1], [0], [0], [1], [0, 0, 1, 1], [], []>} : vector<144x4xf32>, vector<4x4xf32>, vector<144x4xf32> -> vector<144x4xf32>
    %131 = arith.addf %126, %130 : vector<144x4xf32>
    %c0_98 = arith.constant 0 : index
    %c0_99 = arith.constant 0 : index
    %132 = vector.load %arg8[%c0_98, %c0_99] : memref<1x4xf32, #tpu.memory_space<vmem>>, vector<1x4xf32>
    %133 = vector.broadcast %132 : vector<1x4xf32> to vector<144x4xf32>
    %134 = arith.addf %131, %133 : vector<144x4xf32>
    %c18_i32_100 = arith.constant 18 : i32
    %135 = arith.addi %2, %c18_i32_100 : i32
    %c0_101 = arith.constant 0 : index
    %136 = arith.index_cast %135 : i32 to index
    %c0_102 = arith.constant 0 : index
    %137 = vector.load %arg2[%c0_101, %136, %c0_102] : memref<1x396x4xf32, #tpu.memory_space<vmem>>, vector<1x144x4xf32>
    %138 = vector.shape_cast %137 : vector<1x144x4xf32> to vector<144x4xf32>
    %139 = arith.addf %134, %138 : vector<144x4xf32>
    %c0_103 = arith.constant 0 : index
    %c0_104 = arith.constant 0 : index
    %c0_105 = arith.constant 0 : index
    %140 = vector.load %arg9[%c0_103, %c0_104, %c0_105] : memref<1x144x4xf32, #tpu.memory_space<vmem>>, vector<1x144x4xf32>
    %141 = vector.shape_cast %140 : vector<1x144x4xf32> to vector<144x4xf32>
    %142 = vector.shape_cast %139 : vector<144x4xf32> to vector<1x144x4xf32>
    tpu.vector_store %arg9[%c0_103, %c0_104, %c0_105], %142 {strides = array<i32>} : memref<1x144x4xf32, #tpu.memory_space<vmem>>, vector<1x144x4xf32>,
    return
  }
  func.func @transform_0(%arg0: i32, %arg1: i32) -> (i32, i32, i32) {
    %c0_i32 = arith.constant 0 : i32
    %c0_i32_0 = arith.constant 0 : i32
    %c0_i32_1 = arith.constant 0 : i32
    return %arg0, %c0_i32, %c0_i32_0 : i32, i32, i32
  }
  func.func @transform_1(%arg0: i32, %arg1: i32) -> (i32, i32) {
    %c0_i32 = arith.constant 0 : i32
    %c0_i32_0 = arith.constant 0 : i32
    %c0_i32_1 = arith.constant 0 : i32
    return %c0_i32, %c0_i32_0 : i32, i32
  }
  func.func @transform_2(%arg0: i32, %arg1: i32) -> (i32, i32, i32) {
    %c0_i32 = arith.constant 0 : i32
    %c0_i32_0 = arith.constant 0 : i32
    %c0_i32_1 = arith.constant 0 : i32
    %c0_i32_2 = arith.constant 0 : i32
    return %c0_i32, %c0_i32_0, %c0_i32_1 : i32, i32, i32
  }
  func.func @transform_3(%arg0: i32, %arg1: i32) -> (i32, i32) {
    %c0_i32 = arith.constant 0 : i32
    %c0_i32_0 = arith.constant 0 : i32
    %c0_i32_1 = arith.constant 0 : i32
    return %c0_i32, %c0_i32_0 : i32, i32
  }
  func.func @transform_4(%arg0: i32, %arg1: i32) -> (i32, i32) {
    %c0_i32 = arith.constant 0 : i32
    %c0_i32_0 = arith.constant 0 : i32
    %c0_i32_1 = arith.constant 0 : i32
    return %c0_i32, %c0_i32_0 : i32, i32
  }
  func.func @transform_5(%arg0: i32, %arg1: i32) -> (i32, i32, i32) {
    %c0_i32 = arith.constant 0 : i32
    %c0_i32_0 = arith.constant 0 : i32
    %c0_i32_1 = arith.constant 0 : i32
    %c0_i32_2 = arith.constant 0 : i32
    return %c0_i32, %c0_i32_0, %c0_i32_1 : i32, i32, i32
  }
  func.func @transform_6(%arg0: i32, %arg1: i32) -> (i32, i32) {
    %c0_i32 = arith.constant 0 : i32
    %c0_i32_0 = arith.constant 0 : i32
    %c0_i32_1 = arith.constant 0 : i32
    return %c0_i32, %c0_i32_0 : i32, i32
  }
  func.func @transform_7(%arg0: i32, %arg1: i32) -> (i32, i32, i32) {
    %c0_i32 = arith.constant 0 : i32
    %c0_i32_0 = arith.constant 0 : i32
    return %arg0, %arg1, %c0_i32 : i32, i32, i32
  }
}

</mosaic_0001>

<bundles_post_ra>
// kernel: tpu_custom_call.1
= control target key start
LH: loop header
LB: loop body
LE: loop exit
PB: predicated region body
PF: predicated region fallthrough
CT: control target
= control target key end

     0   :  { %s7787_s24 = smov 0   ;;  %s7789_s25 = smov 0   ;;  %s9803_s0 = inlined_call_operand.vmem [shape: f32[2,396,4], index: 0, kind: input, shape index: {}]   ;;  %s9804_s1 = inlined_call_operand.vmem [shape: f32[396,1], index: 1, kind: input, shape index: {}]   ;;  %s9805_s2 = inlined_call_operand.vmem [shape: f32[9,4,4], index: 2, kind: input, shape index: {}]   ;;  %s9806_s3 = inlined_call_operand.vmem [shape: f32[1,4], index: 3, kind: input, shape index: {}]   ;;  %s9807_s4 = inlined_call_operand.vmem [shape: f32[1,4], index: 4, kind: input, shape index: {}]   ;;  %s9808_s5 = inlined_call_operand.vmem [shape: f32[9,4,4], index: 5, kind: input, shape index: {}]   ;;  %s9809_s6 = inlined_call_operand.vmem [shape: f32[1,4], index: 6, kind: input, shape index: {}]   ;;  %s9810_s7 = inlined_call_operand.vmem [shape: f32[2,288,4], index: 7, kind: output, shape index: {}]  }
   0x1   :  { %s7791_s26 = smov 0   ;;  %s7793_s27 = smov 0  }
   0x2   :  { %s7795_s28 = smov 0  }
   0x3 LB: > { %s26_s29 = sadd.s32 1, %s7734_s26  ;;  %s29_s30 = sadd.s32 1, %s7738_s27  ;;  %s7742_s28 = sphi %s7795_s28, %s17_s28   ;;  %s7738_s27 = sphi %s7793_s27, %s9824_s27   ;;  %s7734_s26 = sphi %s7791_s26, %s9823_s26   ;;  %s7730_s25 = sphi %s7789_s25, %s9822_s25   ;;  %s7726_s24 = sphi %s7787_s24, %s9821_s24  }
   0x4   : > { %p27_p0 = scmp.ge.s32.totalorder %s26_s29, 2  ;;  %p5689_p1 = scmp.ge.s32.totalorder %s7742_s28, 1 }
   0x5   : > { %p251_p2 = scmp.lt.s32.totalorder %s7742_s28, 5 }
   0x6   : > { %s9826_s29 = smov (%p27_p0, %s26_s29), 0  ;;  %s9828_s30 = smov (!%p27_p0, %s29_s30), %s7738_s27 }
   0x7   : > { %p252_p3 = pnand %p5689_p1, %p251_p2  ;;  %p31_p4 = scmp.ge.s32.totalorder %s9828_s30, 2 }
   0x9   : > { %s9830_s30 = smov (%p31_p4, %s9828_s30), 0  ;;  %255 = sbr.rel (%p252_p3) target bundleno = 1058 (0x422), region = 48 }
   0xe   : > { %v5742_v0 = vld [vmem:[%s9805_s2 + $0x4] sm:$0xf]  ;;  %vm428_vm0 = vcmask 1043456   ;;  %p287_p5 = scmp.lt.s32.totalorder %s7730_s25, 1  ;;  %v7744_v1 = vmov 0.0   ;;  %vm7745_vm1 = vmmov 0  }
   0xf   : > { %6755 = vmatprep.subr.mxu0 %v7744_v1  ;;  %6757 = vmatprep.mubr.msk.f32.mxu0 %vm7745_vm1, %v7744_v1  ;;  %v330_v2 = vld [vmem:[%s9805_s2] sm:$0xf]  ;;  %s5693_s12 = smul.u32 144, %s7726_s24  ;;  %vm358_vm2 = vcmask 31744   ;;  %v5866_v5 = vld [vmem:[%s9805_s2 + $0xc] sm:$0xf] }
  0x10   : > { %6756 = vmatpush3.msk.msra.mxu0 %vm428_vm0, %v5742_v0  ;;  %s9832_s25 = smov (!%p287_p5, %s7730_s25), 1  ;;  %7655 = vmatprep.subr.mxu1 %v7744_v1  ;;  %v5966_v48 = vld [vmem:[%s9805_s2 + $0x14] sm:$0xf]  ;;  %v5816_v52 = vld [vmem:[%s9805_s2 + $0x8] sm:$0xf]  ;;  %s292_s11 = smul.u32 18, %s7726_s24 }
  0x11   : > { %6826 = vmatprep.subr.mxu0 %v7744_v1  ;;  %7656 = vmatpush3.msk.msra.mxu1 %vm428_vm0, %v330_v2  ;;  %s7657_s13 = smul.u32 400, %s9832_s25  ;;  %v5916_v57 = vld [vmem:[%s9805_s2 + $0x10] sm:$0xf]  ;;  %s8607_s20 = scalar_lea.vmem %s9804_s1, %s5693_s12 }
  0x12   : > { %6834 = vmatprep.mubr.msk.f32.mxu1 %vm7745_vm1, %v7744_v1  ;;  %6968 = vmatprep.subr.mxu1 %v7744_v1  ;;  %p295_p6 = scmp.lt.s32.totalorder %s292_s11, 35 }
  0x13   : > { %s291_s16 = scalar_lea.vmem %s9803_s0, %s7657_s13  ;;  %s7658_s13 = smul.u32 36, %s9832_s25 }
  0x14   : > { %s7844_s17 = scalar_lea.vmem %s291_s16, %s5693_s12  ;;  %s9834_s11 = smov (!%p295_p6, %s292_s11), 35 }
  0x15   : > { %v5719_v3 = vld [vmem:[%s7844_s17 + $0x12] sm:$0xff]  ;;  %v5696_v4 = vld [vmem:[%s7844_s17 + $0x21] sm:$0xff]  ;;  %v5697_v7 = vld [vmem:[%s7844_s17 + $0x29] sm:$0xff]  ;;  %s298_s24 = sadd.s32 %s7658_s13, %s9834_s11 }
  0x16   : > { %6758 = vmatmul.mubr.msk.f32.vlgmr.msra.gmra.mxu0 %vm358_vm2, %v5719_v3  ;;  %v5720_v6 = vld [vmem:[%s7844_s17 + $0x1a] sm:$0xff]  ;;  %6835 = vmatmul.mubr.msk.f32.vlgmr.msra.gmra.mxu1 %vm358_vm2, %v5696_v4  ;;  %v5721_v8 = vld [vmem:[%s7844_s17 + $0x22] sm:$0xff]  ;;  %v5698_v9 = vld [vmem:[%s7844_s17 + $0x31] sm:$0xff]  ;;  %s5691_s15 = sshll.u32 %s298_s24, 3 }
  0x17   : > { %6827 = vmatpush3.msk.msra.mxu0 %vm428_vm0, %v330_v2  ;;  %6760 = vmatprep.mubr.msk.f32.mxu0 %vm7745_vm1, %v7744_v1  ;;  %v5722_v10 = vld [vmem:[%s7844_s17 + $0x2a] sm:$0xff]  ;;  %v5699_v11 = vld [vmem:[%s7844_s17 + $0x39] sm:$0xff]  ;;  %v5700_v13 = vld [vmem:[%s7844_s17 + $0x41] sm:$0xff]  ;;  %s9677_s19 = scalar_lea.vmem %s9810_s7, %s5691_s15 }
  0x18   : > { %6897 = vmatprep.subr.mxu0 %v7744_v1  ;;  %6837 = vmatprep.mubr.msk.f32.mxu1 %vm7745_vm1, %v7744_v1  ;;  %v5723_v12 = vld [vmem:[%s7844_s17 + $0x32] sm:$0xff]  ;;  %v5724_v14 = vld [vmem:[%s7844_s17 + $0x3a] sm:$0xff]  ;;  %v5701_v15 = vld [vmem:[%s7844_s17 + $0x49] sm:$0xff] }
  0x19   : > { %6969 = vmatpush3.msk.msra.mxu1 %vm428_vm0, %v5866_v5  ;;  %v5725_v16 = vld [vmem:[%s7844_s17 + $0x42] sm:$0xff]  ;;  %v5702_v17 = vld [vmem:[%s7844_s17 + $0x51] sm:$0xff]  ;;  %v5703_v19 = vld [vmem:[%s7844_s17 + $0x59] sm:$0xff] }
  0x1a   : > { %6761 = vmatmul.mubr.msk.f32.gmra.mxu0 %vm358_vm2, %v5720_v6  ;;  %7110 = vmatprep.subr.mxu1 %v7744_v1  ;;  %v5726_v18 = vld [vmem:[%s7844_s17 + $0x4a] sm:$0xff]  ;;  %v5727_v20 = vld [vmem:[%s7844_s17 + $0x52] sm:$0xff]  ;;  %v5704_v21 = vld [vmem:[%s7844_s17 + $0x61] sm:$0xff] }
  0x1b   : > { %6763 = vmatprep.mubr.msk.f32.mxu0 %vm7745_vm1, %v7744_v1  ;;  %6838 = vmatmul.mubr.msk.f32.gmra.mxu1 %vm358_vm2, %v5697_v7  ;;  %v5728_v22 = vld [vmem:[%s7844_s17 + $0x5a] sm:$0xff]  ;;  %v5705_v23 = vld [vmem:[%s7844_s17 + $0x69] sm:$0xff]  ;;  %v5706_v25 = vld [vmem:[%s7844_s17 + $0x71] sm:$0xff] }
  0x1c   : > { %6840 = vmatprep.mubr.msk.f32.mxu1 %vm7745_vm1, %v7744_v1  ;;  %v5729_v24 = vld [vmem:[%s7844_s17 + $0x62] sm:$0xff]  ;;  %v5730_v26 = vld [vmem:[%s7844_s17 + $0x6a] sm:$0xff]  ;;  %v5707_v27 = vld [vmem:[%s7844_s17 + $0x79] sm:$0xff] }
  0x1d   : > { %v5731_v28 = vld [vmem:[%s7844_s17 + $0x72] sm:$0xff]  ;;  %v5708_v29 = vld [vmem:[%s7844_s17 + $0x81] sm:$0xff]  ;;  %v5709_v31 = vld [vmem:[%s7844_s17 + $0x89] sm:$0xff] }
  0x1e   : > { %6764 = vmatmul.mubr.msk.f32.gmra.mxu0 %vm358_vm2, %v5721_v8  ;;  %v5732_v30 = vld [vmem:[%s7844_s17 + $0x7a] sm:$0xff]  ;;  %v5733_v32 = vld [vmem:[%s7844_s17 + $0x82] sm:$0xff]  ;;  %v5710_v33 = vld [vmem:[%s7844_s17 + $0x91] sm:$0xff] }
  0x1f   : > { %6766 = vmatprep.mubr.msk.f32.mxu0 %vm7745_vm1, %v7744_v1  ;;  %6841 = vmatmul.mubr.msk.f32.gmra.mxu1 %vm358_vm2, %v5698_v9  ;;  %v5734_v34 = vld [vmem:[%s7844_s17 + $0x8a] sm:$0xff]  ;;  %v5711_v35 = vld [vmem:[%s7844_s17 + $0x99] sm:$0xff]  ;;  %v5712_v37 = vld [vmem:[%s7844_s17 + $0xa1] sm:$0xff] }
  0x20   : > { %6843 = vmatprep.mubr.msk.f32.mxu1 %vm7745_vm1, %v7744_v1  ;;  %v5735_v36 = vld [vmem:[%s7844_s17 + $0x92] sm:$0xff]  ;;  %v5736_v38 = vld [vmem:[%s7844_s17 + $0x9a] sm:$0xff]  ;;  %v5713_v39 = vld [vmem:[%s7844_s17 + $0xa9] sm:$0xff] }
  0x21   : > { %v5737_v40 = vld [vmem:[%s7844_s17 + $0xa2] sm:$0xff]  ;;  %v5714_v41 = vld [vmem:[%s7844_s17 + $0xb1] sm:$0xff]  ;;  %v5715_v43 = vld [vmem:[%s7844_s17 + $0xb9] sm:$0xff] }
  0x22   : > { %6767 = vmatmul.mubr.msk.f32.gmra.mxu0 %vm358_vm2, %v5722_v10  ;;  %v5738_v42 = vld [vmem:[%s7844_s17 + $0xaa] sm:$0xff]  ;;  %v5739_v44 = vld [vmem:[%s7844_s17 + $0xb2] sm:$0xff]  ;;  %v5716_v45 = vld [vmem:[%s7844_s17 + $0xc1] sm:$0xf] }
  0x23   : > { %6769 = vmatprep.mubr.msk.f32.mxu0 %vm7745_vm1, %v7744_v1  ;;  %6844 = vmatmul.mubr.msk.f32.gmra.mxu1 %vm358_vm2, %v5699_v11  ;;  %v5740_v46 = vld [vmem:[%s7844_s17 + $0xba] sm:$0xff]  ;;  %v5843_v47 = vld [vmem:[%s7844_s17 + $0x23] sm:$0xff]  ;;  %v5844_v50 = vld [vmem:[%s7844_s17 + $0x2b] sm:$0xff] }
  0x24   : > { %6846 = vmatprep.mubr.msk.f32.mxu1 %vm7745_vm1, %v7744_v1  ;;  %v5741_v49 = vld [vmem:[%s7844_s17 + $0xc2] sm:$0xf]  ;;  %v5694_v51 = vld [vmem:[%s7844_s17 + $0x11] sm:$0xff]  ;;  %v5695_v54 = vld [vmem:[%s7844_s17 + $0x19] sm:$0xff] }
  0x25   : > { %v5845_v53 = vld [vmem:[%s7844_s17 + $0x33] sm:$0xff]  ;;  %v5846_v55 = vld [vmem:[%s7844_s17 + $0x3b] sm:$0xff]  ;;  %v5847_v58 = vld [vmem:[%s7844_s17 + $0x43] sm:$0xff] }
  0x26   : > { %6770 = vmatmul.mubr.msk.f32.gmra.mxu0 %vm358_vm2, %v5723_v12  ;;  %v5793_v56 = vld [vmem:[%s7844_s17 + $0x13] sm:$0xff]  ;;  %v5794_v59 = vld [vmem:[%s7844_s17 + $0x1b] sm:$0xff]  ;;  %v5848_v60 = vld [vmem:[%s7844_s17 + $0x4b] sm:$0xff] }
  0x27   : > { %6772 = vmatprep.mubr.msk.f32.mxu0 %vm7745_vm1, %v7744_v1  ;;  %6847 = vmatmul.mubr.msk.f32.gmra.mxu1 %vm358_vm2, %v5700_v13  ;;  %v5849_v61 = vld [vmem:[%s7844_s17 + $0x53] sm:$0xff]  ;;  %v5850_v62 = vld [vmem:[%s7844_s17 + $0x5b] sm:$0xff]  ;;  %v5851_v63 = vld [vmem:[%s7844_s17 + $0x63] sm:$0xff] }
  0x28   : > { %6849 = vmatprep.mubr.msk.f32.mxu1 %vm7745_vm1, %v7744_v1  ;;  %v5852_v0 = vld [vmem:[%s7844_s17 + $0x6b] sm:$0xff]  ;;  %v5853_v2 = vld [vmem:[%s7844_s17 + $0x73] sm:$0xff]  ;;  %v5854_v3 = vld [vmem:[%s7844_s17 + $0x7b] sm:$0xff] }
  0x29   : > { %v5855_v4 = vld [vmem:[%s7844_s17 + $0x83] sm:$0xff]  ;;  %v5856_v5 = vld [vmem:[%s7844_s17 + $0x8b] sm:$0xff]  ;;  %v5857_v6 = vld [vmem:[%s7844_s17 + $0x93] sm:$0xff] }
  0x2a   : > { %6773 = vmatmul.mubr.msk.f32.gmra.mxu0 %vm358_vm2, %v5724_v14  ;;  %v5858_v7 = vld [vmem:[%s7844_s17 + $0x9b] sm:$0xff]  ;;  %v5859_v8 = vld [vmem:[%s7844_s17 + $0xa3] sm:$0xff]  ;;  %v5860_v9 = vld [vmem:[%s7844_s17 + $0xab] sm:$0xff] }
  0x2b   : > { %6775 = vmatprep.mubr.msk.f32.mxu0 %vm7745_vm1, %v7744_v1  ;;  %6850 = vmatmul.mubr.msk.f32.gmra.mxu1 %vm358_vm2, %v5701_v15  ;;  %v5861_v10 = vld [vmem:[%s7844_s17 + $0xb3] sm:$0xff]  ;;  %v5862_v11 = vld [vmem:[%s7844_s17 + $0xbb] sm:$0xff]  ;;  %v5863_v12 = vld [vmem:[%s7844_s17 + $0xc3] sm:$0xff] }
  0x2c   : > { %6852 = vmatprep.mubr.msk.f32.mxu1 %vm7745_vm1, %v7744_v1  ;;  %v5864_v13 = vld [vmem:[%s7844_s17 + $0xcb] sm:$0xff]  ;;  %v5865_v14 = vld [vmem:[%s7844_s17 + $0xd3] sm:$0xf] }
  0x2d   : > { %v5943_v15 = vld [vmem:[%s7844_s17 + $0x25] sm:$0xff] }
  0x2e   : > { %6776 = vmatmul.mubr.msk.f32.gmra.mxu0 %vm358_vm2, %v5725_v16  ;;  %v6066_v16 = vld [vmem:[%s9805_s2 + $0x1c] sm:$0xf] }
  0x2f   : > { %6778 = vmatprep.mubr.msk.f32.mxu0 %vm7745_vm1, %v7744_v1  ;;  %6853 = vmatmul.mubr.msk.f32.gmra.mxu1 %vm358_vm2, %v5702_v17  ;;  %v5944_v17 = vld [vmem:[%s7844_s17 + $0x2d] sm:$0xff] }
  0x30   : > { %6855 = vmatprep.mubr.msk.f32.mxu1 %vm7745_vm1, %v7744_v1 }
  0x32   : > { %6779 = vmatmul.mubr.msk.f32.gmra.mxu0 %vm358_vm2, %v5726_v18  ;;  %v8222_v18 = vld [vmem:[%s7844_s17 + $0x35] sm:$0xff] }
  0x33   : > { %6781 = vmatprep.mubr.msk.f32.mxu0 %vm7745_vm1, %v7744_v1  ;;  %6856 = vmatmul.mubr.msk.f32.gmra.mxu1 %vm358_vm2, %v5703_v19  ;;  %v5815_v19 = vld [vmem:[%s7844_s17 + $0xc3] sm:$0xf] }
  0x34   : > { %6858 = vmatprep.mubr.msk.f32.mxu1 %vm7745_vm1, %v7744_v1 }
  0x36   : > { %6782 = vmatmul.mubr.msk.f32.gmra.mxu0 %vm358_vm2, %v5727_v20  ;;  %v8233_v20 = vld [vmem:[%s7844_s17 + $0x3d] sm:$0xff] }
  0x37   : > { %6784 = vmatprep.mubr.msk.f32.mxu0 %vm7745_vm1, %v7744_v1  ;;  %6859 = vmatmul.mubr.msk.f32.gmra.mxu1 %vm358_vm2, %v5704_v21  ;;  %v5893_v21 = vld [vmem:[%s7844_s17 + $0x24] sm:$0xff] }
  0x38   : > { %6861 = vmatprep.mubr.msk.f32.mxu1 %vm7745_vm1, %v7744_v1 }
  0x3a   : > { %6785 = vmatmul.mubr.msk.f32.gmra.mxu0 %vm358_vm2, %v5728_v22  ;;  %v6016_v22 = vld [vmem:[%s9805_s2 + $0x18] sm:$0xf] }
  0x3b   : > { %6787 = vmatprep.mubr.msk.f32.mxu0 %vm7745_vm1, %v7744_v1  ;;  %6862 = vmatmul.mubr.msk.f32.gmra.mxu1 %vm358_vm2, %v5705_v23  ;;  %v8247_v23 = vld [vmem:[%s7844_s17 + $0x45] sm:$0xff] }
  0x3c   : > { %6864 = vmatprep.mubr.msk.f32.mxu1 %vm7745_vm1, %v7744_v1 }
  0x3e   : > { %6788 = vmatmul.mubr.msk.f32.gmra.mxu0 %vm358_vm2, %v5729_v24 }
  0x3f   : > { %6790 = vmatprep.mubr.msk.f32.mxu0 %vm7745_vm1, %v7744_v1  ;;  %6865 = vmatmul.mubr.msk.f32.gmra.mxu1 %vm358_vm2, %v5706_v25  ;;  %v5894_v25 = vld [vmem:[%s7844_s17 + $0x2c] sm:$0xff] }
  0x40   : > { %6867 = vmatprep.mubr.msk.f32.mxu1 %vm7745_vm1, %v7744_v1 }
  0x42   : > { %6791 = vmatmul.mubr.msk.f32.gmra.mxu0 %vm358_vm2, %v5730_v26 }
  0x43   : > { %6793 = vmatprep.mubr.msk.f32.mxu0 %vm7745_vm1, %v7744_v1  ;;  %6868 = vmatmul.mubr.msk.f32.gmra.mxu1 %vm358_vm2, %v5707_v27 }
  0x44   : > { %6870 = vmatprep.mubr.msk.f32.mxu1 %vm7745_vm1, %v7744_v1 }
  0x46   : > { %6794 = vmatmul.mubr.msk.f32.gmra.mxu0 %vm358_vm2, %v5731_v28  ;;  %v8262_v28 = vld [vmem:[%s7844_s17 + $0x4d] sm:$0xff] }
  0x47   : > { %6796 = vmatprep.mubr.msk.f32.mxu0 %vm7745_vm1, %v7744_v1  ;;  %6871 = vmatmul.mubr.msk.f32.gmra.mxu1 %vm358_vm2, %v5708_v29 }
  0x48   : > { %6873 = vmatprep.mubr.msk.f32.mxu1 %vm7745_vm1, %v7744_v1 }
  0x4a   : > { %6797 = vmatmul.mubr.msk.f32.gmra.mxu0 %vm358_vm2, %v5732_v30 }
  0x4b   : > { %6799 = vmatprep.mubr.msk.f32.mxu0 %vm7745_vm1, %v7744_v1  ;;  %6874 = vmatmul.mubr.msk.f32.gmra.mxu1 %vm358_vm2, %v5709_v31  ;;  %v5895_v31 = vld [vmem:[%s7844_s17 + $0x34] sm:$0xff] }
  0x4c   : > { %6876 = vmatprep.mubr.msk.f32.mxu1 %vm7745_vm1, %v7744_v1 }
  0x4e   : > { %6800 = vmatmul.mubr.msk.f32.gmra.mxu0 %vm358_vm2, %v5733_v32 }
  0x4f   : > { %6802 = vmatprep.mubr.msk.f32.mxu0 %vm7745_vm1, %v7744_v1  ;;  %6877 = vmatmul.mubr.msk.f32.gmra.mxu1 %vm358_vm2, %v5710_v33 }
  0x50   : > { %6879 = vmatprep.mubr.msk.f32.mxu1 %vm7745_vm1, %v7744_v1 }
  0x52   : > { %6803 = vmatmul.mubr.msk.f32.gmra.mxu0 %vm358_vm2, %v5734_v34  ;;  %v8275_v34 = vld [vmem:[%s7844_s17 + $0x55] sm:$0xff] }
  0x53   : > { %6805 = vmatprep.mubr.msk.f32.mxu0 %vm7745_vm1, %v7744_v1  ;;  %6880 = vmatmul.mubr.msk.f32.gmra.mxu1 %vm358_vm2, %v5711_v35 }
  0x54   : > { %6882 = vmatprep.mubr.msk.f32.mxu1 %vm7745_vm1, %v7744_v1 }
  0x56   : > { %6806 = vmatmul.mubr.msk.f32.gmra.mxu0 %vm358_vm2, %v5735_v36 }
  0x57   : > { %6808 = vmatprep.mubr.msk.f32.mxu0 %vm7745_vm1, %v7744_v1  ;;  %6883 = vmatmul.mubr.msk.f32.gmra.mxu1 %vm358_vm2, %v5712_v37 }
  0x58   : > { %6885 = vmatprep.mubr.msk.f32.mxu1 %vm7745_vm1, %v7744_v1 }
  0x5a   : > { %6809 = vmatmul.mubr.msk.f32.gmra.mxu0 %vm358_vm2, %v5736_v38  ;;  %v5896_v38 = vld [vmem:[%s7844_s17 + $0x3c] sm:$0xff] }
  0x5b   : > { %6811 = vmatprep.mubr.msk.f32.mxu0 %vm7745_vm1, %v7744_v1  ;;  %6886 = vmatmul.mubr.msk.f32.gmra.mxu1 %vm358_vm2, %v5713_v39 }
  0x5c   : > { %6888 = vmatprep.mubr.msk.f32.mxu1 %vm7745_vm1, %v7744_v1 }
  0x5e   : > { %6812 = vmatmul.mubr.msk.f32.gmra.mxu0 %vm358_vm2, %v5737_v40 }
  0x5f   : > { %6814 = vmatprep.mubr.msk.f32.mxu0 %vm7745_vm1, %v7744_v1  ;;  %6889 = vmatmul.mubr.msk.f32.gmra.mxu1 %vm358_vm2, %v5714_v41  ;;  %v8288_v41 = vld [vmem:[%s7844_s17 + $0x5d] sm:$0xff] }
  0x60   : > { %6891 = vmatprep.mubr.msk.f32.mxu1 %vm7745_vm1, %v7744_v1 }
  0x62   : > { %6815 = vmatmul.mubr.msk.f32.gmra.mxu0 %vm358_vm2, %v5738_v42 }
  0x63   : > { %6817 = vmatprep.mubr.msk.f32.mxu0 %vm7745_vm1, %v7744_v1  ;;  %6892 = vmatmul.mubr.msk.f32.gmra.mxu1 %vm358_vm2, %v5715_v43 }
  0x64   : > { %6894 = vmatprep.mubr.msk.f32.mxu1 %vm7745_vm1, %v7744_v1 }
  0x66   : > { %6818 = vmatmul.mubr.msk.f32.gmra.mxu0 %vm358_vm2, %v5739_v44 }
  0x67   : > { %6820 = vmatprep.mubr.msk.f32.mxu0 %vm7745_vm1, %v7744_v1  ;;  %6895 = vmatmul.mubr.msk.f32.gmra.mxu1 %vm358_vm2, %v5716_v45  ;;  %v5897_v45 = vld [vmem:[%s7844_s17 + $0x44] sm:$0xff] }
  0x68   : > { %6970 = vmatprep.mubr.msk.f32.mxu1 %vm7745_vm1, %v7744_v1 }
  0x6a   : > { %6821 = vmatmul.mubr.msk.f32.gmra.mxu0 %vm358_vm2, %v5740_v46 }
  0x6b   : > { %6823 = vmatprep.mubr.msk.f32.mxu0 %vm7745_vm1, %v7744_v1  ;;  %6971 = vmatmul.mubr.msk.f32.vlgmr.msra.gmra.mxu1 %vm358_vm2, %v5843_v47 }
  0x6c   : > { %6973 = vmatprep.mubr.msk.f32.mxu1 %vm7745_vm1, %v7744_v1  ;;  %7111 = vmatpush3.msk.msra.mxu1 %vm428_vm0, %v5966_v48  ;;  %v8301_v48 = vld [vmem:[%s7844_s17 + $0x65] sm:$0xff] }
  0x6d   : > { %7252 = vmatprep.subr.mxu1 %v7744_v1 }
  0x6e   : > { %6824 = vmatmul.mubr.msk.f32.gmra.mxu0 %vm358_vm2, %v5741_v49 }
  0x6f   : > { %6828 = vmatprep.mubr.msk.f32.mxu0 %vm7745_vm1, %v7744_v1  ;;  %6974 = vmatmul.mubr.msk.f32.gmra.mxu1 %vm358_vm2, %v5844_v50 }
  0x70   : > { %6976 = vmatprep.mubr.msk.f32.mxu1 %vm7745_vm1, %v7744_v1 }
  0x72   : > { %6829 = vmatmul.mubr.msk.f32.vlgmr.msra.gmra.mxu0 %vm358_vm2, %v5694_v51 }
  0x73   : > { %6898 = vmatpush3.msk.msra.mxu0 %vm428_vm0, %v5816_v52  ;;  %6831 = vmatprep.mubr.msk.f32.mxu0 %vm7745_vm1, %v7744_v1  ;;  %v5898_v52 = vld [vmem:[%s7844_s17 + $0x4c] sm:$0xff] }
  0x74   : > { %7039 = vmatprep.subr.mxu0 %v7744_v1  ;;  %6977 = vmatmul.mubr.msk.f32.gmra.mxu1 %vm358_vm2, %v5845_v53 }
  0x75   : > { %6979 = vmatprep.mubr.msk.f32.mxu1 %vm7745_vm1, %v7744_v1 }
  0x76   : > { %6832 = vmatmul.mubr.msk.f32.gmra.mxu0 %vm358_vm2, %v5695_v54 }
  0x77   : > { %6899 = vmatprep.mubr.msk.f32.mxu0 %vm7745_vm1, %v7744_v1 }
  0x78   : > { %6980 = vmatmul.mubr.msk.f32.gmra.mxu1 %vm358_vm2, %v5846_v55 }
  0x79   : > { %6982 = vmatprep.mubr.msk.f32.mxu1 %vm7745_vm1, %v7744_v1 }
  0x7a   : > { %6900 = vmatmul.mubr.msk.f32.vlgmr.msra.gmra.mxu0 %vm358_vm2, %v5793_v56 }
  0x7b   : > { %7040 = vmatpush3.msk.msra.mxu0 %vm428_vm0, %v5916_v57  ;;  %6902 = vmatprep.mubr.msk.f32.mxu0 %vm7745_vm1, %v7744_v1 }
  0x7c   : > { %6983 = vmatmul.mubr.msk.f32.gmra.mxu1 %vm358_vm2, %v5847_v58  ;;  %7181 = vmatprep.subr.mxu0 %v7744_v1 }
  0x7d   : > { %6985 = vmatprep.mubr.msk.f32.mxu1 %vm7745_vm1, %v7744_v1 }
  0x7e   : > { %6903 = vmatmul.mubr.msk.f32.gmra.mxu0 %vm358_vm2, %v5794_v59  ;;  %v5899_v59 = vld [vmem:[%s7844_s17 + $0x54] sm:$0xff] }
  0x7f   : > { %6905 = vmatprep.mubr.msk.f32.mxu0 %vm7745_vm1, %v7744_v1 }
  0x80   : > { %6986 = vmatmul.mubr.msk.f32.gmra.mxu1 %vm358_vm2, %v5848_v60 }
  0x81   : > { %6988 = vmatprep.mubr.msk.f32.mxu1 %vm7745_vm1, %v7744_v1 }
  0x82   : > { %6906 = vmatmul.mubr.msk.f32.gmra.mxu0 %vm358_vm2, %v5843_v47 }
  0x83   : > { %6908 = vmatprep.mubr.msk.f32.mxu0 %vm7745_vm1, %v7744_v1 }
  0x84   : > { %6989 = vmatmul.mubr.msk.f32.gmra.mxu1 %vm358_vm2, %v5849_v61 }
  0x85   : > { %6991 = vmatprep.mubr.msk.f32.mxu1 %vm7745_vm1, %v7744_v1 }
  0x86   : > { %6909 = vmatmul.mubr.msk.f32.gmra.mxu0 %vm358_vm2, %v5844_v50 }
  0x87   : > { %6911 = vmatprep.mubr.msk.f32.mxu0 %vm7745_vm1, %v7744_v1 }
  0x88   : > { %6992 = vmatmul.mubr.msk.f32.gmra.mxu1 %vm358_vm2, %v5850_v62 }
  0x89   : > { %6994 = vmatprep.mubr.msk.f32.mxu1 %vm7745_vm1, %v7744_v1 }
  0x8a   : > { %6912 = vmatmul.mubr.msk.f32.gmra.mxu0 %vm358_vm2, %v5845_v53 }
  0x8b   : > { %6914 = vmatprep.mubr.msk.f32.mxu0 %vm7745_vm1, %v7744_v1 }
  0x8c   : > { %6995 = vmatmul.mubr.msk.f32.gmra.mxu1 %vm358_vm2, %v5851_v63 }
  0x8d   : > { %6997 = vmatprep.mubr.msk.f32.mxu1 %vm7745_vm1, %v7744_v1 }
  0x8e   : > { %6915 = vmatmul.mubr.msk.f32.gmra.mxu0 %vm358_vm2, %v5846_v55  ;;  %v8314_v55 = vld [vmem:[%s7844_s17 + $0x6d] sm:$0xff] }
  0x8f   : > { %6917 = vmatprep.mubr.msk.f32.mxu0 %vm7745_vm1, %v7744_v1 }
  0x90   : > { %6998 = vmatmul.mubr.msk.f32.gmra.mxu1 %vm358_vm2, %v5852_v0 }
  0x91   : > { %7000 = vmatprep.mubr.msk.f32.mxu1 %vm7745_vm1, %v7744_v1 }
  0x92   : > { %6918 = vmatmul.mubr.msk.f32.gmra.mxu0 %vm358_vm2, %v5847_v58 }
  0x93   : > { %6920 = vmatprep.mubr.msk.f32.mxu0 %vm7745_vm1, %v7744_v1 }
  0x94   : > { %7001 = vmatmul.mubr.msk.f32.gmra.mxu1 %vm358_vm2, %v5853_v2 }
  0x95   : > { %7003 = vmatprep.mubr.msk.f32.mxu1 %vm7745_vm1, %v7744_v1 }
  0x96   : > { %6921 = vmatmul.mubr.msk.f32.gmra.mxu0 %vm358_vm2, %v5848_v60 }
  0x97   : > { %6923 = vmatprep.mubr.msk.f32.mxu0 %vm7745_vm1, %v7744_v1 }
  0x98   : > { %7004 = vmatmul.mubr.msk.f32.gmra.mxu1 %vm358_vm2, %v5854_v3 }
  0x99   : > { %7006 = vmatprep.mubr.msk.f32.mxu1 %vm7745_vm1, %v7744_v1 }
  0x9a   : > { %6924 = vmatmul.mubr.msk.f32.gmra.mxu0 %vm358_vm2, %v5849_v61 }
  0x9b   : > { %6926 = vmatprep.mubr.msk.f32.mxu0 %vm7745_vm1, %v7744_v1 }
  0x9c   : > { %7007 = vmatmul.mubr.msk.f32.gmra.mxu1 %vm358_vm2, %v5855_v4 }
  0x9d   : > { %7009 = vmatprep.mubr.msk.f32.mxu1 %vm7745_vm1, %v7744_v1 }
  0x9e   : > { %6927 = vmatmul.mubr.msk.f32.gmra.mxu0 %vm358_vm2, %v5850_v62  ;;  %v8327_v62 = vld [vmem:[%s7844_s17 + $0x75] sm:$0xff] }
  0x9f   : > { %6929 = vmatprep.mubr.msk.f32.mxu0 %vm7745_vm1, %v7744_v1 }
  0xa0   : > { %7010 = vmatmul.mubr.msk.f32.gmra.mxu1 %vm358_vm2, %v5856_v5 }
  0xa1   : > { %7012 = vmatprep.mubr.msk.f32.mxu1 %vm7745_vm1, %v7744_v1 }
  0xa2   : > { %6930 = vmatmul.mubr.msk.f32.gmra.mxu0 %vm358_vm2, %v5851_v63 }
  0xa3   : > { %6932 = vmatprep.mubr.msk.f32.mxu0 %vm7745_vm1, %v7744_v1 }
  0xa4   : > { %7013 = vmatmul.mubr.msk.f32.gmra.mxu1 %vm358_vm2, %v5857_v6 }
  0xa5   : > { %7015 = vmatprep.mubr.msk.f32.mxu1 %vm7745_vm1, %v7744_v1 }
  0xa6   : > { %6933 = vmatmul.mubr.msk.f32.gmra.mxu0 %vm358_vm2, %v5852_v0 }
  0xa7   : > { %6935 = vmatprep.mubr.msk.f32.mxu0 %vm7745_vm1, %v7744_v1 }
  0xa8   : > { %7016 = vmatmul.mubr.msk.f32.gmra.mxu1 %vm358_vm2, %v5858_v7 }
  0xa9   : > { %7018 = vmatprep.mubr.msk.f32.mxu1 %vm7745_vm1, %v7744_v1 }
  0xaa   : > { %6936 = vmatmul.mubr.msk.f32.gmra.mxu0 %vm358_vm2, %v5853_v2 }
  0xab   : > { %6938 = vmatprep.mubr.msk.f32.mxu0 %vm7745_vm1, %v7744_v1 }
  0xac   : > { %7019 = vmatmul.mubr.msk.f32.gmra.mxu1 %vm358_vm2, %v5859_v8 }
  0xad   : > { %7021 = vmatprep.mubr.msk.f32.mxu1 %vm7745_vm1, %v7744_v1 }
  0xae   : > { %6939 = vmatmul.mubr.msk.f32.gmra.mxu0 %vm358_vm2, %v5854_v3  ;;  %v5900_v3 = vld [vmem:[%s7844_s17 + $0x5c] sm:$0xff] }
  0xaf   : > { %6941 = vmatprep.mubr.msk.f32.mxu0 %vm7745_vm1, %v7744_v1 }
  0xb0   : > { %7022 = vmatmul.mubr.msk.f32.gmra.mxu1 %vm358_vm2, %v5860_v9 }
  0xb1   : > { %7024 = vmatprep.mubr.msk.f32.mxu1 %vm7745_vm1, %v7744_v1 }
  0xb2   : > { %6942 = vmatmul.mubr.msk.f32.gmra.mxu0 %vm358_vm2, %v5855_v4 }
  0xb3   : > { %6944 = vmatprep.mubr.msk.f32.mxu0 %vm7745_vm1, %v7744_v1 }
  0xb4   : > { %7025 = vmatmul.mubr.msk.f32.gmra.mxu1 %vm358_vm2, %v5861_v10 }
  0xb5   : > { %7027 = vmatprep.mubr.msk.f32.mxu1 %vm7745_vm1, %v7744_v1 }
  0xb6   : > { %6945 = vmatmul.mubr.msk.f32.gmra.mxu0 %vm358_vm2, %v5856_v5 }
  0xb7   : > { %6947 = vmatprep.mubr.msk.f32.mxu0 %vm7745_vm1, %v7744_v1 }
  0xb8   : > { %7028 = vmatmul.mubr.msk.f32.gmra.mxu1 %vm358_vm2, %v5862_v11 }
  0xb9   : > { %7030 = vmatprep.mubr.msk.f32.mxu1 %vm7745_vm1, %v7744_v1 }
  0xba   : > { %6948 = vmatmul.mubr.msk.f32.gmra.mxu0 %vm358_vm2, %v5857_v6  ;;  %v8340_v6 = vld [vmem:[%s7844_s17 + $0x7d] sm:$0xff] }
  0xbb   : > { %6950 = vmatprep.mubr.msk.f32.mxu0 %vm7745_vm1, %v7744_v1 }
  0xbc   : > { %7031 = vmatmul.mubr.msk.f32.gmra.mxu1 %vm358_vm2, %v5863_v12 }
  0xbd   : > { %7033 = vmatprep.mubr.msk.f32.mxu1 %vm7745_vm1, %v7744_v1 }
  0xbe   : > { %6951 = vmatmul.mubr.msk.f32.gmra.mxu0 %vm358_vm2, %v5858_v7 }
  0xbf   : > { %6953 = vmatprep.mubr.msk.f32.mxu0 %vm7745_vm1, %v7744_v1 }
  0xc0   : > { %7034 = vmatmul.mubr.msk.f32.gmra.mxu1 %vm358_vm2, %v5864_v13  ;;  %v8353_v13 = vld [vmem:[%s7844_s17 + $0x85] sm:$0xff] }
  0xc1   : > { %7036 = vmatprep.mubr.msk.f32.mxu1 %vm7745_vm1, %v7744_v1 }
  0xc2   : > { %6954 = vmatmul.mubr.msk.f32.gmra.mxu0 %vm358_vm2, %v5859_v8 }
  0xc3   : > { %6956 = vmatprep.mubr.msk.f32.mxu0 %vm7745_vm1, %v7744_v1 }
  0xc4   : > { %7037 = vmatmul.mubr.msk.f32.gmra.mxu1 %vm358_vm2, %v5865_v14 }
  0xc5   : > { %7112 = vmatprep.mubr.msk.f32.mxu1 %vm7745_vm1, %v7744_v1 }
  0xc6   : > { %6957 = vmatmul.mubr.msk.f32.gmra.mxu0 %vm358_vm2, %v5860_v9 }
  0xc7   : > { %6959 = vmatprep.mubr.msk.f32.mxu0 %vm7745_vm1, %v7744_v1 }
  0xc8   : > { %7113 = vmatmul.mubr.msk.f32.vlgmr.msra.gmra.mxu1 %vm358_vm2, %v5943_v15 }
  0xc9   : > { %7115 = vmatprep.mubr.msk.f32.mxu1 %vm7745_vm1, %v7744_v1  ;;  %7253 = vmatpush3.msk.msra.mxu1 %vm428_vm0, %v6066_v16 }
  0xca   : > { %6960 = vmatmul.mubr.msk.f32.gmra.mxu0 %vm358_vm2, %v5861_v10  ;;  %v5901_v10 = vld [vmem:[%s7844_s17 + $0x64] sm:$0xff] }
  0xcb   : > { %6962 = vmatprep.mubr.msk.f32.mxu0 %vm7745_vm1, %v7744_v1 }
  0xcc   : > { %7116 = vmatmul.mubr.msk.f32.gmra.mxu1 %vm358_vm2, %v5944_v17  ;;  %v5902_v17 = vld [vmem:[%s7844_s17 + $0x6c] sm:$0xff] }
  0xcd   : > { %7118 = vmatprep.mubr.msk.f32.mxu1 %vm7745_vm1, %v7744_v1 }
  0xce   : > { %6963 = vmatmul.mubr.msk.f32.gmra.mxu0 %vm358_vm2, %v5862_v11 }
  0xcf   : > { %6965 = vmatprep.mubr.msk.f32.mxu0 %vm7745_vm1, %v7744_v1 }
  0xd0   : > { %7119 = vmatmul.mubr.msk.f32.gmra.mxu1 %vm358_vm2, %v8222_v18 }
  0xd1   : > { %7121 = vmatprep.mubr.msk.f32.mxu1 %vm7745_vm1, %v7744_v1 }
  0xd2   : > { %6966 = vmatmul.mubr.msk.f32.gmra.mxu0 %vm358_vm2, %v5815_v19 }
  0xd3   : > { %7041 = vmatprep.mubr.msk.f32.mxu0 %vm7745_vm1, %v7744_v1 }
  0xd4   : > { %7122 = vmatmul.mubr.msk.f32.gmra.mxu1 %vm358_vm2, %v8233_v20 }
  0xd5   : > { %7124 = vmatprep.mubr.msk.f32.mxu1 %vm7745_vm1, %v7744_v1 }
  0xd6   : > { %v8249_v24 = vpop.f32.mrf.mxu0  ;;  %7042 = vmatmul.mubr.msk.f32.vlgmr.msra.gmra.mxu0 %vm358_vm2, %v5893_v21  ;;  %v760_v27 = vpop.f32.mrf.mxu1 }
  0xd7   : > { %7182 = vmatpush3.msk.msra.mxu0 %vm428_vm0, %v6016_v22  ;;  %7044 = vmatprep.mubr.msk.f32.mxu0 %vm7745_vm1, %v7744_v1  ;;  %v8366_v22 = vld [vmem:[%s7844_s17 + $0x8d] sm:$0xff] }
  0xd8   : > { %v6759_v26 = vpop.f32.mrf.mxu0  ;;  %7125 = vmatmul.mubr.msk.f32.gmra.mxu1 %vm358_vm2, %v8247_v23  ;;  %7323 = vmatprep.subr.mxu0 %v7744_v1  ;;  %v6836_v30 = vpop.f32.mrf.mxu1 }
  0xd9   : > { %7127 = vmatprep.mubr.msk.f32.mxu1 %vm7745_vm1, %v7744_v1  ;;  %v5903_v30 = vld [vmem:[%s7844_s17 + $0x74] sm:$0xff] }
  0xda   : > { %v8264_v29 = vpop.f32.mrf.mxu0  ;;  %7045 = vmatmul.mubr.msk.f32.gmra.mxu0 %vm358_vm2, %v5894_v25 }
  0xdb   : > { %7047 = vmatprep.mubr.msk.f32.mxu0 %vm7745_vm1, %v7744_v1  ;;  %v765_v33 = vpop.f32.mrf.mxu1 }
  0xdc   : > { %v6762_v32 = vpop.f32.mrf.mxu0  ;;  %7128 = vmatmul.mubr.msk.f32.gmra.mxu1 %vm358_vm2, %v8262_v28 }
  0xdd   : > { %7130 = vmatprep.mubr.msk.f32.mxu1 %vm7745_vm1, %v7744_v1  ;;  %v6839_v36 = vpop.f32.mrf.mxu1 }
  0xde   : > { %v508_v35 = vpop.f32.mrf.mxu0  ;;  %7048 = vmatmul.mubr.msk.f32.gmra.mxu0 %vm358_vm2, %v5895_v31 }
  0xdf   : > { %v8278_v37 = vadd.f32 %v760_v27, %v508_v35  ;;  %7050 = vmatprep.mubr.msk.f32.mxu0 %vm7745_vm1, %v7744_v1  ;;  %v770_v40 = vpop.f32.mrf.mxu1 }
  0xe0   : > { %v6765_v39 = vpop.f32.mrf.mxu0  ;;  %7131 = vmatmul.mubr.msk.f32.gmra.mxu1 %vm358_vm2, %v8275_v34 }
  0xe1   : > { %7133 = vmatprep.mubr.msk.f32.mxu1 %vm7745_vm1, %v7744_v1  ;;  %v6842_v43 = vpop.f32.mrf.mxu1  ;;  %v5904_v39 = vld [vmem:[%s7844_s17 + $0x7c] sm:$0xff] }
  0xe2   : > { %v513_v42 = vpop.f32.mrf.mxu0  ;;  %7051 = vmatmul.mubr.msk.f32.gmra.mxu0 %vm358_vm2, %v5896_v38  ;;  %v8392_v43 = vld [vmem:[%s7844_s17 + $0x9d] sm:$0xff] }
  0xe3   : > { %v8291_v44 = vadd.f32 %v765_v33, %v513_v42  ;;  %7053 = vmatprep.mubr.msk.f32.mxu0 %vm7745_vm1, %v7744_v1  ;;  %v775_v47 = vpop.f32.mrf.mxu1  ;;  %v8379_v33 = vld [vmem:[%s7844_s17 + $0x95] sm:$0xff] }
  0xe4   : > { %v6768_v46 = vpop.f32.mrf.mxu0  ;;  %7134 = vmatmul.mubr.msk.f32.gmra.mxu1 %vm358_vm2, %v8288_v41 }
  0xe5   : > { %7136 = vmatprep.mubr.msk.f32.mxu1 %vm7745_vm1, %v7744_v1  ;;  %v6845_v50 = vpop.f32.mrf.mxu1 }
  0xe6   : > { %v518_v49 = vpop.f32.mrf.mxu0  ;;  %7054 = vmatmul.mubr.msk.f32.gmra.mxu0 %vm358_vm2, %v5897_v45 }
  0xe7   : > { %v8304_v51 = vadd.f32 %v770_v40, %v518_v49  ;;  %7056 = vmatprep.mubr.msk.f32.mxu0 %vm7745_vm1, %v7744_v1  ;;  %v780_v54 = vpop.f32.mrf.mxu1  ;;  %v5905_v49 = vld [vmem:[%s7844_s17 + $0x84] sm:$0xff] }
  0xe8   : > { %v6771_v53 = vpop.f32.mrf.mxu0  ;;  %7137 = vmatmul.mubr.msk.f32.gmra.mxu1 %vm358_vm2, %v8301_v48 }
  0xe9   : > { %7139 = vmatprep.mubr.msk.f32.mxu1 %vm7745_vm1, %v7744_v1  ;;  %v6848_v57 = vpop.f32.mrf.mxu1  ;;  %v8405_v53 = vld [vmem:[%s7844_s17 + $0xa5] sm:$0xff] }
  0xea   : > { %v523_v56 = vpop.f32.mrf.mxu0  ;;  %7057 = vmatmul.mubr.msk.f32.gmra.mxu0 %vm358_vm2, %v5898_v52 }
  0xeb   : > { %v8317_v58 = vadd.f32 %v775_v47, %v523_v56  ;;  %7059 = vmatprep.mubr.msk.f32.mxu0 %vm7745_vm1, %v7744_v1  ;;  %v785_v61 = vpop.f32.mrf.mxu1 }
  0xec   : > { %v6774_v60 = vpop.f32.mrf.mxu0  ;;  %7140 = vmatmul.mubr.msk.f32.gmra.mxu1 %vm358_vm2, %v8314_v55 }
  0xed   : > { %7142 = vmatprep.mubr.msk.f32.mxu1 %vm7745_vm1, %v7744_v1  ;;  %v6851_v0 = vpop.f32.mrf.mxu1 }
  0xee   : > { %v528_v63 = vpop.f32.mrf.mxu0  ;;  %7060 = vmatmul.mubr.msk.f32.gmra.mxu0 %vm358_vm2, %v5899_v59  ;;  %v5906_v59 = vld [vmem:[%s7844_s17 + $0x8c] sm:$0xff] }
  0xef   : > { %v8330_v2 = vadd.f32 %v780_v54, %v528_v63  ;;  %7062 = vmatprep.mubr.msk.f32.mxu0 %vm7745_vm1, %v7744_v1  ;;  %v790_v5 = vpop.f32.mrf.mxu1  ;;  %v8418_v63 = vld [vmem:[%s7844_s17 + $0xad] sm:$0xff] }
  0xf0   : > { %v6777_v4 = vpop.f32.mrf.mxu0  ;;  %7143 = vmatmul.mubr.msk.f32.gmra.mxu1 %vm358_vm2, %v8327_v62 }
  0xf1   : > { %7145 = vmatprep.mubr.msk.f32.mxu1 %vm7745_vm1, %v7744_v1  ;;  %v6854_v8 = vpop.f32.mrf.mxu1 }
  0xf2   : > { %v533_v7 = vpop.f32.mrf.mxu0  ;;  %7063 = vmatmul.mubr.msk.f32.gmra.mxu0 %vm358_vm2, %v5900_v3 }
  0xf3   : > { %v8343_v9 = vadd.f32 %v785_v61, %v533_v7  ;;  %7065 = vmatprep.mubr.msk.f32.mxu0 %vm7745_vm1, %v7744_v1  ;;  %v795_v12 = vpop.f32.mrf.mxu1 }
  0xf4   : > { %v6780_v11 = vpop.f32.mrf.mxu0  ;;  %7146 = vmatmul.mubr.msk.f32.gmra.mxu1 %vm358_vm2, %v8340_v6 }
  0xf5   : > { %7148 = vmatprep.mubr.msk.f32.mxu1 %vm7745_vm1, %v7744_v1  ;;  %v6857_v15 = vpop.f32.mrf.mxu1 }
  0xf6   : > { %v538_v14 = vpop.f32.mrf.mxu0  ;;  %7066 = vmatmul.mubr.msk.f32.gmra.mxu0 %vm358_vm2, %v5901_v10  ;;  %v8431_v10 = vld [vmem:[%s7844_s17 + $0xb5] sm:$0xff] }
  0xf7   : > { %v8356_v16 = vadd.f32 %v790_v5, %v538_v14  ;;  %7068 = vmatprep.mubr.msk.f32.mxu0 %vm7745_vm1, %v7744_v1  ;;  %v800_v21 = vpop.f32.mrf.mxu1  ;;  %v5907_v5 = vld [vmem:[%s7844_s17 + $0x94] sm:$0xff]  ;;  %v5908_v15 = vld [vmem:[%s7844_s17 + $0x9c] sm:$0xff] }
  0xf8   : > { %v6783_v19 = vpop.f32.mrf.mxu0  ;;  %7149 = vmatmul.mubr.msk.f32.gmra.mxu1 %vm358_vm2, %v8353_v13 }
  0xf9   : > { %7151 = vmatprep.mubr.msk.f32.mxu1 %vm7745_vm1, %v7744_v1  ;;  %v6860_v26 = vpop.f32.mrf.mxu1 }
  0xfa   : > { %v543_v25 = vpop.f32.mrf.mxu0  ;;  %7069 = vmatmul.mubr.msk.f32.gmra.mxu0 %vm358_vm2, %v5902_v17 }
  0xfb   : > { %v8369_v27 = vadd.f32 %v795_v12, %v543_v25  ;;  %7071 = vmatprep.mubr.msk.f32.mxu0 %vm7745_vm1, %v7744_v1  ;;  %v805_v32 = vpop.f32.mrf.mxu1 }
  0xfc   : > { %v6786_v31 = vpop.f32.mrf.mxu0  ;;  %7152 = vmatmul.mubr.msk.f32.gmra.mxu1 %vm358_vm2, %v8366_v22 }
  0xfd   : > { %7154 = vmatprep.mubr.msk.f32.mxu1 %vm7745_vm1, %v7744_v1  ;;  %v6863_v36 = vpop.f32.mrf.mxu1  ;;  %v5909_v31 = vld [vmem:[%s7844_s17 + $0xa4] sm:$0xff] }
  0xfe   : > { %v548_v35 = vpop.f32.mrf.mxu0  ;;  %7072 = vmatmul.mubr.msk.f32.gmra.mxu0 %vm358_vm2, %v5903_v30  ;;  %v8457_v36 = vld [vmem:[%s7844_s17 + $0xc5] sm:$0xff] }
  0xff   : > { %v8382_v38 = vadd.f32 %v800_v21, %v548_v35  ;;  %7074 = vmatprep.mubr.msk.f32.mxu0 %vm7745_vm1, %v7744_v1  ;;  %v810_v42 = vpop.f32.mrf.mxu1  ;;  %v8444_v21 = vld [vmem:[%s7844_s17 + $0xbd] sm:$0xff] }
 0x100   : > { %v6789_v40 = vpop.f32.mrf.mxu0  ;;  %7155 = vmatmul.mubr.msk.f32.gmra.mxu1 %vm358_vm2, %v8379_v33 }
 0x101   : > { %7157 = vmatprep.mubr.msk.f32.mxu1 %vm7745_vm1, %v7744_v1  ;;  %v6866_v46 = vpop.f32.mrf.mxu1 }
 0x102   : > { %v553_v45 = vpop.f32.mrf.mxu0  ;;  %7075 = vmatmul.mubr.msk.f32.gmra.mxu0 %vm358_vm2, %v5904_v39 }
 0x103   : > { %v8395_v47 = vadd.f32 %v805_v32, %v553_v45  ;;  %7077 = vmatprep.mubr.msk.f32.mxu0 %vm7745_vm1, %v7744_v1  ;;  %v815_v52 = vpop.f32.mrf.mxu1  ;;  %v5910_v45 = vld [vmem:[%s7844_s17 + $0xac] sm:$0xff] }
 0x104   : > { %v6792_v50 = vpop.f32.mrf.mxu0  ;;  %7158 = vmatmul.mubr.msk.f32.gmra.mxu1 %vm358_vm2, %v8392_v43 }
 0x105   : > { %7160 = vmatprep.mubr.msk.f32.mxu1 %vm7745_vm1, %v7744_v1  ;;  %v6869_v56 = vpop.f32.mrf.mxu1  ;;  %v8470_v50 = vld [vmem:[%s7844_s17 + $0xcd] sm:$0xff] }
 0x106   : > { %v558_v54 = vpop.f32.mrf.mxu0  ;;  %7078 = vmatmul.mubr.msk.f32.gmra.mxu0 %vm358_vm2, %v5905_v49 }
 0x107   : > { %v8408_v57 = vadd.f32 %v810_v42, %v558_v54  ;;  %7080 = vmatprep.mubr.msk.f32.mxu0 %vm7745_vm1, %v7744_v1  ;;  %v820_v61 = vpop.f32.mrf.mxu1 }
 0x108   : > { %v6795_v60 = vpop.f32.mrf.mxu0  ;;  %7161 = vmatmul.mubr.msk.f32.gmra.mxu1 %vm358_vm2, %v8405_v53 }
 0x109   : > { %7163 = vmatprep.mubr.msk.f32.mxu1 %vm7745_vm1, %v7744_v1  ;;  %v6872_v3 = vpop.f32.mrf.mxu1 }
 0x10a   : > { %v563_v0 = vpop.f32.mrf.mxu0  ;;  %7081 = vmatmul.mubr.msk.f32.gmra.mxu0 %vm358_vm2, %v5906_v59  ;;  %v5911_v59 = vld [vmem:[%s7844_s17 + $0xb4] sm:$0xff] }
 0x10b   : > { %v8421_v4 = vadd.f32 %v815_v52, %v563_v0  ;;  %7083 = vmatprep.mubr.msk.f32.mxu0 %vm7745_vm1, %v7744_v1  ;;  %v825_v8 = vpop.f32.mrf.mxu1  ;;  %v5965_v0 = vld [vmem:[%s7844_s17 + $0xd5] sm:$0xf] }
 0x10c   : > { %v6798_v7 = vpop.f32.mrf.mxu0  ;;  %7164 = vmatmul.mubr.msk.f32.gmra.mxu1 %vm358_vm2, %v8418_v63 }
 0x10d   : > { %7166 = vmatprep.mubr.msk.f32.mxu1 %vm7745_vm1, %v7744_v1  ;;  %v6875_v12 = vpop.f32.mrf.mxu1 }
 0x10e   : > { %v568_v11 = vpop.f32.mrf.mxu0  ;;  %7084 = vmatmul.mubr.msk.f32.gmra.mxu0 %vm358_vm2, %v5907_v5 }
 0x10f   : > { %v8434_v14 = vadd.f32 %v820_v61, %v568_v11  ;;  %7086 = vmatprep.mubr.msk.f32.mxu0 %vm7745_vm1, %v7744_v1  ;;  %v830_v19 = vpop.f32.mrf.mxu1 }
 0x110   : > { %v6801_v17 = vpop.f32.mrf.mxu0  ;;  %7167 = vmatmul.mubr.msk.f32.gmra.mxu1 %vm358_vm2, %v8431_v10 }
 0x111   : > { %7169 = vmatprep.mubr.msk.f32.mxu1 %vm7745_vm1, %v7744_v1  ;;  %v6878_v26 = vpop.f32.mrf.mxu1 }
 0x112   : > { %v573_v25 = vpop.f32.mrf.mxu0  ;;  %7087 = vmatmul.mubr.msk.f32.gmra.mxu0 %vm358_vm2, %v5908_v15  ;;  %v6043_v15 = vld [vmem:[%s7844_s17 + $0x36] sm:$0xff]  ;;  %v5913_v26 = vld [vmem:[%s7844_s17 + $0xc4] sm:$0xff] }
 0x113   : > { %v8447_v30 = vadd.f32 %v825_v8, %v573_v25  ;;  %7089 = vmatprep.mubr.msk.f32.mxu0 %vm7745_vm1, %v7744_v1  ;;  %v835_v35 = vpop.f32.mrf.mxu1  ;;  %v5912_v8 = vld [vmem:[%s7844_s17 + $0xbc] sm:$0xff] }
 0x114   : > { %v6804_v32 = vpop.f32.mrf.mxu0  ;;  %7170 = vmatmul.mubr.msk.f32.gmra.mxu1 %vm358_vm2, %v8444_v21 }
 0x115   : > { %7172 = vmatprep.mubr.msk.f32.mxu1 %vm7745_vm1, %v7744_v1  ;;  %v6881_v40 = vpop.f32.mrf.mxu1 }
 0x116   : > { %v578_v39 = vpop.f32.mrf.mxu0  ;;  %7090 = vmatmul.mubr.msk.f32.gmra.mxu0 %vm358_vm2, %v5909_v31 }
 0x117   : > { %v8460_v42 = vadd.f32 %v830_v19, %v578_v39  ;;  %7092 = vmatprep.mubr.msk.f32.mxu0 %vm7745_vm1, %v7744_v1  ;;  %v840_v49 = vpop.f32.mrf.mxu1 }
 0x118   : > { %v6807_v46 = vpop.f32.mrf.mxu0  ;;  %7173 = vmatmul.mubr.msk.f32.gmra.mxu1 %vm358_vm2, %v8457_v36 }
 0x119   : > { %7175 = vmatprep.mubr.msk.f32.mxu1 %vm7745_vm1, %v7744_v1  ;;  %v6884_v54 = vpop.f32.mrf.mxu1  ;;  %v5914_v46 = vld [vmem:[%s7844_s17 + $0xcc] sm:$0xff] }
 0x11a   : > { %v583_v52 = vpop.f32.mrf.mxu0  ;;  %7093 = vmatmul.mubr.msk.f32.gmra.mxu0 %vm358_vm2, %v5910_v45  ;;  %v6045_v54 = vld [vmem:[%s7844_s17 + $0x46] sm:$0xff] }
 0x11b   : > { %v8473_v56 = vadd.f32 %v835_v35, %v583_v52  ;;  %7095 = vmatprep.mubr.msk.f32.mxu0 %vm7745_vm1, %v7744_v1  ;;  %v845_v61 = vpop.f32.mrf.mxu1  ;;  %v6044_v35 = vld [vmem:[%s7844_s17 + $0x3e] sm:$0xff] }
 0x11c   : > { %v6810_v60 = vpop.f32.mrf.mxu0  ;;  %7176 = vmatmul.mubr.msk.f32.gmra.mxu1 %vm358_vm2, %v8470_v50 }
 0x11d   : > { %7178 = vmatprep.mubr.msk.f32.mxu1 %vm7745_vm1, %v7744_v1  ;;  %v6887_v5 = vpop.f32.mrf.mxu1 }
 0x11e   : > { %v588_v3 = vpop.f32.mrf.mxu0  ;;  %7096 = vmatmul.mubr.msk.f32.gmra.mxu0 %vm358_vm2, %v5911_v59 }
 0x11f   : > { %v8484_v7 = vadd.f32 %v840_v49, %v588_v3  ;;  %7098 = vmatprep.mubr.msk.f32.mxu0 %vm7745_vm1, %v7744_v1  ;;  %v850_v12 = vpop.f32.mrf.mxu1 }
 0x120   : > { %v6813_v11 = vpop.f32.mrf.mxu0  ;;  %7179 = vmatmul.mubr.msk.f32.gmra.mxu1 %vm358_vm2, %v5965_v0  ;;  %v5915_v0 = vld [vmem:[%s7844_s17 + $0xd4] sm:$0xf] }
 0x121   : > { %7254 = vmatprep.mubr.msk.f32.mxu1 %vm7745_vm1, %v7744_v1  ;;  %v6890_v19 = vpop.f32.mrf.mxu1 }
 0x122   : > { %v593_v17 = vpop.f32.mrf.mxu0  ;;  %7099 = vmatmul.mubr.msk.f32.gmra.mxu0 %vm358_vm2, %v5912_v8  ;;  %v6046_v8 = vld [vmem:[%s7844_s17 + $0x4e] sm:$0xff]  ;;  %v6116_v19 = vld [vmem:[%s9805_s2 + $0x20] sm:$0xf] }
 0x123   : > { %v8494_v25 = vadd.f32 %v845_v61, %v593_v17  ;;  %7101 = vmatprep.mubr.msk.f32.mxu0 %vm7745_vm1, %v7744_v1  ;;  %v855_v32 = vpop.f32.mrf.mxu1 }
 0x124   : > { %v6816_v31 = vpop.f32.mrf.mxu0  ;;  %7255 = vmatmul.mubr.msk.f32.vlgmr.msra.gmra.mxu1 %vm358_vm2, %v6043_v15 }
 0x125   : > { %7257 = vmatprep.mubr.msk.f32.mxu1 %vm7745_vm1, %v7744_v1  ;;  %v6893_v40 = vpop.f32.mrf.mxu1  ;;  %v6047_v31 = vld [vmem:[%s7844_s17 + $0x56] sm:$0xff] }
 0x126   : > { %v598_v39 = vpop.f32.mrf.mxu0  ;;  %7102 = vmatmul.mubr.msk.f32.gmra.mxu0 %vm358_vm2, %v5913_v26 }
 0x127   : > { %v8504_v45 = vadd.f32 %v850_v12, %v598_v39  ;;  %7104 = vmatprep.mubr.msk.f32.mxu0 %vm7745_vm1, %v7744_v1  ;;  %v860_v52 = vpop.f32.mrf.mxu1 }
 0x128   : > { %v6819_v49 = vpop.f32.mrf.mxu0  ;;  %7258 = vmatmul.mubr.msk.f32.gmra.mxu1 %vm358_vm2, %v6044_v35 }
 0x129   : > { %7260 = vmatprep.mubr.msk.f32.mxu1 %vm7745_vm1, %v7744_v1  ;;  %v6896_v60 = vpop.f32.mrf.mxu1 }
 0x12a   : > { %v603_v59 = vpop.f32.mrf.mxu0  ;;  %7105 = vmatmul.mubr.msk.f32.gmra.mxu0 %vm358_vm2, %v5914_v46  ;;  %v6048_v46 = vld [vmem:[%s7844_s17 + $0x5e] sm:$0xff]  ;;  %v6049_v60 = vld [vmem:[%s7844_s17 + $0x66] sm:$0xff] }
 0x12b   : > { %v8514_v61 = vadd.f32 %v855_v32, %v603_v59  ;;  %7107 = vmatprep.mubr.msk.f32.mxu0 %vm7745_vm1, %v7744_v1  ;;  %v1331_v5 = vpop.f32.mrf.mxu1 }
 0x12c   : > { %v6822_v3 = vpop.f32.mrf.mxu0  ;;  %7261 = vmatmul.mubr.msk.f32.gmra.mxu1 %vm358_vm2, %v6045_v54 }
 0x12d   : > { %7263 = vmatprep.mubr.msk.f32.mxu1 %vm7745_vm1, %v7744_v1  ;;  %v6972_v12 = vpop.f32.mrf.mxu1 }
 0x12e   : > { %v608_v11 = vpop.f32.mrf.mxu0  ;;  %7108 = vmatmul.mubr.msk.f32.gmra.mxu0 %vm358_vm2, %v5915_v0 }
 0x12f   : > { %v8524_v15 = vadd.f32 %v860_v52, %v608_v11  ;;  %7183 = vmatprep.mubr.msk.f32.mxu0 %vm7745_vm1, %v7744_v1  ;;  %v1336_v26 = vpop.f32.mrf.mxu1 }
 0x130   : > { %v6825_v17 = vpop.f32.mrf.mxu0  ;;  %7264 = vmatmul.mubr.msk.f32.gmra.mxu1 %vm358_vm2, %v6046_v8 }
 0x131   : > { %7266 = vmatprep.mubr.msk.f32.mxu1 %vm7745_vm1, %v7744_v1  ;;  %v6975_v35 = vpop.f32.mrf.mxu1  ;;  %v6050_v17 = vld [vmem:[%s7844_s17 + $0x6e] sm:$0xff] }
 0x132   : > { %v750_v32 = vpop.f32.mrf.mxu0  ;;  %7184 = vmatmul.mubr.msk.f32.vlgmr.msra.gmra.mxu0 %vm358_vm2, %v8222_v18 }
 0x133   : > { %7324 = vmatpush3.msk.msra.mxu0 %vm428_vm0, %v6116_v19  ;;  %7186 = vmatprep.mubr.msk.f32.mxu0 %vm7745_vm1, %v7744_v1  ;;  %v751_v59 = vadd.f32 %v750_v32, %v8249_v24 }
 0x134   : > { %v6830_v39 = vpop.f32.mrf.mxu0  ;;  %v1341_v40 = vpop.f32.mrf.mxu1  ;;  %7267 = vmatmul.mubr.msk.f32.gmra.mxu1 %vm358_vm2, %v6047_v31 }
 0x135   : > { %7269 = vmatprep.mubr.msk.f32.mxu1 %vm7745_vm1, %v7744_v1 }
 0x136   : > { %v755_v49 = vpop.f32.mrf.mxu0  ;;  %7187 = vmatmul.mubr.msk.f32.gmra.mxu0 %vm358_vm2, %v8233_v20  ;;  %v6978_v18 = vpop.f32.mrf.mxu1 }
 0x137   : > { %7189 = vmatprep.mubr.msk.f32.mxu0 %vm7745_vm1, %v7744_v1  ;;  %v756_v24 = vadd.f32 %v755_v49, %v8264_v29 }
 0x138   : > { %v6833_v52 = vpop.f32.mrf.mxu0  ;;  %v1346_v54 = vpop.f32.mrf.mxu1  ;;  %7270 = vmatmul.mubr.msk.f32.gmra.mxu1 %vm358_vm2, %v6048_v46 }
 0x139   : > { %7272 = vmatprep.mubr.msk.f32.mxu1 %vm7745_vm1, %v7744_v1  ;;  %v6052_v52 = vld [vmem:[%s7844_s17 + $0x7e] sm:$0xff] }
 0x13a   : > { %v1029_v0 = vpop.f32.mrf.mxu0  ;;  %7190 = vmatmul.mubr.msk.f32.gmra.mxu0 %vm358_vm2, %v8247_v23  ;;  %v6981_v20 = vpop.f32.mrf.mxu1 }
 0x13b   : > { %v1143_v3 = vadd.f32 %v1029_v0, %v751_v59  ;;  %7192 = vmatprep.mubr.msk.f32.mxu0 %vm7745_vm1, %v7744_v1  ;;  %v6053_v20 = vld [vmem:[%s7844_s17 + $0x86] sm:$0xff] }
 0x13c   : > { %v6901_v8 = vpop.f32.mrf.mxu0  ;;  %v1351_v11 = vpop.f32.mrf.mxu1  ;;  %7273 = vmatmul.mubr.msk.f32.gmra.mxu1 %vm358_vm2, %v6049_v60 }
 0x13d   : > { %v8559_v12 = vadd.f32 %v1331_v5, %v1143_v3  ;;  %7275 = vmatprep.mubr.msk.f32.mxu1 %vm7745_vm1, %v7744_v1  ;;  %v6051_v5 = vld [vmem:[%s7844_s17 + $0x76] sm:$0xff] }
 0x13e   : > { %v1034_v19 = vpop.f32.mrf.mxu0  ;;  %7193 = vmatmul.mubr.msk.f32.gmra.mxu0 %vm358_vm2, %v8262_v28  ;;  %v6984_v23 = vpop.f32.mrf.mxu1 }
 0x13f   : > { %v1144_v31 = vadd.f32 %v1034_v19, %v756_v24  ;;  %7195 = vmatprep.mubr.msk.f32.mxu0 %vm7745_vm1, %v7744_v1 }
 0x140   : > { %v6904_v32 = vpop.f32.mrf.mxu0  ;;  %v1356_v35 = vpop.f32.mrf.mxu1  ;;  %7276 = vmatmul.mubr.msk.f32.gmra.mxu1 %vm358_vm2, %v6050_v17  ;;  %v6145_v17 = vld [vmem:[%s8607_s20 + $0x24] sm:$0xff] }
 0x141   : > { %v8569_v29 = vadd.f32 %v1336_v26, %v1144_v31  ;;  %7278 = vmatprep.mubr.msk.f32.mxu1 %vm7745_vm1, %v7744_v1 }
 0x142   : > { %v1039_v39 = vpop.f32.mrf.mxu0  ;;  %7196 = vmatmul.mubr.msk.f32.gmra.mxu0 %vm358_vm2, %v8275_v34  ;;  %v6987_v28 = vpop.f32.mrf.mxu1 }
 0x143   : > { %v1145_v46 = vadd.f32 %v1039_v39, %v8278_v37  ;;  %7198 = vmatprep.mubr.msk.f32.mxu0 %vm7745_vm1, %v7744_v1  ;;  %v6146_v39 = vld [vmem:[%s8607_s20 + $0x2c] sm:$0xff] }
 0x144   : > { %v6907_v49 = vpop.f32.mrf.mxu0  ;;  %v1361_v18 = vpop.f32.mrf.mxu1  ;;  %7279 = vmatmul.mubr.msk.f32.gmra.mxu1 %vm358_vm2, %v6051_v5 }
 0x145   : > { %v8580_v26 = vadd.f32 %v1341_v40, %v1145_v46  ;;  %7281 = vmatprep.mubr.msk.f32.mxu1 %vm7745_vm1, %v7744_v1 }
 0x146   : > { %v1044_v59 = vpop.f32.mrf.mxu0  ;;  %7199 = vmatmul.mubr.msk.f32.gmra.mxu0 %vm358_vm2, %v8288_v41  ;;  %v6990_v34 = vpop.f32.mrf.mxu1 }
 0x147   : > { %v1146_v37 = vadd.f32 %v1044_v59, %v8291_v44  ;;  %7201 = vmatprep.mubr.msk.f32.mxu0 %vm7745_vm1, %v7744_v1  ;;  %v6056_v59 = vld [vmem:[%s7844_s17 + $0x9e] sm:$0xff] }
 0x148   : > { %v6910_v60 = vpop.f32.mrf.mxu0  ;;  %v1366_v0 = vpop.f32.mrf.mxu1  ;;  %7282 = vmatmul.mubr.msk.f32.gmra.mxu1 %vm358_vm2, %v6052_v52  ;;  %v6149_v34 = vld [vmem:[%s8607_s20 + $0x44] sm:$0xff] }
 0x149   : > { %v8591_v40 = vadd.f32 %v1346_v54, %v1146_v37  ;;  %7284 = vmatprep.mubr.msk.f32.mxu1 %vm7745_vm1, %v7744_v1 }
 0x14a   : > { %v1049_v3 = vpop.f32.mrf.mxu0  ;;  %7202 = vmatmul.mubr.msk.f32.gmra.mxu0 %vm358_vm2, %v8301_v48  ;;  %v6993_v41 = vpop.f32.mrf.mxu1  ;;  %v6054_v48 = vld [vmem:[%s7844_s17 + $0x8e] sm:$0xff] }
 0x14b   : > { %v1147_v44 = vadd.f32 %v1049_v3, %v8304_v51  ;;  %7204 = vmatprep.mubr.msk.f32.mxu0 %vm7745_vm1, %v7744_v1  ;;  %v7746_v51 = vmov 0   ;;  %v6057_v41 = vld [vmem:[%s7844_s17 + $0xa6] sm:$0xff] }
 0x14c   : > { %v6913_v8 = vpop.f32.mrf.mxu0  ;;  %v1371_v24 = vpop.f32.mrf.mxu1  ;;  %7285 = vmatmul.mubr.msk.f32.gmra.mxu1 %vm358_vm2, %v6053_v20  ;;  %7702 = vset.pattern.permute.xlu0 %v7746_v51 }
 0x14d   : > { %v8609_v54 = vadd.f32 %v1351_v11, %v1147_v44  ;;  %7287 = vmatprep.mubr.msk.f32.mxu1 %vm7745_vm1, %v7744_v1  ;;  %3109 = vperm.xlu0 %7702, %v6145_v17   ;;  %v6151_v44 = vld [vmem:[%s8607_s20 + $0x54] sm:$0xff] }
 0x14e   : > { %v1054_v19 = vpop.f32.mrf.mxu0  ;;  %7205 = vmatmul.mubr.msk.f32.gmra.mxu0 %vm358_vm2, %v8314_v55  ;;  %v6996_v23 = vpop.f32.mrf.mxu1  ;;  %7703 = vset.pattern.permute.xlu1 %v7746_v51  ;;  %v6055_v55 = vld [vmem:[%s7844_s17 + $0x96] sm:$0xff] }
 0x14f   : > { %v1148_v31 = vadd.f32 %v1054_v19, %v8317_v58  ;;  %7207 = vmatprep.mubr.msk.f32.mxu0 %vm7745_vm1, %v7744_v1  ;;  %v6058_v19 = vld [vmem:[%s7844_s17 + $0xae] sm:$0xff]  ;;  %v6153_v23 = vld [vmem:[%s8607_s20 + $0x64] sm:$0xff] }
 0x150   : > { %v6916_v11 = vpop.f32.mrf.mxu0  ;;  %v1376_v32 = vpop.f32.mrf.mxu1  ;;  %7288 = vmatmul.mubr.msk.f32.gmra.mxu1 %vm358_vm2, %v6054_v48 }
 0x151   : > { %v8621_v5 = vadd.f32 %v1356_v35, %v1148_v31  ;;  %7290 = vmatprep.mubr.msk.f32.mxu1 %vm7745_vm1, %v7744_v1  ;;  %3114 = vperm.xlu0 %7702, %v6146_v39  }
 0x152   : > { %v1059_v28 = vpop.f32.mrf.mxu0  ;;  %7208 = vmatmul.mubr.msk.f32.gmra.mxu0 %vm358_vm2, %v8327_v62  ;;  %v6999_v58 = vpop.f32.mrf.mxu1  ;;  %v6147_v62 = vld [vmem:[%s8607_s20 + $0x34] sm:$0xff] }
 0x153   : > { %v1149_v46 = vadd.f32 %v1059_v28, %v8330_v2  ;;  %7210 = vmatprep.mubr.msk.f32.mxu0 %vm7745_vm1, %v7744_v1  ;;  %3119 = vperm.xlu1 %7703, %v6147_v62   ;;  %v6059_v28 = vld [vmem:[%s7844_s17 + $0xb6] sm:$0xff] }
 0x154   : > { %v6919_v35 = vpop.f32.mrf.mxu0  ;;  %v1381_v49 = vpop.f32.mrf.mxu1  ;;  %7291 = vmatmul.mubr.msk.f32.gmra.mxu1 %vm358_vm2, %v6055_v55  ;;  %v6155_v58 = vld [vmem:[%s8607_s20 + $0x74] sm:$0xff] }
 0x155   : > { %v8633_v52 = vadd.f32 %v1361_v18, %v1149_v46  ;;  %7293 = vmatprep.mubr.msk.f32.mxu1 %vm7745_vm1, %v7744_v1  ;;  %3129 = vperm.xlu0 %7702, %v6149_v34   ;;  %v6060_v34 = vld [vmem:[%s7844_s17 + $0xbe] sm:$0xff] }
 0x156   : > { %v1064_v37 = vpop.f32.mrf.mxu0  ;;  %7211 = vmatmul.mubr.msk.f32.gmra.mxu0 %vm358_vm2, %v8340_v6  ;;  %v7002_v2 = vpop.f32.mrf.mxu1  ;;  %v6148_v6 = vld [vmem:[%s8607_s20 + $0x3c] sm:$0xff] }
 0x157   : > { %v1150_v60 = vadd.f32 %v1064_v37, %v8343_v9  ;;  %7213 = vmatprep.mubr.msk.f32.mxu0 %vm7745_vm1, %v7744_v1  ;;  %3124 = vperm.xlu1 %7703, %v6148_v6   ;;  %v6157_v37 = vld [vmem:[%s8607_s20 + $0x84] sm:$0xff] }
 0x158   : > { %v6922_v18 = vpop.f32.mrf.mxu0  ;;  %v1386_v20 = vpop.f32.mrf.mxu1  ;;  %7294 = vmatmul.mubr.msk.f32.gmra.mxu1 %vm358_vm2, %v6056_v59  ;;  %v6061_v6 = vld [vmem:[%s7844_s17 + $0xc6] sm:$0xff] }
 0x159   : > { %v8646_v3 = vadd.f32 %v1366_v0, %v1150_v60  ;;  %7296 = vmatprep.mubr.msk.f32.mxu1 %vm7745_vm1, %v7744_v1  ;;  %3139 = vperm.xlu0 %7702, %v6151_v44   ;;  %v6159_v44 = vld [vmem:[%s8607_s20 + $0x94] sm:$0xff] }
 0x15a   : > { %v1069_v9 = vpop.f32.mrf.mxu0  ;;  %7214 = vmatmul.mubr.msk.f32.gmra.mxu0 %vm358_vm2, %v8353_v13  ;;  %v7005_v8 = vpop.f32.mrf.mxu1  ;;  %v6150_v13 = vld [vmem:[%s8607_s20 + $0x4c] sm:$0xff] }
 0x15b   : > { %v1151_v48 = vadd.f32 %v1069_v9, %v8356_v16  ;;  %7216 = vmatprep.mubr.msk.f32.mxu0 %vm7745_vm1, %v7744_v1  ;;  %3134 = vperm.xlu1 %7703, %v6150_v13   ;;  %v6161_v13 = vld [vmem:[%s8607_s20 + $0xa4] sm:$0xff] }
 0x15c   : > { %v6925_v0 = vpop.f32.mrf.mxu0  ;;  %v1391_v51 = vpop.f32.mrf.mxu1  ;;  %7297 = vmatmul.mubr.msk.f32.gmra.mxu1 %vm358_vm2, %v6057_v41 }
 0x15d   : > { %v8659_v17 = vadd.f32 %v1371_v24, %v1151_v48  ;;  %7299 = vmatprep.mubr.msk.f32.mxu1 %vm7745_vm1, %v7744_v1  ;;  %3149 = vperm.xlu0 %7702, %v6153_v23  }
 0x15e   : > { %v1074_v16 = vpop.f32.mrf.mxu0  ;;  %7217 = vmatmul.mubr.msk.f32.gmra.mxu0 %vm358_vm2, %v8366_v22  ;;  %v7008_v31 = vpop.f32.mrf.mxu1  ;;  %v6152_v22 = vld [vmem:[%s8607_s20 + $0x5c] sm:$0xff] }
 0x15f   : > { %v1152_v11 = vadd.f32 %v1074_v16, %v8369_v27  ;;  %7219 = vmatprep.mubr.msk.f32.mxu0 %vm7745_vm1, %v7744_v1  ;;  %3144 = vperm.xlu1 %7703, %v6152_v22  }
 0x160   : > { %v6928_v24 = vpop.f32.mrf.mxu0  ;;  %v1396_v55 = vpop.f32.mrf.mxu1  ;;  %7300 = vmatmul.mubr.msk.f32.gmra.mxu1 %vm358_vm2, %v6058_v19  ;;  %v6062_v19 = vld [vmem:[%s7844_s17 + $0xce] sm:$0xff] }
 0x161   : > { %v8672_v39 = vadd.f32 %v1376_v32, %v1152_v11  ;;  %7302 = vmatprep.mubr.msk.f32.mxu1 %vm7745_vm1, %v7744_v1  ;;  %3159 = vperm.xlu0 %7702, %v6155_v58   ;;  %v6063_v24 = vld [vmem:[%s7844_s17 + $0xd6] sm:$0xff] }
 0x162   : > { %v1079_v27 = vpop.f32.mrf.mxu0  ;;  %7220 = vmatmul.mubr.msk.f32.gmra.mxu0 %vm358_vm2, %v8379_v33  ;;  %v7011_v46 = vpop.f32.mrf.mxu1  ;;  %v6154_v33 = vld [vmem:[%s8607_s20 + $0x6c] sm:$0xff] }
 0x163   : > { %v1153_v35 = vadd.f32 %v1079_v27, %v8382_v38  ;;  %7222 = vmatprep.mubr.msk.f32.mxu0 %vm7745_vm1, %v7744_v1  ;;  %3154 = vperm.xlu1 %7703, %v6154_v33  }
 0x164   : > { %v6931_v32 = vpop.f32.mrf.mxu0  ;;  %v1401_v59 = vpop.f32.mrf.mxu1  ;;  %7303 = vmatmul.mubr.msk.f32.gmra.mxu1 %vm358_vm2, %v6059_v28  ;;  %v6163_v28 = vld [vmem:[%s8607_s20 + $0xb4] sm:$0xff] }
 0x165   : > { %v8685_v62 = vadd.f32 %v1381_v49, %v1153_v35  ;;  %7305 = vmatprep.mubr.msk.f32.mxu1 %vm7745_vm1, %v7744_v1  ;;  %3169 = vperm.xlu0 %7702, %v6157_v37   ;;  %v6064_v35 = vld [vmem:[%s7844_s17 + $0xde] sm:$0xff] }
 0x166   : > { %v1084_v38 = vpop.f32.mrf.mxu0  ;;  %7223 = vmatmul.mubr.msk.f32.gmra.mxu0 %vm358_vm2, %v8392_v43  ;;  %v7014_v2 = vpop.f32.mrf.mxu1  ;;  %v6156_v43 = vld [vmem:[%s8607_s20 + $0x7c] sm:$0xff]  ;;  %v6165_v32 = vld [vmem:[%s8607_s20 + $0xc4] sm:$0xff] }
 0x167   : > { %v1154_v60 = vadd.f32 %v1084_v38, %v8395_v47  ;;  %7225 = vmatprep.mubr.msk.f32.mxu0 %vm7745_vm1, %v7744_v1  ;;  %3164 = vperm.xlu1 %7703, %v6156_v43   ;;  %v6065_v2 = vld [vmem:[%s7844_s17 + $0xe6] sm:$0xf] }
 0x168   : > { %v6934_v49 = vpop.f32.mrf.mxu0  ;;  %v1406_v18 = vpop.f32.mrf.mxu1  ;;  %7306 = vmatmul.mubr.msk.f32.gmra.mxu1 %vm358_vm2, %v6060_v34 }
 0x169   : > { %v8698_v41 = vadd.f32 %v1386_v20, %v1154_v60  ;;  %7308 = vmatprep.mubr.msk.f32.mxu1 %vm7745_vm1, %v7744_v1  ;;  %3179 = vperm.xlu0 %7702, %v6159_v44   ;;  %v6167_v60 = vld [vmem:[%s8607_s20 + $0xd4] sm:$0xf] }
 0x16a   : > { %v1089_v47 = vpop.f32.mrf.mxu0  ;;  %7226 = vmatmul.mubr.msk.f32.gmra.mxu0 %vm358_vm2, %v8405_v53  ;;  %v7017_v9 = vpop.f32.mrf.mxu1  ;;  %v6158_v53 = vld [vmem:[%s8607_s20 + $0x8c] sm:$0xff] }
 0x16b   : > { %v1155_v8 = vadd.f32 %v1089_v47, %v8408_v57  ;;  %7228 = vmatprep.mubr.msk.f32.mxu0 %vm7745_vm1, %v7744_v1  ;;  %3174 = vperm.xlu1 %7703, %v6158_v53   ;;  %v6166_v47 = vld [vmem:[%s8607_s20 + $0xcc] sm:$0xff] }
 0x16c   : > { %v6937_v20 = vpop.f32.mrf.mxu0  ;;  %v1411_v48 = vpop.f32.mrf.mxu1  ;;  %7309 = vmatmul.mubr.msk.f32.gmra.mxu1 %vm358_vm2, %v6061_v6 }
 0x16d   : > { %v8711_v0 = vadd.f32 %v1391_v51, %v1155_v8  ;;  %7311 = vmatprep.mubr.msk.f32.mxu1 %vm7745_vm1, %v7744_v1  ;;  %3189 = vperm.xlu0 %7702, %v6161_v13   ;;  %v6013_v8 = vld [vmem:[%s7844_s17 + $0xd5] sm:$0xff] }
 0x16e   : > { %v1094_v57 = vpop.f32.mrf.mxu0  ;;  %7229 = vmatmul.mubr.msk.f32.gmra.mxu0 %vm358_vm2, %v8418_v63  ;;  %v7020_v23 = vpop.f32.mrf.mxu1  ;;  %v6160_v63 = vld [vmem:[%s8607_s20 + $0x9c] sm:$0xff] }
 0x16f   : > { %v1156_v16 = vadd.f32 %v1094_v57, %v8421_v4  ;;  %7231 = vmatprep.mubr.msk.f32.mxu0 %vm7745_vm1, %v7744_v1  ;;  %3184 = vperm.xlu1 %7703, %v6160_v63   ;;  %v6015_v63 = vld [vmem:[%s7844_s17 + $0xe5] sm:$0xf] }
 0x170   : > { %v6940_v51 = vpop.f32.mrf.mxu0  ;;  %v1416_v31 = vpop.f32.mrf.mxu1  ;;  %7312 = vmatmul.mubr.msk.f32.gmra.mxu1 %vm358_vm2, %v6062_v19 }
 0x171   : > { %v8724_v11 = vadd.f32 %v1396_v55, %v1156_v16  ;;  %7314 = vmatprep.mubr.msk.f32.mxu1 %vm7745_vm1, %v7744_v1  ;;  %3199 = vperm.xlu0 %7702, %v6163_v28  }
 0x172   : > { %v1099_v4 = vpop.f32.mrf.mxu0  ;;  %7232 = vmatmul.mubr.msk.f32.gmra.mxu0 %vm358_vm2, %v8431_v10  ;;  %v7023_v22 = vpop.f32.mrf.mxu1  ;;  %v6162_v10 = vld [vmem:[%s8607_s20 + $0xac] sm:$0xff] }
 0x173   : > { %v1157_v58 = vadd.f32 %v1099_v4, %v8434_v14  ;;  %7234 = vmatprep.mubr.msk.f32.mxu0 %vm7745_vm1, %v7744_v1  ;;  %3194 = vperm.xlu1 %7703, %v6162_v10  }
 0x174   : > { %v6943_v55 = vpop.f32.mrf.mxu0  ;;  %v1421_v27 = vpop.f32.mrf.mxu1  ;;  %7315 = vmatmul.mubr.msk.f32.gmra.mxu1 %vm358_vm2, %v6063_v24 }
 0x175   : > { %v8737_v46 = vadd.f32 %v1401_v59, %v1157_v58  ;;  %7317 = vmatprep.mubr.msk.f32.mxu1 %vm7745_vm1, %v7744_v1  ;;  %3209 = vperm.xlu0 %7702, %v6165_v32  }
 0x176   : > { %v1104_v14 = vpop.f32.mrf.mxu0  ;;  %7235 = vmatmul.mubr.msk.f32.gmra.mxu0 %vm358_vm2, %v8444_v21  ;;  %v7026_v34 = vpop.f32.mrf.mxu1  ;;  %v6164_v21 = vld [vmem:[%s8607_s20 + $0xbc] sm:$0xff] }
 0x177   : > { %v1158_v33 = vadd.f32 %v1104_v14, %v8447_v30  ;;  %7237 = vmatprep.mubr.msk.f32.mxu0 %vm7745_vm1, %v7744_v1  ;;  %3204 = vperm.xlu1 %7703, %v6164_v21  }
 0x178   : > { %v6946_v59 = vpop.f32.mrf.mxu0  ;;  %v1426_v37 = vpop.f32.mrf.mxu1  ;;  %7318 = vmatmul.mubr.msk.f32.gmra.mxu1 %vm358_vm2, %v6064_v35 }
 0x179   : > { %v8750_v38 = vadd.f32 %v1406_v18, %v1158_v33  ;;  %7320 = vmatprep.mubr.msk.f32.mxu1 %vm7745_vm1, %v7744_v1  ;;  %3219 = vperm.xlu0 %7702, %v6167_v60   ;;  %v6094_v33 = vld [vmem:[%s7844_s17 + $0x3f] sm:$0xff] }
 0x17a   : > { %v1109_v49 = vpop.f32.mrf.mxu0  ;;  %7238 = vmatmul.mubr.msk.f32.gmra.mxu0 %vm358_vm2, %v8457_v36  ;;  %v7029_v30 = vpop.f32.mrf.mxu1 }
 0x17b   : > { %v1159_v6 = vadd.f32 %v1109_v49, %v8460_v42  ;;  %7240 = vmatprep.mubr.msk.f32.mxu0 %vm7745_vm1, %v7744_v1  ;;  %3214 = vperm.xlu1 %7703, %v6166_v47   ;;  %v6095_v49 = vld [vmem:[%s7844_s17 + $0x47] sm:$0xff] }
 0x17c   : > { %v6949_v18 = vpop.f32.mrf.mxu0  ;;  %v1431_v43 = vpop.f32.mrf.mxu1  ;;  %7321 = vmatmul.mubr.msk.f32.gmra.mxu1 %vm358_vm2, %v6065_v2 }
 0x17d   : > { %v8763_v44 = vadd.f32 %v1411_v48, %v1159_v6 }
 0x17e   : > { %v1114_v9 = vpop.f32.mrf.mxu0  ;;  %7241 = vmatmul.mubr.msk.f32.gmra.mxu0 %vm358_vm2, %v8470_v50  ;;  %v7032_v36 = vpop.f32.mrf.mxu1  ;;  %v6014_v50 = vld [vmem:[%s7844_s17 + $0xdd] sm:$0xff] }
 0x17f   : > { %v1160_v42 = vadd.f32 %v1114_v9, %v8473_v56  ;;  %7243 = vmatprep.mubr.msk.f32.mxu0 %vm7745_vm1, %v7744_v1  ;;  %v6096_v9 = vld [vmem:[%s7844_s17 + $0x4f] sm:$0xff] }
 0x180   : > { %v6952_v20 = vpop.f32.mrf.mxu0  ;;  %v1436_v19 = vpop.f32.mrf.mxu1 }
 0x181   : > { %v8772_v53 = vadd.f32 %v1416_v31, %v1160_v42 }
 0x182   : > { %v1119_v48 = vpop.f32.mrf.mxu0  ;;  %7244 = vmatmul.mubr.msk.f32.gmra.mxu0 %vm358_vm2, %v6013_v8  ;;  %v7035_v13 = vpop.f32.mrf.mxu1 }
 0x183   : > { %v1161_v57 = vadd.f32 %v1119_v48, %v8484_v7  ;;  %7246 = vmatprep.mubr.msk.f32.mxu0 %vm7745_vm1, %v7744_v1  ;;  %v6097_v48 = vld [vmem:[%s7844_s17 + $0x57] sm:$0xff] }
 0x184   : > { %v6955_v56 = vpop.f32.mrf.mxu0  ;;  %v1441_v23 = vpop.f32.mrf.mxu1 }
 0x185   : > { %v8779_v16 = vadd.f32 %v1421_v27, %v1161_v57  ;;  %v6093_v27 = vld [vmem:[%s7844_s17 + $0x37] sm:$0xff] }
 0x186   : > { %v1124_v51 = vpop.f32.mrf.mxu0  ;;  %7247 = vmatmul.mubr.msk.f32.gmra.mxu0 %vm358_vm2, %v6014_v50  ;;  %v7038_v31 = vpop.f32.mrf.mxu1 }
 0x187   : > { %v1162_v24 = vadd.f32 %v1124_v51, %v8494_v25  ;;  %7249 = vmatprep.mubr.msk.f32.mxu0 %vm7745_vm1, %v7744_v1  ;;  %v6098_v51 = vld [vmem:[%s7844_s17 + $0x5f] sm:$0xff] }
 0x188   : > { %v6958_v7 = vpop.f32.mrf.mxu0  ;;  %v1934_v28 = vpop.f32.mrf.mxu1 }
 0x189   : > { %v8786_v4 = vadd.f32 %v1426_v37, %v1162_v24 }
 0x18a   : > { %v1129_v22 = vpop.f32.mrf.mxu0  ;;  %7250 = vmatmul.mubr.msk.f32.gmra.mxu0 %vm358_vm2, %v6015_v63  ;;  %v7114_v58 = vpop.f32.mrf.mxu1 }
 0x18b   : > { %v1163_v55 = vadd.f32 %v1129_v22, %v8504_v45  ;;  %7325 = vmatprep.mubr.msk.f32.mxu0 %vm7745_vm1, %v7744_v1  ;;  %v6099_v22 = vld [vmem:[%s7844_s17 + $0x67] sm:$0xff] }
 0x18c   : > { %v6961_v25 = vpop.f32.mrf.mxu0  ;;  %v1939_v35 = vpop.f32.mrf.mxu1 }
 0x18d   : > { %v8793_v10 = vadd.f32 %v1431_v43, %v1163_v55 }
 0x18e   : > { %v1134_v32 = vpop.f32.mrf.mxu0  ;;  %7326 = vmatmul.mubr.msk.f32.vlgmr.msra.gmra.mxu0 %vm358_vm2, %v6093_v27  ;;  %v7117_v14 = vpop.f32.mrf.mxu1 }
 0x18f   : > { %v1164_v34 = vadd.f32 %v1134_v32, %v8514_v61  ;;  %7328 = vmatprep.mubr.msk.f32.mxu0 %vm7745_vm1, %v7744_v1  ;;  %v6100_v32 = vld [vmem:[%s7844_s17 + $0x6f] sm:$0xff] }
 0x190   : > { %v6964_v45 = vpop.f32.mrf.mxu0  ;;  %v1944_v59 = vpop.f32.mrf.mxu1 }
 0x191   : > { %v8800_v37 = vadd.f32 %v1436_v19, %v1164_v34 }
 0x192   : > { %v1139_v2 = vpop.f32.mrf.mxu0  ;;  %7329 = vmatmul.mubr.msk.f32.gmra.mxu0 %vm358_vm2, %v6094_v33  ;;  %v7120_v21 = vpop.f32.mrf.mxu1 }
 0x193   : > { %v1165_v60 = vadd.f32 %v1139_v2, %v8524_v15  ;;  %7331 = vmatprep.mubr.msk.f32.mxu0 %vm7745_vm1, %v7744_v1  ;;  %v6101_v2 = vld [vmem:[%s7844_s17 + $0x77] sm:$0xff] }
 0x194   : > { %v6967_v61 = vpop.f32.mrf.mxu0  ;;  %v1949_v30 = vpop.f32.mrf.mxu1 }
 0x195   : > { %v8807_v6 = vadd.f32 %v1441_v23, %v1165_v60 }
 0x196   : > { %v1632_v18 = vpop.f32.mrf.mxu0  ;;  %7332 = vmatmul.mubr.msk.f32.gmra.mxu0 %vm358_vm2, %v6095_v49  ;;  %v7123_v43 = vpop.f32.mrf.mxu1 }
 0x197   : > { %v1746_v47 = vadd.f32 %v1632_v18, %v8559_v12  ;;  %7334 = vmatprep.mubr.msk.f32.mxu0 %vm7745_vm1, %v7744_v1  ;;  %v6102_v43 = vld [vmem:[%s7844_s17 + $0x7f] sm:$0xff] }
 0x198   : > { %v7043_v15 = vpop.f32.mrf.mxu0  ;;  %v1954_v36 = vpop.f32.mrf.mxu1 }
 0x199   : > { %v8814_v42 = vadd.f32 %v1934_v28, %v1746_v47 }
 0x19a   : > { %v1637_v8 = vpop.f32.mrf.mxu0  ;;  %7335 = vmatmul.mubr.msk.f32.gmra.mxu0 %vm358_vm2, %v6096_v9  ;;  %v7126_v20 = vpop.f32.mrf.mxu1 }
 0x19b   : > { %v1747_v19 = vadd.f32 %v1637_v8, %v8569_v29  ;;  %7337 = vmatprep.mubr.msk.f32.mxu0 %vm7745_vm1, %v7744_v1  ;;  %v6103_v20 = vld [vmem:[%s7844_s17 + $0x87] sm:$0xff] }
 0x19c   : > { %v7046_v12 = vpop.f32.mrf.mxu0  ;;  %v1959_v13 = vpop.f32.mrf.mxu1 }
 0x19d   : > { %v8821_v57 = vadd.f32 %v1939_v35, %v1747_v19 }
 0x19e   : > { %v1642_v50 = vpop.f32.mrf.mxu0  ;;  %7338 = vmatmul.mubr.msk.f32.gmra.mxu0 %vm358_vm2, %v6097_v48  ;;  %v7129_v56 = vpop.f32.mrf.mxu1 }
 0x19f   : > { %v1748_v23 = vadd.f32 %v1642_v50, %v8580_v26  ;;  %7340 = vmatprep.mubr.msk.f32.mxu0 %vm7745_vm1, %v7744_v1  ;;  %v6104_v56 = vld [vmem:[%s7844_s17 + $0x8f] sm:$0xff] }
 0x1a0   : > { %v7049_v29 = vpop.f32.mrf.mxu0  ;;  %v1964_v31 = vpop.f32.mrf.mxu1 }
 0x1a1   : > { %v8828_v24 = vadd.f32 %v1944_v59, %v1748_v23 }
 0x1a2   : > { %v1647_v63 = vpop.f32.mrf.mxu0  ;;  %7341 = vmatmul.mubr.msk.f32.gmra.mxu0 %vm358_vm2, %v6098_v51  ;;  %v7132_v7 = vpop.f32.mrf.mxu1 }
 0x1a3   : > { %v1749_v28 = vadd.f32 %v1647_v63, %v8591_v40  ;;  %7343 = vmatprep.mubr.msk.f32.mxu0 %vm7745_vm1, %v7744_v1  ;;  %v6168_v40 = vld [vmem:[%s9808_s5 + $0x4] sm:$0xf]  ;;  %v6105_v7 = vld [vmem:[%s7844_s17 + $0x97] sm:$0xff] }
 0x1a4   : > { %v7052_v26 = vpop.f32.mrf.mxu0  ;;  %v1969_v58 = vpop.f32.mrf.mxu1  ;;  %7394 = vmatprep.subr.msk.mxu1 %vm428_vm0, %v6168_v40 }
 0x1a5   : > { %v8835_v55 = vadd.f32 %v1949_v30, %v1749_v28  ;;  %7395 = vmatpush3.msk.msra.mxu1 %vm428_vm0, %v6168_v40 }
 0x1a6   : > { %v1652_v27 = vpop.f32.mrf.mxu0  ;;  %7344 = vmatmul.mubr.msk.f32.gmra.mxu0 %vm358_vm2, %v6099_v22  ;;  %v7135_v25 = vpop.f32.mrf.mxu1 }
 0x1a7   : > { %v1750_v35 = vadd.f32 %v1652_v27, %v8609_v54  ;;  %7346 = vmatprep.mubr.msk.f32.mxu0 %vm7745_vm1, %v7744_v1  ;;  %v6106_v25 = vld [vmem:[%s7844_s17 + $0x9f] sm:$0xff] }
 0x1a8   : > { %v7055_v14 = vpop.f32.mrf.mxu0  ;;  %v1974_v34 = vpop.f32.mrf.mxu1 }
 0x1a9   : > { %v8846_v33 = vadd.f32 %v1954_v36, %v1750_v35 }
 0x1aa   : > { %v1657_v45 = vpop.f32.mrf.mxu0  ;;  %7347 = vmatmul.mubr.msk.f32.gmra.mxu0 %vm358_vm2, %v6100_v32  ;;  %v7138_v54 = vpop.f32.mrf.mxu1 }
 0x1ab   : > { %v1751_v59 = vadd.f32 %v1657_v45, %v8621_v5  ;;  %7349 = vmatprep.mubr.msk.f32.mxu0 %vm7745_vm1, %v7744_v1  ;;  %v6107_v45 = vld [vmem:[%s7844_s17 + $0xa7] sm:$0xff] }
 0x1ac   : > { %v7058_v21 = vpop.f32.mrf.mxu0  ;;  %v1979_v60 = vpop.f32.mrf.mxu1 }
 0x1ad   : > { %v8854_v49 = vadd.f32 %v1959_v13, %v1751_v59 }
 0x1ae   : > { %v1662_v61 = vpop.f32.mrf.mxu0  ;;  %7350 = vmatmul.mubr.msk.f32.gmra.mxu0 %vm358_vm2, %v6101_v2  ;;  %v7141_v30 = vpop.f32.mrf.mxu1 }
 0x1af   : > { %v1752_v18 = vadd.f32 %v1662_v61, %v8633_v52  ;;  %7352 = vmatprep.mubr.msk.f32.mxu0 %vm7745_vm1, %v7744_v1  ;;  %v6108_v61 = vld [vmem:[%s7844_s17 + $0xaf] sm:$0xff] }
 0x1b0   : > { %v7061_v5 = vpop.f32.mrf.mxu0  ;;  %v1984_v47 = vpop.f32.mrf.mxu1 }
 0x1b1   : > { %v8861_v9 = vadd.f32 %v1964_v31, %v1752_v18 }
 0x1b2   : > { %v1667_v15 = vpop.f32.mrf.mxu0  ;;  %7353 = vmatmul.mubr.msk.f32.gmra.mxu0 %vm358_vm2, %v6102_v43  ;;  %v7144_v36 = vpop.f32.mrf.mxu1 }
 0x1b3   : > { %v1753_v8 = vadd.f32 %v1667_v15, %v8646_v3  ;;  %7355 = vmatprep.mubr.msk.f32.mxu0 %vm7745_vm1, %v7744_v1  ;;  %v6109_v15 = vld [vmem:[%s7844_s17 + $0xb7] sm:$0xff] }
 0x1b4   : > { %v7064_v52 = vpop.f32.mrf.mxu0  ;;  %v1989_v19 = vpop.f32.mrf.mxu1 }
 0x1b5   : > { %v8868_v48 = vadd.f32 %v1969_v58, %v1753_v8 }
 0x1b6   : > { %v1672_v12 = vpop.f32.mrf.mxu0  ;;  %7356 = vmatmul.mubr.msk.f32.gmra.mxu0 %vm358_vm2, %v6103_v20  ;;  %v7147_v13 = vpop.f32.mrf.mxu1 }
 0x1b7   : > { %v1754_v50 = vadd.f32 %v1672_v12, %v8659_v17  ;;  %7358 = vmatprep.mubr.msk.f32.mxu0 %vm7745_vm1, %v7744_v1  ;;  %v6110_v12 = vld [vmem:[%s7844_s17 + $0xbf] sm:$0xff] }
 0x1b8   : > { %v7067_v3 = vpop.f32.mrf.mxu0  ;;  %v1994_v23 = vpop.f32.mrf.mxu1 }
 0x1b9   : > { %v8875_v51 = vadd.f32 %v1974_v34, %v1754_v50 }
 0x1ba   : > { %v1677_v29 = vpop.f32.mrf.mxu0  ;;  %7359 = vmatmul.mubr.msk.f32.gmra.mxu0 %vm358_vm2, %v6104_v56  ;;  %v7150_v31 = vpop.f32.mrf.mxu1 }
 0x1bb   : > { %v1755_v63 = vadd.f32 %v1677_v29, %v8672_v39  ;;  %7361 = vmatprep.mubr.msk.f32.mxu0 %vm7745_vm1, %v7744_v1  ;;  %v6111_v29 = vld [vmem:[%s7844_s17 + $0xc7] sm:$0xff] }
 0x1bc   : > { %v7070_v17 = vpop.f32.mrf.mxu0  ;;  %v1999_v28 = vpop.f32.mrf.mxu1 }
 0x1bd   : > { %v8882_v22 = vadd.f32 %v1979_v60, %v1755_v63 }
 0x1be   : > { %v1682_v26 = vpop.f32.mrf.mxu0  ;;  %7362 = vmatmul.mubr.msk.f32.gmra.mxu0 %vm358_vm2, %v6105_v7  ;;  %v7153_v58 = vpop.f32.mrf.mxu1 }
 0x1bf   : > { %v1756_v27 = vadd.f32 %v1682_v26, %v8685_v62  ;;  %7364 = vmatprep.mubr.msk.f32.mxu0 %vm7745_vm1, %v7744_v1  ;;  %v6112_v26 = vld [vmem:[%s7844_s17 + $0xcf] sm:$0xff] }
 0x1c0   : > { %v7073_v39 = vpop.f32.mrf.mxu0  ;;  %v2004_v35 = vpop.f32.mrf.mxu1 }
 0x1c1   : > { %v8889_v32 = vadd.f32 %v1984_v47, %v1756_v27 }
 0x1c2   : > { %v1687_v40 = vpop.f32.mrf.mxu0  ;;  %7365 = vmatmul.mubr.msk.f32.gmra.mxu0 %vm358_vm2, %v6106_v25  ;;  %v7156_v14 = vpop.f32.mrf.mxu1 }
 0x1c3   : > { %v1757_v34 = vadd.f32 %v1687_v40, %v8698_v41  ;;  %7367 = vmatprep.mubr.msk.f32.mxu0 %vm7745_vm1, %v7744_v1  ;;  %v6113_v40 = vld [vmem:[%s7844_s17 + $0xd7] sm:$0xff] }
 0x1c4   : > { %v7076_v62 = vpop.f32.mrf.mxu0  ;;  %v2009_v54 = vpop.f32.mrf.mxu1 }
 0x1c5   : > { %v8896_v59 = vadd.f32 %v1989_v19, %v1757_v34 }
 0x1c6   : > { %v1692_v2 = vpop.f32.mrf.mxu0  ;;  %7368 = vmatmul.mubr.msk.f32.gmra.mxu0 %vm358_vm2, %v6107_v45  ;;  %v7159_v21 = vpop.f32.mrf.mxu1 }
 0x1c7   : > { %v1758_v60 = vadd.f32 %v1692_v2, %v8711_v0  ;;  %7370 = vmatprep.mubr.msk.f32.mxu0 %vm7745_vm1, %v7744_v1  ;;  %v6114_v2 = vld [vmem:[%s7844_s17 + $0xdf] sm:$0xff] }
 0x1c8   : > { %v7079_v41 = vpop.f32.mrf.mxu0  ;;  %v2014_v30 = vpop.f32.mrf.mxu1 }
 0x1c9   : > { %v8903_v18 = vadd.f32 %v1994_v23, %v1758_v60 }
 0x1ca   : > { %v1697_v43 = vpop.f32.mrf.mxu0  ;;  %7371 = vmatmul.mubr.msk.f32.gmra.mxu0 %vm358_vm2, %v6108_v61  ;;  %v7162_v5 = vpop.f32.mrf.mxu1 }
 0x1cb   : > { %v1759_v47 = vadd.f32 %v1697_v43, %v8724_v11  ;;  %7373 = vmatprep.mubr.msk.f32.mxu0 %vm7745_vm1, %v7744_v1  ;;  %v6115_v43 = vld [vmem:[%s7844_s17 + $0xe7] sm:$0xf] }
 0x1cc   : > { %v7082_v0 = vpop.f32.mrf.mxu0  ;;  %v2019_v36 = vpop.f32.mrf.mxu1 }
 0x1cd   : > { %v8910_v8 = vadd.f32 %v1999_v28, %v1759_v47 }
 0x1ce   : > { %v1702_v20 = vpop.f32.mrf.mxu0  ;;  %7374 = vmatmul.mubr.msk.f32.gmra.mxu0 %vm358_vm2, %v6109_v15  ;;  %v7165_v52 = vpop.f32.mrf.mxu1 }
 0x1cf   : > { %v1760_v19 = vadd.f32 %v1702_v20, %v8737_v46  ;;  %7376 = vmatprep.mubr.msk.f32.mxu0 %vm7745_vm1, %v7744_v1 }
 0x1d0   : > { %v7085_v11 = vpop.f32.mrf.mxu0  ;;  %v2024_v13 = vpop.f32.mrf.mxu1 }
 0x1d1   : > { %v8917_v50 = vadd.f32 %v2004_v35, %v1760_v19 }
 0x1d2   : > { %v1707_v56 = vpop.f32.mrf.mxu0  ;;  %7377 = vmatmul.mubr.msk.f32.gmra.mxu0 %vm358_vm2, %v6110_v12  ;;  %v7168_v3 = vpop.f32.mrf.mxu1 }
 0x1d3   : > { %v1761_v23 = vadd.f32 %v1707_v56, %v8750_v38  ;;  %7379 = vmatprep.mubr.msk.f32.mxu0 %vm7745_vm1, %v7744_v1  ;;  %v6227_v3 = vld [vmem:[%s9808_s5 + $0xc] sm:$0xf] }
 0x1d4   : > { %v7088_v46 = vpop.f32.mrf.mxu0  ;;  %v2029_v31 = vpop.f32.mrf.mxu1  ;;  %7481 = vmatprep.subr.msk.mxu0 %vm428_vm0, %v6227_v3 }
 0x1d5   : > { %v8924_v63 = vadd.f32 %v2009_v54, %v1761_v23  ;;  %7482 = vmatpush3.msk.msra.mxu0 %vm428_vm0, %v6227_v3 }
 0x1d6   : > { %v1712_v7 = vpop.f32.mrf.mxu0  ;;  %7380 = vmatmul.mubr.msk.f32.gmra.mxu0 %vm358_vm2, %v6111_v29  ;;  %v7171_v17 = vpop.f32.mrf.mxu1 }
 0x1d7   : > { %v1762_v28 = vadd.f32 %v1712_v7, %v8763_v44  ;;  %7382 = vmatprep.mubr.msk.f32.mxu0 %vm7745_vm1, %v7744_v1 }
 0x1d8   : > { %v7091_v38 = vpop.f32.mrf.mxu0  ;;  %v2034_v58 = vpop.f32.mrf.mxu1 }
 0x1d9   : > { %v8931_v27 = vadd.f32 %v2014_v30, %v1762_v28 }
 0x1da   : > { %v1717_v25 = vpop.f32.mrf.mxu0  ;;  %7383 = vmatmul.mubr.msk.f32.gmra.mxu0 %vm358_vm2, %v6112_v26  ;;  %v7174_v39 = vpop.f32.mrf.mxu1 }
 0x1db   : > { %v1763_v35 = vadd.f32 %v1717_v25, %v8772_v53  ;;  %7385 = vmatprep.mubr.msk.f32.mxu0 %vm7745_vm1, %v7744_v1 }
 0x1dc   : > { %v7094_v44 = vpop.f32.mrf.mxu0  ;;  %v2039_v14 = vpop.f32.mrf.mxu1 }
 0x1dd   : > { %v8938_v34 = vadd.f32 %v2019_v36, %v1763_v35 }
 0x1de   : > { %v1722_v45 = vpop.f32.mrf.mxu0  ;;  %7386 = vmatmul.mubr.msk.f32.gmra.mxu0 %vm358_vm2, %v6113_v40  ;;  %v7177_v62 = vpop.f32.mrf.mxu1 }
 0x1df   : > { %v1764_v54 = vadd.f32 %v1722_v45, %v8779_v16  ;;  %7388 = vmatprep.mubr.msk.f32.mxu0 %vm7745_vm1, %v7744_v1 }
 0x1e0   : > { %v7097_v53 = vpop.f32.mrf.mxu0  ;;  %v2044_v21 = vpop.f32.mrf.mxu1 }
 0x1e1   : > { %v8945_v60 = vadd.f32 %v2024_v13, %v1764_v54 }
 0x1e2   : > { %v1727_v61 = vpop.f32.mrf.mxu0  ;;  %7389 = vmatmul.mubr.msk.f32.gmra.mxu0 %vm358_vm2, %v6114_v2  ;;  %v7180_v41 = vpop.f32.mrf.mxu1 }
 0x1e3   : > { %v1765_v30 = vadd.f32 %v1727_v61, %v8786_v4  ;;  %7391 = vmatprep.mubr.msk.f32.mxu0 %vm7745_vm1, %v7744_v1 }
 0x1e4   : > { %v7100_v5 = vpop.f32.mrf.mxu0  ;;  %v2538_v16 = vpop.f32.mrf.mxu1 }
 0x1e5   : > { %v8952_v47 = vadd.f32 %v2029_v31, %v1765_v30 }
 0x1e6   : > { %v1732_v15 = vpop.f32.mrf.mxu0  ;;  %7392 = vmatmul.mubr.msk.f32.gmra.mxu0 %vm358_vm2, %v6115_v43  ;;  %v7256_v0 = vpop.f32.mrf.mxu1 }
 0x1e7   : > { %v1766_v36 = vadd.f32 %v1732_v15, %v8793_v10 }
 0x1e8   : > { %v7103_v20 = vpop.f32.mrf.mxu0  ;;  %v2543_v52 = vpop.f32.mrf.mxu1 }
 0x1e9   : > { %v8956_v19 = vadd.f32 %v2034_v58, %v1766_v36 }
 0x1ea   : > { %v1737_v12 = vpop.f32.mrf.mxu0  ;;  %v7259_v4 = vpop.f32.mrf.mxu1 }
 0x1eb   : > { %v1767_v11 = vadd.f32 %v1737_v12, %v8800_v37 }
 0x1ec   : > { %v7106_v1 = vpop.f32.mrf.mxu0  ;;  %v2548_v13 = vpop.f32.mrf.mxu1 }
 0x1ed   : > { %v8959_v56 = vadd.f32 %v2039_v14, %v1767_v11 }
 0x1ee   : > { %v1742_v23 = vpop.f32.mrf.mxu0  ;;  %v7262_v29 = vpop.f32.mrf.mxu1 }
 0x1ef   : > { %v1768_v10 = vadd.f32 %v1742_v23, %v8807_v6 }
 0x1f0   : > { %v7109_v46 = vpop.f32.mrf.mxu0  ;;  %v2553_v31 = vpop.f32.mrf.mxu1 }
 0x1f1   : > { %v8967_v7 = vadd.f32 %v2044_v21, %v1768_v10 }
 0x1f2   : > { %v2236_v37 = vpop.f32.mrf.mxu0  ;;  %v7265_v17 = vpop.f32.mrf.mxu1 }
 0x1f3   : > { %v2350_v28 = vadd.f32 %v2236_v37, %v8814_v42 }
 0x1f4   : > { %v7185_v26 = vpop.f32.mrf.mxu0  ;;  %v2558_v38 = vpop.f32.mrf.mxu1 }
 0x1f5   : > { %v8970_v58 = vadd.f32 %v2538_v16, %v2350_v28 }
 0x1f6   : > { %v2241_v25 = vpop.f32.mrf.mxu0  ;;  %v7268_v39 = vpop.f32.mrf.mxu1 }
 0x1f7   : > { %v2351_v35 = vadd.f32 %v2241_v25, %v8821_v57 }
 0x1f8   : > { %v7188_v40 = vpop.f32.mrf.mxu0  ;;  %v2563_v6 = vpop.f32.mrf.mxu1 }
 0x1f9   : > { %v8973_v44 = vadd.f32 %v2543_v52, %v2351_v35 }
 0x1fa   : > { %v2246_v14 = vpop.f32.mrf.mxu0  ;;  %v7271_v45 = vpop.f32.mrf.mxu1 }
 0x1fb   : > { %v2352_v62 = vadd.f32 %v2246_v14, %v8828_v24 }
 0x1fc   : > { %v7191_v54 = vpop.f32.mrf.mxu0  ;;  %v2568_v2 = vpop.f32.mrf.mxu1 }
 0x1fd   : > { %v8976_v53 = vadd.f32 %v2548_v13, %v2352_v62 }
 0x1fe   : > { %v2251_v42 = vpop.f32.mrf.mxu0  ;;  %v7274_v21 = vpop.f32.mrf.mxu1 }
 0x1ff   : > { %v2353_v61 = vadd.f32 %v2251_v42, %v8835_v55 }
 0x200   : > { %v7194_v41 = vpop.f32.mrf.mxu0  ;;  %v2573_v30 = vpop.f32.mrf.mxu1 }
 0x201   : > { %v8979_v43 = vadd.f32 %v2553_v31, %v2353_v61 }
 0x202   : > { %v2256_v57 = vpop.f32.mrf.mxu0  ;;  %v7277_v5 = vpop.f32.mrf.mxu1 }
 0x203   : > { %v2354_v16 = vadd.f32 %v2256_v57, %v8846_v33  ;;  %v8991_v33 = vld [vmem:[%s9808_s5] sm:$0xf] }
 0x204   : > { %v7197_v15 = vpop.f32.mrf.mxu0  ;;  %v2578_v0 = vpop.f32.mrf.mxu1  ;;  %7423 = vmatprep.subr.msk.mxu1 %vm428_vm0, %v8991_v33 }
 0x205   : > { %v8982_v36 = vadd.f32 %v2558_v38, %v2354_v16 }
 0x206   : > { %v2261_v24 = vpop.f32.mrf.mxu0  ;;  %v7280_v20 = vpop.f32.mrf.mxu1 }
 0x207   : > { %v2355_v52 = vadd.f32 %v2261_v24, %v8854_v49 }
 0x208   : > { %v7200_v12 = vpop.f32.mrf.mxu0  ;;  %v2583_v4 = vpop.f32.mrf.mxu1 }
 0x209   : > { %v8985_v11 = vadd.f32 %v2563_v6, %v2355_v52 }
 0x20a   : > { %v2266_v55 = vpop.f32.mrf.mxu0  ;;  %v7283_v1 = vpop.f32.mrf.mxu1 }
 0x20b   : > { %v2356_v13 = vadd.f32 %v2266_v55, %v8861_v9 }
 0x20c   : > { %v7203_v3 = vpop.f32.mrf.mxu0  ;;  %v2588_v23 = vpop.f32.mrf.mxu1 }
 0x20d   : > { %v8993_v29 = vadd.f32 %v2568_v2, %v2356_v13 }
 0x20e   : > { %v2271_v49 = vpop.f32.mrf.mxu0  ;;  %v7286_v10 = vpop.f32.mrf.mxu1 }
 0x20f   : > { %v2357_v46 = vadd.f32 %v2271_v49, %v8868_v48 }
 0x210   : > { %v7206_v31 = vpop.f32.mrf.mxu0  ;;  %v2593_v37 = vpop.f32.mrf.mxu1 }
 0x211   : > { %v8998_v17 = vadd.f32 %v2573_v30, %v2357_v46 }
 0x212   : > { %v2276_v9 = vpop.f32.mrf.mxu0  ;;  %v7289_v28 = vpop.f32.mrf.mxu1 }
 0x213   : > { %v2358_v26 = vadd.f32 %v2276_v9, %v8875_v51 }
 0x214   : > { %v7209_v38 = vpop.f32.mrf.mxu0  ;;  %v2598_v25 = vpop.f32.mrf.mxu1 }
 0x215   : > { %v9001_v39 = vadd.f32 %v2578_v0, %v2358_v26 }
 0x216   : > { %v2281_v35 = vpop.f32.mrf.mxu0  ;;  %v7292_v40 = vpop.f32.mrf.mxu1 }
 0x217   : > { %v2359_v6 = vadd.f32 %v2281_v35, %v8882_v22 }
 0x218   : > { %v7212_v14 = vpop.f32.mrf.mxu0  ;;  %v2603_v45 = vpop.f32.mrf.mxu1 }
 0x219   : > { %v9004_v62 = vadd.f32 %v2583_v4, %v2359_v6 }
 0x21a   : > { %v2286_v48 = vpop.f32.mrf.mxu0  ;;  %v7295_v54 = vpop.f32.mrf.mxu1 }
 0x21b   : > { %v2360_v2 = vadd.f32 %v2286_v48, %v8889_v32 }
 0x21c   : > { %v7215_v42 = vpop.f32.mrf.mxu0  ;;  %v2608_v21 = vpop.f32.mrf.mxu1 }
 0x21d   : > { %v9007_v61 = vadd.f32 %v2588_v23, %v2360_v2 }
 0x21e   : > { %v2291_v51 = vpop.f32.mrf.mxu0  ;;  %v7298_v41 = vpop.f32.mrf.mxu1 }
 0x21f   : > { %v2361_v30 = vadd.f32 %v2291_v51, %v8896_v59 }
 0x220   : > { %v7218_v57 = vpop.f32.mrf.mxu0  ;;  %v2613_v5 = vpop.f32.mrf.mxu1 }
 0x221   : > { %v9010_v16 = vadd.f32 %v2593_v37, %v2361_v30 }
 0x222   : > { %v2296_v22 = vpop.f32.mrf.mxu0  ;;  %v7301_v15 = vpop.f32.mrf.mxu1 }
 0x223   : > { %v2362_v0 = vadd.f32 %v2296_v22, %v8903_v18 }
 0x224   : > { %v7221_v24 = vpop.f32.mrf.mxu0  ;;  %v2618_v20 = vpop.f32.mrf.mxu1 }
 0x225   : > { %v9013_v52 = vadd.f32 %v2598_v25, %v2362_v0 }
 0x226   : > { %v2301_v32 = vpop.f32.mrf.mxu0  ;;  %v7304_v12 = vpop.f32.mrf.mxu1 }
 0x227   : > { %v2363_v4 = vadd.f32 %v2301_v32, %v8910_v8  ;;  %v9027_v8 = vld [vmem:[%s9808_s5 + $0x14] sm:$0xf] }
 0x228   : > { %v7224_v55 = vpop.f32.mrf.mxu0  ;;  %v2623_v1 = vpop.f32.mrf.mxu1  ;;  %7539 = vmatprep.subr.msk.mxu0 %vm428_vm0, %v9027_v8 }
 0x229   : > { %v9016_v13 = vadd.f32 %v2603_v45, %v2363_v4 }
 0x22a   : > { %v2306_v59 = vpop.f32.mrf.mxu0  ;;  %v7307_v3 = vpop.f32.mrf.mxu1 }
 0x22b   : > { %v2364_v23 = vadd.f32 %v2306_v59, %v8917_v50 }
 0x22c   : > { %v7227_v49 = vpop.f32.mrf.mxu0  ;;  %v2628_v10 = vpop.f32.mrf.mxu1 }
 0x22d   : > { %v9019_v46 = vadd.f32 %v2608_v21, %v2364_v23 }
 0x22e   : > { %v2311_v18 = vpop.f32.mrf.mxu0  ;;  %v7310_v31 = vpop.f32.mrf.mxu1 }
 0x22f   : > { %v2365_v37 = vadd.f32 %v2311_v18, %v8924_v63  ;;  %v3110_v31 = vpop.permute.xlu0 %3109 }
 0x230   : > { %v7230_v9 = vpop.f32.mrf.mxu0  ;;  %v2633_v28 = vpop.f32.mrf.mxu1 }
 0x231   : > { %v9022_v26 = vadd.f32 %v2613_v5, %v2365_v37 }
 0x232   : > { %v2316_v38 = vpop.f32.mrf.mxu0  ;;  %v7313_v25 = vpop.f32.mrf.mxu1 }
 0x233   : > { %v2366_v50 = vadd.f32 %v2316_v38, %v8931_v27 }
 0x234   : > { %v7233_v35 = vpop.f32.mrf.mxu0  ;;  %v2638_v40 = vpop.f32.mrf.mxu1 }
 0x235   : > { %v9032_v6 = vadd.f32 %v2618_v20, %v2366_v50 }
 0x236   : > { %v2321_v63 = vpop.f32.mrf.mxu0  ;;  %v7316_v14 = vpop.f32.mrf.mxu1 }
 0x237   : > { %v2367_v45 = vadd.f32 %v2321_v63, %v8938_v34  ;;  %v3115_v14 = vpop.permute.xlu0 %3114 }
 0x238   : > { %v7236_v48 = vpop.f32.mrf.mxu0  ;;  %v2643_v54 = vpop.f32.mrf.mxu1 }
 0x239   : > { %v9035_v2 = vadd.f32 %v2623_v1, %v2367_v45 }
 0x23a   : > { %v2326_v42 = vpop.f32.mrf.mxu0  ;;  %v7319_v21 = vpop.f32.mrf.mxu1 }
 0x23b   : > { %v2368_v51 = vadd.f32 %v2326_v42, %v8945_v60  ;;  %v3120_v42 = vpop.permute.xlu1 %3119 }
 0x23c   : > { %v7239_v41 = vpop.f32.mrf.mxu0  ;;  %v2648_v30 = vpop.f32.mrf.mxu1 }
 0x23d   : > { %v9038_v57 = vadd.f32 %v2628_v10, %v2368_v51 }
 0x23e   : > { %v2331_v27 = vpop.f32.mrf.mxu0  ;;  %v7322_v5 = vpop.f32.mrf.mxu1 }
 0x23f   : > { %v2369_v22 = vadd.f32 %v2331_v27, %v8952_v47 }
 0x240   : > { %v7242_v15 = vpop.f32.mrf.mxu0 }
 0x241   : > { %v9041_v0 = vadd.f32 %v2633_v28, %v2369_v22 }
 0x242   : > { %v2336_v34 = vpop.f32.mrf.mxu0 }
 0x243   : > { %v2370_v24 = vadd.f32 %v2336_v34, %v8956_v19  ;;  %v9055_v19 = vld [vmem:[%s9806_s3] ss:$0 sm:$0xff] }
 0x244   : > { %v7245_v20 = vpop.f32.mrf.mxu0 }
 0x245   : > { %v9044_v32 = vadd.f32 %v2638_v40, %v2370_v24 }
 0x246   : > { %v2341_v12 = vpop.f32.mrf.mxu0 }
 0x247   : > { %v2371_v60 = vadd.f32 %v2341_v12, %v8959_v56  ;;  %v9061_v56 = vld [vmem:[%s9807_s4] ss:$0 sm:$0xff] }
 0x248   : > { %v7248_v4 = vpop.f32.mrf.mxu0 }
 0x249   : > { %v9047_v55 = vadd.f32 %v2643_v54, %v2371_v60 }
 0x24a   : > { %v2346_v1 = vpop.f32.mrf.mxu0 }
 0x24b   : > { %v2372_v59 = vadd.f32 %v2346_v1, %v8967_v7 }
 0x24c   : > { %v7251_v3 = vpop.f32.mrf.mxu0 }
 0x24d   : > { %v9050_v47 = vadd.f32 %v2648_v30, %v2372_v59 }
 0x24e   : > { %v2840_v23 = vpop.f32.mrf.mxu0 }
 0x24f   : > { %v2954_v49 = vadd.f32 %v2840_v23, %v8970_v58 }
 0x250   : > { %v7327_v10 = vpop.f32.mrf.mxu0 }
 0x251   : > { %v2984_v18 = vadd.f32 %v9055_v19, %v2954_v49  ;;  %v3130_v49 = vpop.permute.xlu0 %3129 }
 0x252   : > { %v2845_v7 = vpop.f32.mrf.mxu0 }
 0x253   : > { %vm3007_vm3 = vcmp.ge.f32.partialorder %v2984_v18, 0.0  ;;  %v3037_v37 = vmul.f32 %v9061_v56, %v2984_v18  ;;  %v2955_v9 = vadd.f32 %v2845_v7, %v8973_v44 }
 0x254   : > { %v7330_v28 = vpop.f32.mrf.mxu0 }
 0x255   : > { %v3060_v38 = vsel %vm3007_vm3, %v2984_v18, %v3037_v37  ;;  %v2985_v25 = vadd.f32 %v9055_v19, %v2955_v9 }
 0x256   : > { %v3222_v58 = vmul.f32 %v3110_v31, %v3060_v38  ;;  %v2850_v50 = vpop.f32.mrf.mxu0 }
 0x257   : > { %vm3008_vm4 = vcmp.ge.f32.partialorder %v2985_v25, 0.0  ;;  %v3038_v35 = vmul.f32 %v9061_v56, %v2985_v25  ;;  %v2956_v40 = vadd.f32 %v2850_v50, %v8976_v53 }
 0x258   : > { %3245 = vst.msk [vmem:[#allocation2 + $0x12] sm:$0xff] %vm358_vm2, %v3222_v58  ;;  %v7333_v63 = vpop.f32.mrf.mxu0 }
 0x259   : > { %v3061_v45 = vsel %vm3008_vm4, %v2985_v25, %v3038_v35  ;;  %v2986_v48 = vadd.f32 %v9055_v19, %v2956_v40 }
 0x25a   : > { %v3223_v54 = vmul.f32 %v3115_v14, %v3061_v45  ;;  %v2855_v44 = vpop.f32.mrf.mxu0  ;;  %v3140_v45 = vpop.permute.xlu0 %3139 }
 0x25b   : > { %vm3009_vm5 = vcmp.ge.f32.partialorder %v2986_v48, 0.0  ;;  %v3039_v21 = vmul.f32 %v9061_v56, %v2986_v48  ;;  %v2957_v51 = vadd.f32 %v2855_v44, %v8979_v43  ;;  %v3125_v43 = vpop.permute.xlu1 %3124 }
 0x25c   : > { %3246 = vst.msk [vmem:[#allocation2 + $0x1a] sm:$0xff] %vm358_vm2, %v3223_v54  ;;  %v7336_v41 = vpop.f32.mrf.mxu0 }
 0x25d   : > { %v3062_v30 = vsel %vm3009_vm5, %v2986_v48, %v3039_v21  ;;  %v2987_v53 = vadd.f32 %v9055_v19, %v2957_v51 }
 0x25e   : > { %v3224_v27 = vmul.f32 %v3120_v42, %v3062_v30  ;;  %v2860_v5 = vpop.f32.mrf.mxu0  ;;  %v9115_v30 = vld [vmem:[%s9808_s5 + $0x1c] sm:$0xf] }
 0x25f   : > { %vm3010_vm6 = vcmp.ge.f32.partialorder %v2987_v53, 0.0  ;;  %v3040_v22 = vmul.f32 %v9061_v56, %v2987_v53  ;;  %v2958_v15 = vadd.f32 %v2860_v5, %v8982_v36  ;;  %v3288_v34 = vld [vmem:[#allocation2 + $0x12] sm:$0xff]  ;;  %v9085_v36 = vld [vmem:[%s9808_s5 + $0x8] sm:$0xf]  ;;  %v3135_v38 = vpop.permute.xlu1 %3134 }
 0x260   : > { %3247 = vst.msk [vmem:[#allocation2 + $0x22] sm:$0xff] %vm358_vm2, %v3224_v27  ;;  %v7339_v24 = vpop.f32.mrf.mxu0  ;;  %7396 = vmatprep.mubr.msk.f32.mxu1 %vm358_vm2, %v3288_v34 }
 0x261   : > { %v3063_v20 = vsel %vm3010_vm6, %v2987_v53, %v3040_v22  ;;  %v2988_v12 = vadd.f32 %v9055_v19, %v2958_v15 }
 0x262   : > { %v3225_v60 = vmul.f32 %v3125_v43, %v3063_v20  ;;  %v2865_v4 = vpop.f32.mrf.mxu0 }
 0x263   : > { %vm3011_vm7 = vcmp.ge.f32.partialorder %v2988_v12, 0.0  ;;  %v3041_v1 = vmul.f32 %v9061_v56, %v2988_v12  ;;  %v2959_v59 = vadd.f32 %v2865_v4, %v8985_v11  ;;  %v3289_v3 = vld [vmem:[#allocation2 + $0x1a] sm:$0xff]  ;;  %v3145_v27 = vpop.permute.xlu1 %3144 }
 0x264   : > { %3248 = vst.msk [vmem:[#allocation2 + $0x2a] sm:$0xff] %vm358_vm2, %v3225_v60  ;;  %v7342_v23 = vpop.f32.mrf.mxu0  ;;  %7397 = vmatmul.mubr.msk.f32.vlgmr.msra.gmra.mxu1 %vm358_vm2, %v3289_v3 }
 0x265   : > { %v3064_v10 = vsel %vm3011_vm7, %v2988_v12, %v3041_v1  ;;  %v2989_v18 = vadd.f32 %v9055_v19, %v2959_v59  ;;  %7424 = vmatpush3.msk.msra.mxu1 %vm428_vm0, %v8991_v33 }
 0x266   : > { %v3226_v7 = vmul.f32 %v3130_v49, %v3064_v10  ;;  %v2870_v11 = vpop.f32.mrf.mxu0  ;;  %7452 = vmatprep.subr.msk.mxu1 %vm428_vm0, %v9085_v36 }
 0x267   : > { %vm3012_vm8 = vcmp.ge.f32.partialorder %v2989_v18, 0.0  ;;  %v3042_v31 = vmul.f32 %v9061_v56, %v2989_v18  ;;  %v2960_v37 = vadd.f32 %v2870_v11, %v8993_v29  ;;  %v3290_v9 = vld [vmem:[#allocation2 + $0x22] sm:$0xff] }
 0x268   : > { %3249 = vst.msk [vmem:[#allocation2 + $0x32] sm:$0xff] %vm358_vm2, %v3226_v7  ;;  %v7345_v28 = vpop.f32.mrf.mxu0  ;;  %7399 = vmatprep.mubr.msk.f32.mxu1 %vm358_vm2, %v3290_v9 }
 0x269   : > { %v3065_v25 = vsel %vm3012_vm8, %v2989_v18, %v3042_v31  ;;  %v2990_v33 = vadd.f32 %v9055_v19, %v2960_v37  ;;  %v3155_v18 = vpop.permute.xlu1 %3154 }
 0x26a   : > { %v3227_v58 = vmul.f32 %v3135_v38, %v3065_v25  ;;  %v2875_v50 = vpop.f32.mrf.mxu0 }
 0x26b   : > { %vm3013_vm9 = vcmp.ge.f32.partialorder %v2990_v33, 0.0  ;;  %v3043_v35 = vmul.f32 %v9061_v56, %v2990_v33  ;;  %v2961_v40 = vadd.f32 %v2875_v50, %v8998_v17  ;;  %v3291_v63 = vld [vmem:[#allocation2 + $0x2a] sm:$0xff] }
 0x26c   : > { %v9101_v14 = vld [vmem:[#allocation2 + $0x23] sm:$0xff]  ;;  %3250 = vst.msk [vmem:[#allocation2 + $0x3a] sm:$0xff] %vm358_vm2, %v3227_v58  ;;  %v7348_v29 = vpop.f32.mrf.mxu0  ;;  %7400 = vmatmul.mubr.msk.f32.gmra.mxu1 %vm358_vm2, %v3291_v63 }
 0x26d   : > { %7483 = vmatprep.mubr.msk.f32.mxu0 %vm358_vm2, %v9101_v14  ;;  %v3066_v48 = vsel %vm3013_vm9, %v2990_v33, %v3043_v35  ;;  %v2991_v54 = vadd.f32 %v9055_v19, %v2961_v40 }
 0x26e   : > { %v3228_v44 = vmul.f32 %v3140_v45, %v3066_v48  ;;  %v2880_v42 = vpop.f32.mrf.mxu0 }
 0x26f   : > { %vm3014_vm10 = vcmp.ge.f32.partialorder %v2991_v54, 0.0  ;;  %v3044_v17 = vmul.f32 %v9061_v56, %v2991_v54  ;;  %v2962_v21 = vadd.f32 %v2880_v42, %v9001_v39  ;;  %v3292_v51 = vld [vmem:[#allocation2 + $0x32] sm:$0xff] }
 0x270   : > { %v9110_v41 = vld [vmem:[#allocation2 + $0x2b] sm:$0xff]  ;;  %3251 = vst.msk [vmem:[#allocation2 + $0x42] sm:$0xff] %vm358_vm2, %v3228_v44  ;;  %v7351_v53 = vpop.f32.mrf.mxu0  ;;  %7402 = vmatprep.mubr.msk.f32.mxu1 %vm358_vm2, %v3292_v51 }
 0x271   : > { %7484 = vmatmul.mubr.msk.f32.vlgmr.msra.gmra.mxu0 %vm358_vm2, %v9110_v41  ;;  %v3067_v5 = vsel %vm3014_vm10, %v2991_v54, %v3044_v17  ;;  %v2992_v39 = vadd.f32 %v9055_v19, %v2962_v21  ;;  %v3165_v54 = vpop.permute.xlu1 %3164 }
 0x272   : > { %7540 = vmatpush3.msk.msra.mxu0 %vm428_vm0, %v9027_v8  ;;  %v3229_v22 = vmul.f32 %v3145_v27, %v3067_v5  ;;  %v2885_v15 = vpop.f32.mrf.mxu0  ;;  %v3150_v8 = vpop.permute.xlu0 %3149 }
 0x273   : > { %7597 = vmatprep.subr.msk.mxu0 %vm428_vm0, %v9115_v30  ;;  %vm3015_vm11 = vcmp.ge.f32.partialorder %v2992_v39, 0.0  ;;  %v3045_v34 = vmul.f32 %v9061_v56, %v2992_v39  ;;  %v2963_v24 = vadd.f32 %v2885_v15, %v9004_v62  ;;  %v3293_v43 = vld [vmem:[#allocation2 + $0x3a] sm:$0xff] }
 0x274   : > { %v9128_v20 = vld [vmem:[#allocation2 + $0x33] sm:$0xff]  ;;  %3252 = vst.msk [vmem:[#allocation2 + $0x4a] sm:$0xff] %vm358_vm2, %v3229_v22  ;;  %v7354_v12 = vpop.f32.mrf.mxu0  ;;  %7403 = vmatmul.mubr.msk.f32.gmra.mxu1 %vm358_vm2, %v3293_v43 }
 0x275   : > { %7486 = vmatprep.mubr.msk.f32.mxu0 %vm358_vm2, %v9128_v20  ;;  %v3068_v60 = vsel %vm3015_vm11, %v2992_v39, %v3045_v34  ;;  %v2993_v4 = vadd.f32 %v9055_v19, %v2963_v24 }
 0x276   : > { %v3230_v1 = vmul.f32 %v3150_v8, %v3068_v60  ;;  %v2890_v59 = vpop.f32.mrf.mxu0  ;;  %v3160_v33 = vpop.permute.xlu0 %3159 }
 0x277   : > { %vm3016_vm12 = vcmp.ge.f32.partialorder %v2993_v4, 0.0  ;;  %v3046_v62 = vmul.f32 %v9061_v56, %v2993_v4  ;;  %v2964_v3 = vadd.f32 %v2890_v59, %v9007_v61  ;;  %v3294_v23 = vld [vmem:[#allocation2 + $0x42] sm:$0xff] }
 0x278   : > { %v9137_v49 = vld [vmem:[#allocation2 + $0x3b] sm:$0xff]  ;;  %3253 = vst.msk [vmem:[#allocation2 + $0x52] sm:$0xff] %vm358_vm2, %v3230_v1  ;;  %v7357_v10 = vpop.f32.mrf.mxu0  ;;  %7405 = vmatprep.mubr.msk.f32.mxu1 %vm358_vm2, %v3294_v23 }
 0x279   : > { %7487 = vmatmul.mubr.msk.f32.gmra.mxu0 %vm358_vm2, %v9137_v49  ;;  %v3069_v7 = vsel %vm3016_vm12, %v2993_v4, %v3046_v62  ;;  %v2994_v11 = vadd.f32 %v9055_v19, %v2964_v3  ;;  %v3175_v4 = vpop.permute.xlu1 %3174  ;;  %vm3267_vm12 = vcmask 27648  }
 0x27a   : > { %v3231_v31 = vmul.f32 %v3155_v18, %v3069_v7  ;;  %v2895_v37 = vpop.f32.mrf.mxu0  ;;  %v3170_v39 = vpop.permute.xlu0 %3169 }
 0x27b   : > { %vm3017_vm13 = vcmp.ge.f32.partialorder %v2994_v11, 0.0  ;;  %v3047_v61 = vmul.f32 %v9061_v56, %v2994_v11  ;;  %v2965_v9 = vadd.f32 %v2895_v37, %v9010_v16  ;;  %v3295_v28 = vld [vmem:[#allocation2 + $0x4a] sm:$0xff] }
 0x27c   : > { %v9146_v38 = vld [vmem:[#allocation2 + $0x43] sm:$0xff]  ;;  %3254 = vst.msk [vmem:[#allocation2 + $0x5a] sm:$0xff] %vm358_vm2, %v3231_v31  ;;  %v7360_v25 = vpop.f32.mrf.mxu0  ;;  %7406 = vmatmul.mubr.msk.f32.gmra.mxu1 %vm358_vm2, %v3295_v28 }
 0x27d   : > { %7489 = vmatprep.mubr.msk.f32.mxu0 %vm358_vm2, %v9146_v38  ;;  %v3070_v58 = vsel %vm3017_vm13, %v2994_v11, %v3047_v61  ;;  %v2995_v50 = vadd.f32 %v9055_v19, %v2965_v9 }
 0x27e   : > { %v3232_v35 = vmul.f32 %v3160_v33, %v3070_v58  ;;  %v2900_v40 = vpop.f32.mrf.mxu0  ;;  %v3180_v11 = vpop.permute.xlu0 %3179 }
 0x27f   : > { %vm3018_vm14 = vcmp.ge.f32.partialorder %v2995_v50, 0.0  ;;  %v3048_v16 = vmul.f32 %v9061_v56, %v2995_v50  ;;  %v2966_v63 = vadd.f32 %v2900_v40, %v9013_v52  ;;  %v3296_v29 = vld [vmem:[#allocation2 + $0x52] sm:$0xff] }
 0x280   : > { %v9155_v45 = vld [vmem:[#allocation2 + $0x4b] sm:$0xff]  ;;  %3255 = vst.msk [vmem:[#allocation2 + $0x62] sm:$0xff] %vm358_vm2, %v3232_v35  ;;  %v7363_v48 = vpop.f32.mrf.mxu0  ;;  %7408 = vmatprep.mubr.msk.f32.mxu1 %vm358_vm2, %v3296_v29 }
 0x281   : > { %7490 = vmatmul.mubr.msk.f32.gmra.mxu0 %vm358_vm2, %v9155_v45  ;;  %v3071_v44 = vsel %vm3018_vm14, %v2995_v50, %v3048_v16  ;;  %v2996_v42 = vadd.f32 %v9055_v19, %v2966_v63  ;;  %v3185_v50 = vpop.permute.xlu1 %3184 }
 0x282   : > { %v3233_v17 = vmul.f32 %v3165_v54, %v3071_v44  ;;  %v2905_v21 = vpop.f32.mrf.mxu0 }
 0x283   : > { %vm3019_vm15 = vcmp.ge.f32.partialorder %v2996_v42, 0.0  ;;  %v3049_v52 = vmul.f32 %v9061_v56, %v2996_v42  ;;  %v2967_v51 = vadd.f32 %v2905_v21, %v9016_v13  ;;  %v3297_v53 = vld [vmem:[#allocation2 + $0x5a] sm:$0xff] }
 0x284   : > { %v9164_v27 = vld [vmem:[#allocation2 + $0x53] sm:$0xff]  ;;  %3256 = vst.msk [vmem:[#allocation2 + $0x6a] sm:$0xff] %vm358_vm2, %v3233_v17  ;;  %v7366_v5 = vpop.f32.mrf.mxu0  ;;  %7409 = vmatmul.mubr.msk.f32.gmra.mxu1 %vm358_vm2, %v3297_v53 }
 0x285   : > { %7492 = vmatprep.mubr.msk.f32.mxu0 %vm358_vm2, %v9164_v27  ;;  %v3072_v22 = vsel %vm3019_vm15, %v2996_v42, %v3049_v52  ;;  %v2997_v15 = vadd.f32 %v9055_v19, %v2967_v51  ;;  %v3190_v42 = vpop.permute.xlu0 %3189 }
 0x286   : > { %v3234_v34 = vmul.f32 %v3170_v39, %v3072_v22  ;;  %v2910_v24 = vpop.f32.mrf.mxu0 }
 0x287   : > { %vm3020_vm1 = vcmp.ge.f32.partialorder %v2997_v15, 0.0  ;;  %v3050_v13 = vmul.f32 %v9061_v56, %v2997_v15  ;;  %v2968_v43 = vadd.f32 %v2910_v24, %v9019_v46  ;;  %v3298_v12 = vld [vmem:[#allocation2 + $0x62] sm:$0xff] }
 0x288   : > { %v9173_v8 = vld [vmem:[#allocation2 + $0x5b] sm:$0xff]  ;;  %3257 = vst.msk [vmem:[#allocation2 + $0x72] sm:$0xff] %vm358_vm2, %v3234_v34  ;;  %v7369_v60 = vpop.f32.mrf.mxu0  ;;  %7411 = vmatprep.mubr.msk.f32.mxu1 %vm358_vm2, %v3298_v12 }
 0x289   : > { %7493 = vmatmul.mubr.msk.f32.gmra.mxu0 %vm358_vm2, %v9173_v8  ;;  %v3073_v1 = vsel %vm3020_vm1, %v2997_v15, %v3050_v13  ;;  %v2998_v59 = vadd.f32 %v9055_v19, %v2968_v43  ;;  %v3195_v15 = vpop.permute.xlu1 %3194 }
 0x28a   : > { %v3235_v62 = vmul.f32 %v3175_v4, %v3073_v1  ;;  %v2915_v3 = vpop.f32.mrf.mxu0 }
 0x28b   : > { %vm3021_vm3 = vcmp.ge.f32.partialorder %v2998_v59, 0.0  ;;  %v3051_v46 = vmul.f32 %v9061_v56, %v2998_v59  ;;  %v2969_v23 = vadd.f32 %v2915_v3, %v9022_v26  ;;  %v3299_v10 = vld [vmem:[#allocation2 + $0x6a] sm:$0xff] }
 0x28c   : > { %v9182_v18 = vld [vmem:[#allocation2 + $0x63] sm:$0xff]  ;;  %3258 = vst.msk [vmem:[#allocation2 + $0x7a] sm:$0xff] %vm358_vm2, %v3235_v62  ;;  %v7372_v7 = vpop.f32.mrf.mxu0  ;;  %7412 = vmatmul.mubr.msk.f32.gmra.mxu1 %vm358_vm2, %v3299_v10 }
 0x28d   : > { %7495 = vmatprep.mubr.msk.f32.mxu0 %vm358_vm2, %v9182_v18  ;;  %v3074_v31 = vsel %vm3021_vm3, %v2998_v59, %v3051_v46  ;;  %v2999_v37 = vadd.f32 %v9055_v19, %v2969_v23  ;;  %v3200_v59 = vpop.permute.xlu0 %3199 }
 0x28e   : > { %v3236_v61 = vmul.f32 %v3180_v11, %v3074_v31  ;;  %v2920_v9 = vpop.f32.mrf.mxu0 }
 0x28f   : > { %vm3022_vm4 = vcmp.ge.f32.partialorder %v2999_v37, 0.0  ;;  %v3052_v26 = vmul.f32 %v9061_v56, %v2999_v37  ;;  %v2970_v28 = vadd.f32 %v2920_v9, %v9032_v6  ;;  %v3300_v25 = vld [vmem:[#allocation2 + $0x72] sm:$0xff] }
 0x290   : > { %v9191_v33 = vld [vmem:[#allocation2 + $0x6b] sm:$0xff]  ;;  %3259 = vst.msk [vmem:[#allocation2 + $0x82] sm:$0xff] %vm358_vm2, %v3236_v61  ;;  %v7375_v58 = vpop.f32.mrf.mxu0  ;;  %7414 = vmatprep.mubr.msk.f32.mxu1 %vm358_vm2, %v3300_v25 }
 0x291   : > { %7496 = vmatmul.mubr.msk.f32.gmra.mxu0 %vm358_vm2, %v9191_v33  ;;  %v3075_v35 = vsel %vm3022_vm4, %v2999_v37, %v3052_v26  ;;  %v3000_v40 = vadd.f32 %v9055_v19, %v2970_v28  ;;  %v3205_v37 = vpop.permute.xlu1 %3204 }
 0x292   : > { %v3237_v16 = vmul.f32 %v3185_v50, %v3075_v35  ;;  %v2925_v63 = vpop.f32.mrf.mxu0 }
 0x293   : > { %vm3023_vm5 = vcmp.ge.f32.partialorder %v3000_v40, 0.0  ;;  %v3053_v6 = vmul.f32 %v9061_v56, %v3000_v40  ;;  %v2971_v29 = vadd.f32 %v2925_v63, %v9035_v2  ;;  %v3301_v48 = vld [vmem:[#allocation2 + $0x7a] sm:$0xff] }
 0x294   : > { %v9200_v54 = vld [vmem:[#allocation2 + $0x73] sm:$0xff]  ;;  %3260 = vst.msk [vmem:[#allocation2 + $0x8a] sm:$0xff] %vm358_vm2, %v3237_v16  ;;  %v7378_v44 = vpop.f32.mrf.mxu0  ;;  %7415 = vmatmul.mubr.msk.f32.gmra.mxu1 %vm358_vm2, %v3301_v48  ;;  %v3210_v16 = vpop.permute.xlu0 %3209 }
 0x295   : > { %7498 = vmatprep.mubr.msk.f32.mxu0 %vm358_vm2, %v9200_v54  ;;  %v3076_v17 = vsel %vm3023_vm5, %v3000_v40, %v3053_v6  ;;  %v3001_v21 = vadd.f32 %v9055_v19, %v2971_v29  ;;  %v3269_v40 = vld [vmem:[#allocation2 + $0x11] sm:$0xff] }
 0x296   : > { %v3238_v52 = vmul.f32 %v3190_v42, %v3076_v17  ;;  %v2930_v51 = vpop.f32.mrf.mxu0  ;;  %v3270_v42 = vld [vmem:[#allocation2 + $0x19] sm:$0xff] }
 0x297   : > { %vm3024_vm6 = vcmp.ge.f32.partialorder %v3001_v21, 0.0  ;;  %v3054_v2 = vmul.f32 %v9061_v56, %v3001_v21  ;;  %v2972_v53 = vadd.f32 %v2930_v51, %v9038_v57  ;;  %v3302_v5 = vld [vmem:[#allocation2 + $0x82] sm:$0xff] }
 0x298   : > { %v9209_v39 = vld [vmem:[#allocation2 + $0x7b] sm:$0xff]  ;;  %3261 = vst.msk [vmem:[#allocation2 + $0x92] sm:$0xff] %vm358_vm2, %v3238_v52  ;;  %v7381_v22 = vpop.f32.mrf.mxu0  ;;  %7417 = vmatprep.mubr.msk.f32.mxu1 %vm358_vm2, %v3302_v5 }
 0x299   : > { %7499 = vmatmul.mubr.msk.f32.gmra.mxu0 %vm358_vm2, %v9209_v39  ;;  %v3077_v34 = vsel %vm3024_vm6, %v3001_v21, %v3054_v2  ;;  %v3002_v24 = vadd.f32 %v9055_v19, %v2972_v53  ;;  %v9251_v21 = vld [vmem:[%s9808_s5 + $0x10] sm:$0xf]  ;;  %v3271_v52 = vld [vmem:[#allocation2 + $0x21] sm:$0xff]  ;;  %v3215_v2 = vpop.permute.xlu1 %3214 }
 0x29a   : > { %v3239_v13 = vmul.f32 %v3195_v15, %v3077_v34  ;;  %v2935_v43 = vpop.f32.mrf.mxu0  ;;  %v3272_v15 = vld [vmem:[#allocation2 + $0x29] sm:$0xff] }
 0x29b   : > { %vm3025_vm7 = vcmp.ge.f32.partialorder %v3002_v24, 0.0  ;;  %v3055_v57 = vmul.f32 %v9061_v56, %v3002_v24  ;;  %v2973_v12 = vadd.f32 %v2935_v43, %v9041_v0  ;;  %v3303_v60 = vld [vmem:[#allocation2 + $0x8a] sm:$0xff]  ;;  %v3274_v43 = vld [vmem:[#allocation2 + $0x39] sm:$0xff] }
 0x29c   : > { %v9218_v4 = vld [vmem:[#allocation2 + $0x83] sm:$0xff]  ;;  %3262 = vst.msk [vmem:[#allocation2 + $0x9a] sm:$0xff] %vm358_vm2, %v3239_v13  ;;  %v7384_v1 = vpop.f32.mrf.mxu0  ;;  %7418 = vmatmul.mubr.msk.f32.gmra.mxu1 %vm358_vm2, %v3303_v60 }
 0x29d   : > { %7501 = vmatprep.mubr.msk.f32.mxu0 %vm358_vm2, %v9218_v4  ;;  %v3078_v62 = vsel %vm3025_vm7, %v3002_v24, %v3055_v57  ;;  %v3003_v3 = vadd.f32 %v9055_v19, %v2973_v12  ;;  %v3220_v24 = vpop.permute.xlu0 %3219  ;;  %v4482_v12 = vld [vmem:[#allocation2 + $0x25] sm:$0xff]  ;;  %v4483_v1 = vld [vmem:[#allocation2 + $0x2d] sm:$0xff] }
 0x29e   : > { %v3240_v46 = vmul.f32 %v3200_v59, %v3078_v62  ;;  %v2940_v23 = vpop.f32.mrf.mxu0  ;;  %v3276_v60 = vld [vmem:[#allocation2 + $0x49] sm:$0xff]  ;;  %v3277_v59 = vld [vmem:[#allocation2 + $0x51] sm:$0xff] }
 0x29f   : > { %vm3026_vm8 = vcmp.ge.f32.partialorder %v3003_v3, 0.0  ;;  %v3056_v0 = vmul.f32 %v9061_v56, %v3003_v3  ;;  %v2974_v10 = vadd.f32 %v2940_v23, %v9044_v32  ;;  %v3304_v7 = vld [vmem:[#allocation2 + $0x92] sm:$0xff]  ;;  %v3279_v23 = vld [vmem:[#allocation2 + $0x61] sm:$0xff] }
 0x2a0   : > { %v9227_v11 = vld [vmem:[#allocation2 + $0x8b] sm:$0xff]  ;;  %3263 = vst.msk [vmem:[#allocation2 + $0xa2] sm:$0xff] %vm358_vm2, %v3240_v46  ;;  %v7387_v31 = vpop.f32.mrf.mxu0  ;;  %7420 = vmatprep.mubr.msk.f32.mxu1 %vm358_vm2, %v3304_v7  ;;  %v9274_v62 = vld [vmem:[#allocation2 + $0x35] sm:$0xff]  ;;  %v9281_v46 = vld [vmem:[#allocation2 + $0x3d] sm:$0xff] }
 0x2a1   : > { %7502 = vmatmul.mubr.msk.f32.gmra.mxu0 %vm358_vm2, %v9227_v11  ;;  %v3079_v61 = vsel %vm3026_vm8, %v3003_v3, %v3056_v0  ;;  %v3004_v9 = vadd.f32 %v9055_v19, %v2974_v10  ;;  %v3278_v3 = vld [vmem:[#allocation2 + $0x59] sm:$0xff]  ;;  %v9286_v0 = vld [vmem:[#allocation2 + $0x45] sm:$0xff]  ;;  %v9291_v7 = vld [vmem:[#allocation2 + $0x4d] sm:$0xff] }
 0x2a2   : > { %v3241_v26 = vmul.f32 %v3205_v37, %v3079_v61  ;;  %v2945_v28 = vpop.f32.mrf.mxu0  ;;  %v3280_v10 = vld [vmem:[#allocation2 + $0x69] sm:$0xff]  ;;  %v9296_v31 = vld [vmem:[#allocation2 + $0x55] sm:$0xff]  ;;  %v9301_v61 = vld [vmem:[#allocation2 + $0x5d] sm:$0xff] }
 0x2a3   : > { %vm3027_vm9 = vcmp.ge.f32.partialorder %v3004_v9, 0.0  ;;  %v3057_v32 = vmul.f32 %v9061_v56, %v3004_v9  ;;  %v2975_v25 = vadd.f32 %v2945_v28, %v9047_v55  ;;  %v3305_v58 = vld [vmem:[#allocation2 + $0x9a] sm:$0xff]  ;;  %v3284_v28 = vld [vmem:[#allocation2 + $0x89] sm:$0xff] }
 0x2a4   : > { %v9236_v50 = vld [vmem:[#allocation2 + $0x93] sm:$0xff]  ;;  %3264 = vst.msk [vmem:[#allocation2 + $0xaa] sm:$0xff] %vm358_vm2, %v3241_v26  ;;  %v7390_v35 = vpop.f32.mrf.mxu0  ;;  %7421 = vmatmul.mubr.msk.f32.gmra.mxu1 %vm358_vm2, %v3305_v58  ;;  %v9306_v26 = vld [vmem:[#allocation2 + $0x65] sm:$0xff] }
 0x2a5   : > { %7504 = vmatprep.mubr.msk.f32.mxu0 %vm358_vm2, %v9236_v50  ;;  %v3080_v63 = vsel %vm3027_vm9, %v3004_v9, %v3057_v32  ;;  %v3005_v6 = vadd.f32 %v9055_v19, %v2975_v25  ;;  %7425 = vmatprep.mubr.msk.f32.mxu1 %vm358_vm2, %v3269_v40  ;;  %v3282_v37 = vld [vmem:[#allocation2 + $0x79] sm:$0xff]  ;;  %v3283_v9 = vld [vmem:[#allocation2 + $0x81] sm:$0xff]  ;;  %v9311_v32 = vld [vmem:[#allocation2 + $0x6d] sm:$0xff] }
 0x2a6   : > { %v3242_v29 = vmul.f32 %v3210_v16, %v3080_v63  ;;  %v2950_v55 = vpop.f32.mrf.mxu0  ;;  %v3285_v25 = vld [vmem:[#allocation2 + $0x91] sm:$0xff]  ;;  %v3286_v35 = vld [vmem:[#allocation2 + $0x99] sm:$0xff]  ;;  %v9326_v63 = vld [vmem:[#allocation2 + $0x85] sm:$0xff] }
 0x2a7   : > { %vm3028_vm10 = vcmp.ge.f32.partialorder %v3005_v6, 0.0  ;;  %v3058_v48 = vmul.f32 %v9061_v56, %v3005_v6  ;;  %v2976_v44 = vadd.f32 %v2950_v55, %v9050_v47  ;;  %v9246_v17 = vld [vmem:[#allocation2 + $0x9b] sm:$0xff]  ;;  %v3732_v16 = vld [vmem:[#allocation2 + $0x13] sm:$0xff] }
 0x2a8   : > { %3265 = vst.msk [vmem:[#allocation2 + $0xb2] sm:$0xff] %vm358_vm2, %v3242_v29  ;;  %7426 = vmatmul.mubr.msk.f32.vlgmr.msra.gmra.mxu1 %vm358_vm2, %v3270_v42  ;;  %7505 = vmatmul.mubr.msk.f32.gmra.mxu0 %vm358_vm2, %v9246_v17  ;;  %v7393_v51 = vpop.f32.mrf.mxu0  ;;  %v9316_v58 = vld [vmem:[#allocation2 + $0x75] sm:$0xff]  ;;  %v9321_v40 = vld [vmem:[#allocation2 + $0x7d] sm:$0xff]  ;;  %v9331_v29 = vld [vmem:[#allocation2 + $0x8d] sm:$0xff] }
 0x2a9   : > { %v3081_v53 = vsel %vm3028_vm10, %v3005_v6, %v3058_v48  ;;  %v3006_v47 = vadd.f32 %v9055_v19, %v2976_v44  ;;  %7453 = vmatpush3.msk.msra.mxu1 %vm428_vm0, %v9085_v36  ;;  %7428 = vmatprep.mubr.msk.f32.mxu1 %vm358_vm2, %v3271_v52  ;;  %v3273_v19 = vld [vmem:[#allocation2 + $0x31] sm:$0xff]  ;;  %v3733_v6 = vld [vmem:[#allocation2 + $0x1b] sm:$0xff] }
 0x2aa   : > { %v3243_v5 = vmul.f32 %v3215_v2, %v3081_v53  ;;  %7510 = vmatprep.subr.msk.mxu1 %vm428_vm0, %v9251_v21  ;;  %v9336_v55 = vld [vmem:[%s9808_s5 + $0x18] sm:$0xf]  ;;  %v9351_v44 = vld [vmem:[#allocation2 + $0x9d] sm:$0xff] }
 0x2ab   : > { %vm3029_vm11 = vcmp.ge.f32.partialorder %v3006_v47, 0.0  ;;  %v3059_v22 = vmul.f32 %v9061_v56, %v3006_v47  ;;  %v3998_v34 = vld [vmem:[#allocation2 + $0xa3] sm:$0xff]  ;;  %v9345_v48 = vld [vmem:[#allocation2 + $0x95] sm:$0xff] }
 0x2ac   : > { %3266 = vst.msk [vmem:[#allocation2 + $0xba] sm:$0xff] %vm358_vm2, %v3243_v5  ;;  %7429 = vmatmul.mubr.msk.f32.gmra.mxu1 %vm358_vm2, %v3272_v15  ;;  %7507 = vmatprep.mubr.msk.f32.mxu0 %vm358_vm2, %v3998_v34  ;;  %v3275_v56 = vld [vmem:[#allocation2 + $0x41] sm:$0xff]  ;;  %v4994_v52 = vld [vmem:[#allocation2 + $0x96] sm:$0xff]  ;;  %v4237_v15 = vld [vmem:[#allocation2 + $0x4c] sm:$0xff] }
 0x2ad   : > { %v3082_v36 = vsel %vm3029_vm11, %v3006_v47, %v3059_v22  ;;  %7431 = vmatprep.mubr.msk.f32.mxu1 %vm358_vm2, %v3273_v19  ;;  %v9357_v42 = vld [vmem:[#allocation2 + $0xa5] sm:$0xff]  ;;  %v4234_v2 = vld [vmem:[#allocation2 + $0x34] sm:$0xff]  ;;  %v4235_v53 = vld [vmem:[#allocation2 + $0x3c] sm:$0xff] }
 0x2ae   : > { %v3244_v13 = vmul.f32 %v3220_v24, %v3082_v36  ;;  %v4995_v51 = vld [vmem:[#allocation2 + $0x9e] sm:$0xff]  ;;  %v4238_v19 = vld [vmem:[#allocation2 + $0x54] sm:$0xff] }
 0x2af   : > { %v3999_v57 = vld [vmem:[#allocation2 + $0xab] sm:$0xff]  ;;  %v4239_v24 = vld [vmem:[#allocation2 + $0x5c] sm:$0xff] }
 0x2b0   : > { %3268 = vst.msk [vmem:[#allocation2 + $0xc2] sm:$0xf] %vm3267_vm12, %v3244_v13  ;;  %7432 = vmatmul.mubr.msk.f32.gmra.mxu1 %vm358_vm2, %v3274_v43  ;;  %7508 = vmatmul.mubr.msk.f32.gmra.mxu0 %vm358_vm2, %v3999_v57  ;;  %v4997_v47 = vld [vmem:[#allocation2 + $0xae] sm:$0xff]  ;;  %v4236_v5 = vld [vmem:[#allocation2 + $0x44] sm:$0xff]  ;;  %v4243_v57 = vld [vmem:[#allocation2 + $0x7c] sm:$0xff] }
 0x2b1   : > { %7434 = vmatprep.mubr.msk.f32.mxu1 %vm358_vm2, %v3275_v56  ;;  %7541 = vmatprep.mubr.msk.f32.mxu0 %vm358_vm2, %v4482_v12  ;;  %v4240_v36 = vld [vmem:[#allocation2 + $0x64] sm:$0xff]  ;;  %v4241_v13 = vld [vmem:[#allocation2 + $0x6c] sm:$0xff]  ;;  %v4242_v43 = vld [vmem:[#allocation2 + $0x74] sm:$0xff] }
 0x2b2   : > { %v4244_v56 = vld [vmem:[#allocation2 + $0x84] sm:$0xff]  ;;  %v4245_v12 = vld [vmem:[#allocation2 + $0x8c] sm:$0xff] }
 0x2b3   : > { %v4998_v22 = vld [vmem:[#allocation2 + $0xb6] sm:$0xff] }
 0x2b4   : > { %7435 = vmatmul.mubr.msk.f32.gmra.mxu1 %vm358_vm2, %v3276_v60  ;;  %7542 = vmatmul.mubr.msk.f32.vlgmr.msra.gmra.mxu0 %vm358_vm2, %v4483_v1  ;;  %v4246_v60 = vld [vmem:[#allocation2 + $0x94] sm:$0xff]  ;;  %v4247_v1 = vld [vmem:[#allocation2 + $0x9c] sm:$0xff] }
 0x2b5   : > { %7437 = vmatprep.mubr.msk.f32.mxu1 %vm358_vm2, %v3277_v59  ;;  %7544 = vmatprep.mubr.msk.f32.mxu0 %vm358_vm2, %v9274_v62  ;;  %v4248_v59 = vld [vmem:[#allocation2 + $0xa4] sm:$0xff] }
 0x2b6   : > { %7598 = vmatpush3.msk.msra.mxu0 %vm428_vm0, %v9115_v30  ;;  %v3281_v30 = vld [vmem:[#allocation2 + $0x71] sm:$0xff] }
 0x2b7   : > { %v4999_v34 = vld [vmem:[#allocation2 + $0xbe] sm:$0xff] }
 0x2b8   : > { %7438 = vmatmul.mubr.msk.f32.gmra.mxu1 %vm358_vm2, %v3278_v3  ;;  %7545 = vmatmul.mubr.msk.f32.gmra.mxu0 %vm358_vm2, %v9281_v46  ;;  %v4249_v3 = vld [vmem:[#allocation2 + $0xac] sm:$0xff] }
 0x2b9   : > { %7440 = vmatprep.mubr.msk.f32.mxu1 %vm358_vm2, %v3279_v23  ;;  %7547 = vmatprep.mubr.msk.f32.mxu0 %vm358_vm2, %v9286_v0 }
 0x2bc   : > { %7441 = vmatmul.mubr.msk.f32.gmra.mxu1 %vm358_vm2, %v3280_v10  ;;  %7548 = vmatmul.mubr.msk.f32.gmra.mxu0 %vm358_vm2, %v9291_v7  ;;  %v5233_v10 = vld [vmem:[#allocation2 + $0x3f] sm:$0xff] }
 0x2bd   : > { %7443 = vmatprep.mubr.msk.f32.mxu1 %vm358_vm2, %v3281_v30  ;;  %7550 = vmatprep.mubr.msk.f32.mxu0 %vm358_vm2, %v9296_v31  ;;  %v5234_v30 = vld [vmem:[#allocation2 + $0x47] sm:$0xff] }
 0x2c0   : > { %7444 = vmatmul.mubr.msk.f32.gmra.mxu1 %vm358_vm2, %v3282_v37  ;;  %7551 = vmatmul.mubr.msk.f32.gmra.mxu0 %vm358_vm2, %v9301_v61  ;;  %v5235_v37 = vld [vmem:[#allocation2 + $0x4f] sm:$0xff] }
 0x2c1   : > { %7446 = vmatprep.mubr.msk.f32.mxu1 %vm358_vm2, %v3283_v9  ;;  %7553 = vmatprep.mubr.msk.f32.mxu0 %vm358_vm2, %v9306_v26 }
 0x2c4   : > { %7447 = vmatmul.mubr.msk.f32.gmra.mxu1 %vm358_vm2, %v3284_v28  ;;  %7554 = vmatmul.mubr.msk.f32.gmra.mxu0 %vm358_vm2, %v9311_v32 }
 0x2c5   : > { %7449 = vmatprep.mubr.msk.f32.mxu1 %vm358_vm2, %v3285_v25  ;;  %7556 = vmatprep.mubr.msk.f32.mxu0 %vm358_vm2, %v9316_v58  ;;  %v5239_v25 = vld [vmem:[#allocation2 + $0x6f] sm:$0xff] }
 0x2c8   : > { %7450 = vmatmul.mubr.msk.f32.gmra.mxu1 %vm358_vm2, %v3286_v35  ;;  %7557 = vmatmul.mubr.msk.f32.gmra.mxu0 %vm358_vm2, %v9321_v40  ;;  %v5240_v35 = vld [vmem:[#allocation2 + $0x77] sm:$0xff] }
 0x2c9   : > { %7454 = vmatprep.mubr.msk.f32.mxu1 %vm358_vm2, %v3732_v16  ;;  %7559 = vmatprep.mubr.msk.f32.mxu0 %vm358_vm2, %v9326_v63  ;;  %v5241_v16 = vld [vmem:[#allocation2 + $0x7f] sm:$0xff] }
 0x2cc   : > { %7455 = vmatmul.mubr.msk.f32.vlgmr.msra.gmra.mxu1 %vm358_vm2, %v3733_v6  ;;  %7560 = vmatmul.mubr.msk.f32.gmra.mxu0 %vm358_vm2, %v9331_v29 }
 0x2cd   : > { %7511 = vmatpush3.msk.msra.mxu1 %vm428_vm0, %v9251_v21  ;;  %7457 = vmatprep.mubr.msk.f32.mxu1 %vm358_vm2, %v9101_v14  ;;  %v9363_v14 = vld [vmem:[#allocation2 + $0xad] sm:$0xff]  ;;  %v4983_v21 = vld [vmem:[#allocation2 + $0x3e] sm:$0xff] }
 0x2ce   : > { %7562 = vmatprep.mubr.msk.f32.mxu0 %vm358_vm2, %v9345_v48  ;;  %7568 = vmatprep.subr.msk.mxu1 %vm428_vm0, %v9336_v55 }
 0x2d0   : > { %7458 = vmatmul.mubr.msk.f32.gmra.mxu1 %vm358_vm2, %v9110_v41  ;;  %7563 = vmatmul.mubr.msk.f32.gmra.mxu0 %vm358_vm2, %v9351_v44  ;;  %v4982_v41 = vld [vmem:[#allocation2 + $0x36] sm:$0xff] }
 0x2d1   : > { %7460 = vmatprep.mubr.msk.f32.mxu1 %vm358_vm2, %v9128_v20  ;;  %7565 = vmatprep.mubr.msk.f32.mxu0 %vm358_vm2, %v9357_v42  ;;  %v4984_v20 = vld [vmem:[#allocation2 + $0x46] sm:$0xff] }
 0x2d4   : > { %7461 = vmatmul.mubr.msk.f32.gmra.mxu1 %vm358_vm2, %v9137_v49  ;;  %7566 = vmatmul.mubr.msk.f32.gmra.mxu0 %vm358_vm2, %v9363_v14  ;;  %v4985_v49 = vld [vmem:[#allocation2 + $0x4e] sm:$0xff] }
 0x2d5   : > { %7463 = vmatprep.mubr.msk.f32.mxu1 %vm358_vm2, %v9146_v38  ;;  %7599 = vmatprep.mubr.msk.f32.mxu0 %vm358_vm2, %v4982_v41  ;;  %v4986_v38 = vld [vmem:[#allocation2 + $0x56] sm:$0xff] }
 0x2d8   : > { %7464 = vmatmul.mubr.msk.f32.gmra.mxu1 %vm358_vm2, %v9155_v45  ;;  %7600 = vmatmul.mubr.msk.f32.vlgmr.msra.gmra.mxu0 %vm358_vm2, %v4983_v21  ;;  %v4987_v45 = vld [vmem:[#allocation2 + $0x5e] sm:$0xff]  ;;  %v5247_v21 = vld [vmem:[#allocation2 + $0xaf] sm:$0xff] }
 0x2d9   : > { %7466 = vmatprep.mubr.msk.f32.mxu1 %vm358_vm2, %v9164_v27  ;;  %7602 = vmatprep.mubr.msk.f32.mxu0 %vm358_vm2, %v4984_v20  ;;  %v4988_v27 = vld [vmem:[#allocation2 + $0x66] sm:$0xff] }
 0x2dc   : > { %7467 = vmatmul.mubr.msk.f32.gmra.mxu1 %vm358_vm2, %v9173_v8  ;;  %7603 = vmatmul.mubr.msk.f32.gmra.mxu0 %vm358_vm2, %v4985_v49  ;;  %v4989_v8 = vld [vmem:[#allocation2 + $0x6e] sm:$0xff]  ;;  %v5248_v49 = vld [vmem:[#allocation2 + $0xb7] sm:$0xff] }
 0x2dd   : > { %7469 = vmatprep.mubr.msk.f32.mxu1 %vm358_vm2, %v9182_v18  ;;  %7605 = vmatprep.mubr.msk.f32.mxu0 %vm358_vm2, %v4986_v38  ;;  %v4990_v18 = vld [vmem:[#allocation2 + $0x76] sm:$0xff] }
 0x2e0   : > { %7470 = vmatmul.mubr.msk.f32.gmra.mxu1 %vm358_vm2, %v9191_v33  ;;  %7606 = vmatmul.mubr.msk.f32.gmra.mxu0 %vm358_vm2, %v4987_v45  ;;  %v4991_v33 = vld [vmem:[#allocation2 + $0x7e] sm:$0xff] }
 0x2e1   : > { %7472 = vmatprep.mubr.msk.f32.mxu1 %vm358_vm2, %v9200_v54  ;;  %7608 = vmatprep.mubr.msk.f32.mxu0 %vm358_vm2, %v4988_v27  ;;  %v4992_v54 = vld [vmem:[#allocation2 + $0x86] sm:$0xff] }
 0x2e2   : > { %v5249_v45 = vld [vmem:[#allocation2 + $0xbf] sm:$0xff] }
 0x2e4   : > { %7473 = vmatmul.mubr.msk.f32.gmra.mxu1 %vm358_vm2, %v9209_v39  ;;  %7609 = vmatmul.mubr.msk.f32.gmra.mxu0 %vm358_vm2, %v4989_v8  ;;  %v4993_v39 = vld [vmem:[#allocation2 + $0x8e] sm:$0xff] }
 0x2e5   : > { %7475 = vmatprep.mubr.msk.f32.mxu1 %vm358_vm2, %v9218_v4  ;;  %7611 = vmatprep.mubr.msk.f32.mxu0 %vm358_vm2, %v4990_v18  ;;  %v4232_v4 = vld [vmem:[#allocation2 + $0x24] sm:$0xff] }
 0x2e8   : > { %7476 = vmatmul.mubr.msk.f32.gmra.mxu1 %vm358_vm2, %v9227_v11  ;;  %7612 = vmatmul.mubr.msk.f32.gmra.mxu0 %vm358_vm2, %v4991_v33  ;;  %v4233_v11 = vld [vmem:[#allocation2 + $0x2c] sm:$0xff] }
 0x2e9   : > { %7478 = vmatprep.mubr.msk.f32.mxu1 %vm358_vm2, %v9236_v50  ;;  %7614 = vmatprep.mubr.msk.f32.mxu0 %vm358_vm2, %v4992_v54  ;;  %v6327_v50 = vld [vmem:[%s9808_s5 + $0x20] sm:$0xf] }
 0x2ec   : > { %7479 = vmatmul.mubr.msk.f32.gmra.mxu1 %vm358_vm2, %v9246_v17  ;;  %7615 = vmatmul.mubr.msk.f32.gmra.mxu0 %vm358_vm2, %v4993_v39  ;;  %v4996_v17 = vld [vmem:[#allocation2 + $0xa6] sm:$0xff] }
 0x2ed   : > { %7512 = vmatprep.mubr.msk.f32.mxu1 %vm358_vm2, %v4232_v4  ;;  %7617 = vmatprep.mubr.msk.f32.mxu0 %vm358_vm2, %v4994_v52 }
 0x2f0   : > { %7513 = vmatmul.mubr.msk.f32.vlgmr.msra.gmra.mxu1 %vm358_vm2, %v4233_v11  ;;  %7618 = vmatmul.mubr.msk.f32.gmra.mxu0 %vm358_vm2, %v4995_v51 }
 0x2f1   : > { %7569 = vmatpush3.msk.msra.mxu1 %vm428_vm0, %v9336_v55  ;;  %7515 = vmatprep.mubr.msk.f32.mxu1 %vm358_vm2, %v4234_v2 }
 0x2f2   : > { %7620 = vmatprep.mubr.msk.f32.mxu0 %vm358_vm2, %v4996_v17  ;;  %7626 = vmatprep.subr.msk.mxu1 %vm428_vm0, %v6327_v50 }
 0x2f4   : > { %7516 = vmatmul.mubr.msk.f32.gmra.mxu1 %vm358_vm2, %v4235_v53  ;;  %7621 = vmatmul.mubr.msk.f32.gmra.mxu0 %vm358_vm2, %v4997_v47 }
 0x2f5   : > { %7518 = vmatprep.mubr.msk.f32.mxu1 %vm358_vm2, %v4236_v5  ;;  %7623 = vmatprep.mubr.msk.f32.mxu0 %vm358_vm2, %v4998_v22 }
 0x2f8   : > { %7519 = vmatmul.mubr.msk.f32.gmra.mxu1 %vm358_vm2, %v4237_v15  ;;  %7624 = vmatmul.mubr.msk.f32.gmra.mxu0 %vm358_vm2, %v4999_v34 }
 0x2f9   : > { %7521 = vmatprep.mubr.msk.f32.mxu1 %vm358_vm2, %v4238_v19 }
 0x2fc   : > { %7522 = vmatmul.mubr.msk.f32.gmra.mxu1 %vm358_vm2, %v4239_v24 }
 0x2fd   : > { %7524 = vmatprep.mubr.msk.f32.mxu1 %vm358_vm2, %v4240_v36 }
 0x300   : > { %7525 = vmatmul.mubr.msk.f32.gmra.mxu1 %vm358_vm2, %v4241_v13 }
 0x301   : > { %7527 = vmatprep.mubr.msk.f32.mxu1 %vm358_vm2, %v4242_v43 }
 0x304   : > { %7528 = vmatmul.mubr.msk.f32.gmra.mxu1 %vm358_vm2, %v4243_v57 }
 0x305   : > { %7530 = vmatprep.mubr.msk.f32.mxu1 %vm358_vm2, %v4244_v56 }
 0x308   : > { %7531 = vmatmul.mubr.msk.f32.gmra.mxu1 %vm358_vm2, %v4245_v12 }
 0x309   : > { %7533 = vmatprep.mubr.msk.f32.mxu1 %vm358_vm2, %v4246_v60 }
 0x30c   : > { %7534 = vmatmul.mubr.msk.f32.gmra.mxu1 %vm358_vm2, %v4247_v1 }
 0x30d   : > { %7536 = vmatprep.mubr.msk.f32.mxu1 %vm358_vm2, %v4248_v59 }
 0x310   : > { %7537 = vmatmul.mubr.msk.f32.gmra.mxu1 %vm358_vm2, %v4249_v3 }
 0x311   : > { %7570 = vmatprep.mubr.msk.f32.mxu1 %vm358_vm2, %v9274_v62  ;;  %v4748_v62 = vld [vmem:[#allocation2 + $0xb5] sm:$0xff] }
 0x314   : > { %7571 = vmatmul.mubr.msk.f32.vlgmr.msra.gmra.mxu1 %vm358_vm2, %v9281_v46  ;;  %v4749_v46 = vld [vmem:[#allocation2 + $0xbd] sm:$0xff] }
 0x315   : > { %7627 = vmatpush3.msk.msra.mxu1 %vm428_vm0, %v6327_v50  ;;  %7573 = vmatprep.mubr.msk.f32.mxu1 %vm358_vm2, %v9286_v0  ;;  %v5232_v0 = vld [vmem:[#allocation2 + $0x37] sm:$0xff] }
 0x318   : > { %7574 = vmatmul.mubr.msk.f32.gmra.mxu1 %vm358_vm2, %v9291_v7 }
 0x319   : > { %7576 = vmatprep.mubr.msk.f32.mxu1 %vm358_vm2, %v9296_v31 }
 0x31c   : > { %7577 = vmatmul.mubr.msk.f32.gmra.mxu1 %vm358_vm2, %v9301_v61  ;;  %v5236_v61 = vld [vmem:[#allocation2 + $0x57] sm:$0xff] }
 0x31d   : > { %7579 = vmatprep.mubr.msk.f32.mxu1 %vm358_vm2, %v9306_v26  ;;  %v5237_v26 = vld [vmem:[#allocation2 + $0x5f] sm:$0xff] }
 0x320   : > { %7580 = vmatmul.mubr.msk.f32.gmra.mxu1 %vm358_vm2, %v9311_v32  ;;  %v5238_v32 = vld [vmem:[#allocation2 + $0x67] sm:$0xff] }
 0x321   : > { %7582 = vmatprep.mubr.msk.f32.mxu1 %vm358_vm2, %v9316_v58 }
 0x324   : > { %7583 = vmatmul.mubr.msk.f32.gmra.mxu1 %vm358_vm2, %v9321_v40  ;;  %v9469_v23 = vpop.f32.mrf.mxu1 }
 0x325   : > { %7585 = vmatprep.mubr.msk.f32.mxu1 %vm358_vm2, %v9326_v63  ;;  %v5242_v63 = vld [vmem:[#allocation2 + $0x87] sm:$0xff] }
 0x326   : > { %v3431_v7 = vpop.f32.mrf.mxu1 }
 0x328   : > { %7586 = vmatmul.mubr.msk.f32.gmra.mxu1 %vm358_vm2, %v9331_v29  ;;  %v5243_v29 = vld [vmem:[#allocation2 + $0x8f] sm:$0xff] }
 0x329   : > { %7588 = vmatprep.mubr.msk.f32.mxu1 %vm358_vm2, %v9345_v48  ;;  %v5244_v48 = vld [vmem:[#allocation2 + $0x97] sm:$0xff] }
 0x32c   : > { %7589 = vmatmul.mubr.msk.f32.gmra.mxu1 %vm358_vm2, %v9351_v44  ;;  %v7401_v31 = vpop.f32.mrf.mxu1  ;;  %v5245_v44 = vld [vmem:[#allocation2 + $0x9f] sm:$0xff] }
 0x32d   : > { %7591 = vmatprep.mubr.msk.f32.mxu1 %vm358_vm2, %v9357_v42 }
 0x32e   : > { %v3441_v9 = vpop.f32.mrf.mxu1 }
 0x330   : > { %7592 = vmatmul.mubr.msk.f32.gmra.mxu1 %vm358_vm2, %v9363_v14  ;;  %v5246_v14 = vld [vmem:[#allocation2 + $0xa7] sm:$0xff] }
 0x331   : > { %7594 = vmatprep.mubr.msk.f32.mxu1 %vm358_vm2, %v4748_v62  ;;  %v9487_v20 = vpop.f32.mrf.mxu0 }
 0x333   : > { %v9491_v27 = vpop.f32.mrf.mxu0 }
 0x334   : > { %7595 = vmatmul.mubr.msk.f32.gmra.mxu1 %vm358_vm2, %v4749_v46  ;;  %v7404_v28 = vpop.f32.mrf.mxu1 }
 0x335   : > { %7628 = vmatprep.mubr.msk.f32.mxu1 %vm358_vm2, %v5232_v0 }
 0x336   : > { %v3451_v58 = vpop.f32.mrf.mxu1 }
 0x338   : > { %7629 = vmatmul.mubr.msk.f32.vlgmr.msra.gmra.mxu1 %vm358_vm2, %v5233_v10 }
 0x339   : > { %7631 = vmatprep.mubr.msk.f32.mxu1 %vm358_vm2, %v5234_v30  ;;  %v9494_v18 = vpop.f32.mrf.mxu0 }
 0x33b   : > { %v9496_v54 = vpop.f32.mrf.mxu0 }
 0x33c   : > { %7632 = vmatmul.mubr.msk.f32.gmra.mxu1 %vm358_vm2, %v5235_v37  ;;  %v7407_v40 = vpop.f32.mrf.mxu1 }
 0x33d   : > { %7634 = vmatprep.mubr.msk.f32.mxu1 %vm358_vm2, %v5236_v61 }
 0x33e   : > { %v3461_v6 = vpop.f32.mrf.mxu1 }
 0x340   : > { %7635 = vmatmul.mubr.msk.f32.gmra.mxu1 %vm358_vm2, %v5237_v26 }
 0x341   : > { %7637 = vmatprep.mubr.msk.f32.mxu1 %vm358_vm2, %v5238_v32  ;;  %v9498_v4 = vpop.f32.mrf.mxu0 }
 0x343   : > { %v9500_v11 = vpop.f32.mrf.mxu0 }
 0x344   : > { %7638 = vmatmul.mubr.msk.f32.gmra.mxu1 %vm358_vm2, %v5239_v25  ;;  %v7410_v55 = vpop.f32.mrf.mxu1 }
 0x345   : > { %7640 = vmatprep.mubr.msk.f32.mxu1 %vm358_vm2, %v5240_v35 }
 0x346   : > { %v3471_v42 = vpop.f32.mrf.mxu1 }
 0x348   : > { %7641 = vmatmul.mubr.msk.f32.gmra.mxu1 %vm358_vm2, %v5241_v16 }
 0x349   : > { %7643 = vmatprep.mubr.msk.f32.mxu1 %vm358_vm2, %v5242_v63  ;;  %v9502_v50 = vpop.f32.mrf.mxu0 }
 0x34b   : > { %v9504_v53 = vpop.f32.mrf.mxu0 }
 0x34c   : > { %7644 = vmatmul.mubr.msk.f32.gmra.mxu1 %vm358_vm2, %v5243_v29  ;;  %v7413_v41 = vpop.f32.mrf.mxu1 }
 0x34d   : > { %7646 = vmatprep.mubr.msk.f32.mxu1 %vm358_vm2, %v5244_v48 }
 0x34e   : > { %v3481_v38 = vpop.f32.mrf.mxu1 }
 0x350   : > { %7647 = vmatmul.mubr.msk.f32.gmra.mxu1 %vm358_vm2, %v5245_v44 }
 0x351   : > { %7649 = vmatprep.mubr.msk.f32.mxu1 %vm358_vm2, %v5246_v14  ;;  %v9506_v22 = vpop.f32.mrf.mxu0 }
 0x353   : > { %v9508_v36 = vpop.f32.mrf.mxu0 }
 0x354   : > { %7650 = vmatmul.mubr.msk.f32.gmra.mxu1 %vm358_vm2, %v5247_v21  ;;  %v7416_v8 = vpop.f32.mrf.mxu1 }
 0x355   : > { %7652 = vmatprep.mubr.msk.f32.mxu1 %vm358_vm2, %v5248_v49 }
 0x356   : > { %v3491_v33 = vpop.f32.mrf.mxu1 }
 0x358   : > { %7653 = vmatmul.mubr.msk.f32.gmra.mxu1 %vm358_vm2, %v5249_v45 }
 0x359   : > { %v9510_v57 = vpop.f32.mrf.mxu0 }
 0x35b   : > { %v9512_v59 = vpop.f32.mrf.mxu0 }
 0x35c   : > { %v7419_v39 = vpop.f32.mrf.mxu1 }
 0x35e   : > { %v3501_v52 = vpop.f32.mrf.mxu1 }
 0x361   : > { %v9514_v46 = vpop.f32.mrf.mxu0 }
 0x364   : > { %v7422_v51 = vpop.f32.mrf.mxu1 }
 0x366   : > { %v3511_v2 = vpop.f32.mrf.mxu1 }
 0x368   : > { %v7427_v17 = vpop.f32.mrf.mxu1 }
 0x36a   : > { %v3643_v47 = vpop.f32.mrf.mxu1 }
 0x36b   : > { %v3644_v5 = vadd.f32 %v3643_v47, %v3431_v7 }
 0x36c   : > { %v7430_v15 = vpop.f32.mrf.mxu1 }
 0x36d   : > { %v3659_v34 = vadd.f32 %v7430_v15, %v7401_v31  ;;  %v9516_v31 = vpop.f32.mrf.mxu0 }
 0x36e   : > { %v3653_v19 = vpop.f32.mrf.mxu1 }
 0x36f   : > { %v3654_v24 = vadd.f32 %v3653_v19, %v3441_v9  ;;  %v9518_v9 = vpop.f32.mrf.mxu0 }
 0x370   : > { %v7433_v13 = vpop.f32.mrf.mxu1 }
 0x371   : > { %v3669_v43 = vadd.f32 %v7433_v13, %v7404_v28 }
 0x372   : > { %v3663_v56 = vpop.f32.mrf.mxu1 }
 0x373   : > { %v3664_v12 = vadd.f32 %v3663_v56, %v3451_v58  ;;  %v9520_v58 = vpop.f32.mrf.mxu0 }
 0x374   : > { %v7436_v60 = vpop.f32.mrf.mxu1 }
 0x375   : > { %v3679_v1 = vadd.f32 %v7436_v60, %v7407_v40  ;;  %v9522_v16 = vpop.f32.mrf.mxu0 }
 0x376   : > { %v3673_v3 = vpop.f32.mrf.mxu1 }
 0x377   : > { %v3674_v62 = vadd.f32 %v3673_v3, %v3461_v6  ;;  %v9524_v48 = vpop.f32.mrf.mxu0 }
 0x378   : > { %v7439_v0 = vpop.f32.mrf.mxu1 }
 0x379   : > { %v3689_v10 = vadd.f32 %v7439_v0, %v7410_v55  ;;  %v9527_v49 = vpop.f32.mrf.mxu0 }
 0x37a   : > { %v3683_v7 = vpop.f32.mrf.mxu1 }
 0x37b   : > { %v3684_v30 = vadd.f32 %v3683_v7, %v3471_v42  ;;  %v9530_v15 = vpop.f32.mrf.mxu0 }
 0x37c   : > { %v7442_v37 = vpop.f32.mrf.mxu1 }
 0x37d   : > { %v3699_v61 = vadd.f32 %v7442_v37, %v7413_v41  ;;  %v3649_v41 = vadd.f32 %v7427_v17, %v9469_v23  ;;  %v9534_v23 = vpop.f32.mrf.mxu0 }
 0x37e   : > { %v3693_v26 = vpop.f32.mrf.mxu1 }
 0x37f   : > { %v3694_v28 = vadd.f32 %v3693_v26, %v3481_v38  ;;  %v9538_v0 = vpop.f32.mrf.mxu0 }
 0x380   : > { %v7445_v32 = vpop.f32.mrf.mxu1 }
 0x381   : > { %v3709_v25 = vadd.f32 %v7445_v32, %v7416_v8  ;;  %v9542_v26 = vpop.f32.mrf.mxu0 }
 0x382   : > { %v3703_v35 = vpop.f32.mrf.mxu1 }
 0x383   : > { %v3704_v40 = vadd.f32 %v3703_v35, %v3491_v33 }
 0x384   : > { %v7448_v63 = vpop.f32.mrf.mxu1 }
 0x385   : > { %v3719_v6 = vadd.f32 %v7448_v63, %v7419_v39  ;;  %v9546_v63 = vpop.f32.mrf.mxu0 }
 0x386   : > { %v3713_v29 = vpop.f32.mrf.mxu1 }
 0x387   : > { %v3714_v55 = vadd.f32 %v3713_v29, %v3501_v52 }
 0x388   : > { %v7451_v44 = vpop.f32.mrf.mxu1 }
 0x389   : > { %v3729_v42 = vadd.f32 %v7451_v44, %v7422_v51 }
 0x38a   : > { %v3723_v14 = vpop.f32.mrf.mxu1 }
 0x38b   : > { %v3724_v21 = vadd.f32 %v3723_v14, %v3511_v2  ;;  %v9550_v14 = vpop.f32.mrf.mxu0 }
 0x38c   : > { %v7456_v38 = vpop.f32.mrf.mxu1 }
 0x38d   : > { %v3965_v45 = vadd.f32 %v7456_v38, %v3649_v41 }
 0x38e   : > { %v3875_v8 = vpop.f32.mrf.mxu1 }
 0x38f   : > { %v3964_v33 = vadd.f32 %v3875_v8, %v3644_v5  ;;  %v4215_v47 = vadd.f32 %v9487_v20, %v3965_v45  ;;  %v9554_v45 = vpop.f32.mrf.mxu0 }
 0x390   : > { %v7459_v39 = vpop.f32.mrf.mxu1 }
 0x391   : > { %v3967_v52 = vadd.f32 %v7459_v39, %v3659_v34  ;;  %v4214_v19 = vadd.f32 %v9491_v27, %v3964_v33  ;;  %v9558_v39 = vpop.f32.mrf.mxu0 }
 0x392   : > { %v3885_v13 = vpop.f32.mrf.mxu1 }
 0x393   : > { %v3966_v51 = vadd.f32 %v3885_v13, %v3654_v24  ;;  %v4217_v56 = vadd.f32 %v9494_v18, %v3967_v52 }
 0x394   : > { %v7462_v2 = vpop.f32.mrf.mxu1 }
 0x395   : > { %v3969_v17 = vadd.f32 %v7462_v2, %v3669_v43  ;;  %v4216_v60 = vadd.f32 %v9496_v54, %v3966_v51  ;;  %v9562_v51 = vpop.f32.mrf.mxu0 }
 0x396   : > { %v3895_v3 = vpop.f32.mrf.mxu1 }
 0x397   : > { %v3968_v5 = vadd.f32 %v3895_v3, %v3664_v12  ;;  %v4219_v20 = vadd.f32 %v9498_v4, %v3969_v17 }
 0x398   : > { %v7465_v7 = vpop.f32.mrf.mxu1 }
 0x399   : > { %v3971_v34 = vadd.f32 %v7465_v7, %v3679_v1  ;;  %v4218_v27 = vadd.f32 %v9500_v11, %v3968_v5 }
 0x39a   : > { %v3905_v37 = vpop.f32.mrf.mxu1 }
 0x39b   : > { %v3970_v24 = vadd.f32 %v3905_v37, %v3674_v62  ;;  %v4221_v18 = vadd.f32 %v9502_v50, %v3971_v34 }
 0x39c   : > { %v7468_v32 = vpop.f32.mrf.mxu1 }
 0x39d   : > { %v3973_v43 = vadd.f32 %v7468_v32, %v3689_v10  ;;  %v4220_v54 = vadd.f32 %v9504_v53, %v3970_v24 }
 0x39e   : > { %v3915_v35 = vpop.f32.mrf.mxu1 }
 0x39f   : > { %v3972_v12 = vadd.f32 %v3915_v35, %v3684_v30  ;;  %v4223_v4 = vadd.f32 %v9506_v22, %v3973_v43 }
 0x3a0   : > { %v7471_v29 = vpop.f32.mrf.mxu1 }
 0x3a1   : > { %v3975_v1 = vadd.f32 %v7471_v29, %v3699_v61  ;;  %v4222_v11 = vadd.f32 %v9508_v36, %v3972_v12 }
 0x3a2   : > { %v3925_v44 = vpop.f32.mrf.mxu1 }
 0x3a3   : > { %v3974_v62 = vadd.f32 %v3925_v44, %v3694_v28  ;;  %v4225_v50 = vadd.f32 %v9510_v57, %v3975_v1 }
 0x3a4   : > { %v7474_v41 = vpop.f32.mrf.mxu1 }
 0x3a5   : > { %v3977_v10 = vadd.f32 %v7474_v41, %v3709_v25  ;;  %v4224_v53 = vadd.f32 %v9512_v59, %v3974_v62 }
 0x3a6   : > { %v3935_v38 = vpop.f32.mrf.mxu1 }
 0x3a7   : > { %v3976_v30 = vadd.f32 %v3935_v38, %v3704_v40  ;;  %v4227_v22 = vadd.f32 %v9514_v46, %v3977_v10 }
 0x3a8   : > { %v7477_v8 = vpop.f32.mrf.mxu1 }
 0x3a9   : > { %v3979_v61 = vadd.f32 %v7477_v8, %v3719_v6  ;;  %v4226_v36 = vadd.f32 %v9516_v31, %v3976_v30 }
 0x3aa   : > { %v3945_v33 = vpop.f32.mrf.mxu1 }
 0x3ab   : > { %v3978_v28 = vadd.f32 %v3945_v33, %v3714_v55  ;;  %v4229_v57 = vadd.f32 %v9518_v9, %v3979_v61  ;;  %v9569_v9 = vpop.f32.mrf.mxu0 }
 0x3ac   : > { %v7480_v52 = vpop.f32.mrf.mxu1 }
 0x3ad   : > { %v3981_v25 = vadd.f32 %v7480_v52, %v3729_v42  ;;  %v4228_v59 = vadd.f32 %v9520_v58, %v3978_v28 }
 0x3ae   : > { %v3955_v13 = vpop.f32.mrf.mxu1 }
 0x3af   : > { %v3980_v40 = vadd.f32 %v3955_v13, %v3724_v21  ;;  %v4231_v46 = vadd.f32 %v9522_v16, %v3981_v25  ;;  %v9575_v21 = vpop.f32.mrf.mxu0 }
 0x3b0   : > { %v7514_v2 = vpop.f32.mrf.mxu1 }
 0x3b1   : > { %v9564_v6 = vadd.f32 %v7514_v2, %v4215_v47  ;;  %v4230_v31 = vadd.f32 %v9524_v48, %v3980_v40  ;;  %v9581_v48 = vpop.f32.mrf.mxu0 }
 0x3b2   : > { %v4375_v55 = vpop.f32.mrf.mxu1 }
 0x3b3   : > { %v9567_v17 = vadd.f32 %v4375_v55, %v4214_v19 }
 0x3b4   : > { %v7517_v3 = vpop.f32.mrf.mxu1 }
 0x3b5   : > { %v9571_v42 = vadd.f32 %v7517_v3, %v4217_v56  ;;  %v9587_v56 = vpop.f32.mrf.mxu0 }
 0x3b6   : > { %v4385_v58 = vpop.f32.mrf.mxu1 }
 0x3b7   : > { %v9573_v5 = vadd.f32 %v4385_v58, %v4216_v60 }
 0x3b8   : > { %v7520_v16 = vpop.f32.mrf.mxu1 }
 0x3b9   : > { %v9577_v7 = vadd.f32 %v7520_v16, %v4219_v20  ;;  %v9593_v20 = vpop.f32.mrf.mxu0 }
 0x3ba   : > { %v4395_v47 = vpop.f32.mrf.mxu1 }
 0x3bb   : > { %v9579_v34 = vadd.f32 %v4395_v47, %v4218_v27 }
 0x3bc   : > { %v7523_v19 = vpop.f32.mrf.mxu1 }
 0x3bd   : > { %v9583_v37 = vadd.f32 %v7523_v19, %v4221_v18  ;;  %v9599_v18 = vpop.f32.mrf.mxu0 }
 0x3be   : > { %v4405_v24 = vpop.f32.mrf.mxu1 }
 0x3bf   : > { %v9585_v32 = vadd.f32 %v4405_v24, %v4220_v54 }
 0x3c0   : > { %v7526_v60 = vpop.f32.mrf.mxu1 }
 0x3c1   : > { %v9589_v43 = vadd.f32 %v7526_v60, %v4223_v4  ;;  %v9605_v4 = vpop.f32.mrf.mxu0 }
 0x3c2   : > { %v4415_v35 = vpop.f32.mrf.mxu1  ;;  %9811 = vst [vmem:[#allocation3_spill] sm:$0xff] %v9605_v4  ;;  %v4717_v4 = vadd.f32 %v9534_v23, %v9571_v42  ;;  %v4719_v23 = vadd.f32 %v9542_v26, %v9577_v7  ;;  %v6348_v26 = vld [vmem:[%s7844_s17 + $0x36] sm:$0xff] }
 0x3c3   : > { %v9591_v12 = vadd.f32 %v4415_v35, %v4222_v11 }
 0x3c4   : > { %v7529_v27 = vpop.f32.mrf.mxu1 }
 0x3c5   : > { %v9595_v29 = vadd.f32 %v7529_v27, %v4225_v50  ;;  %v9611_v50 = vpop.f32.mrf.mxu0 }
 0x3c6   : > { %v4425_v1 = vpop.f32.mrf.mxu1  ;;  %9812 = vst [vmem:[#allocation4_spill] sm:$0xff] %v9611_v50 }
 0x3c7   : > { %v9597_v44 = vadd.f32 %v4425_v1, %v4224_v53 }
 0x3c8   : > { %v7532_v54 = vpop.f32.mrf.mxu1 }
 0x3c9   : > { %v9601_v62 = vadd.f32 %v7532_v54, %v4227_v22  ;;  %v7601_v22 = vpop.f32.mrf.mxu0 }
 0x3ca   : > { %v4435_v41 = vpop.f32.mrf.mxu1 }
 0x3cb   : > { %v9603_v10 = vadd.f32 %v4435_v41, %v4226_v36  ;;  %v5125_v25 = vpop.f32.mrf.mxu0  ;;  %v4715_v41 = vadd.f32 %v9527_v49, %v9564_v6  ;;  %v4716_v49 = vadd.f32 %v9538_v0, %v9573_v5  ;;  %v4718_v5 = vadd.f32 %v9546_v63, %v9579_v34 }
 0x3cc   : > { %v7535_v11 = vpop.f32.mrf.mxu1 }
 0x3cd   : > { %v9607_v38 = vadd.f32 %v7535_v11, %v4229_v57  ;;  %v7604_v57 = vpop.f32.mrf.mxu0 }
 0x3ce   : > { %v4445_v30 = vpop.f32.mrf.mxu1 }
 0x3cf   : > { %v9609_v8 = vadd.f32 %v4445_v30, %v4228_v59  ;;  %v5135_v59 = vpop.f32.mrf.mxu0 }
 0x3d0   : > { %v7538_v53 = vpop.f32.mrf.mxu1 }
 0x3d1   : > { %v9613_v61 = vadd.f32 %v7538_v53, %v4231_v46  ;;  %v7607_v46 = vpop.f32.mrf.mxu0  ;;  %v4714_v53 = vadd.f32 %v9530_v15, %v9567_v17 }
 0x3d2   : > { %v4455_v33 = vpop.f32.mrf.mxu1 }
 0x3d3   : > { %9813 = vst [vmem:[#allocation5_spill] sm:$0xff] %v9613_v61  ;;  %v9615_v28 = vadd.f32 %v4455_v33, %v4230_v31  ;;  %v9623_v47 = vpop.f32.mrf.mxu0 }
 0x3d4   : > { %v7572_v52 = vpop.f32.mrf.mxu1 }
 0x3d5   : > { %9814 = vst [vmem:[#allocation6_spill] sm:$0xff] %v9615_v28  ;;  %v9630_v60 = vpop.f32.mrf.mxu0  ;;  %v4965_v30 = vadd.f32 %v7572_v52, %v4715_v41 }
 0x3d6   : > { %v4875_v36 = vpop.f32.mrf.mxu1 }
 0x3d7   : > { %v9636_v1 = vpop.f32.mrf.mxu0  ;;  %v4964_v28 = vadd.f32 %v4875_v36, %v4714_v53  ;;  %v5215_v52 = vadd.f32 %v7601_v22, %v4965_v30  ;;  %v9662_v36 = vld [vmem:[%s9809_s6] ss:$0 sm:$0xff] }
 0x3d8   : > { %v7575_v13 = vpop.f32.mrf.mxu1 }
 0x3d9   : > { %v9647_v33 = vpop.f32.mrf.mxu0  ;;  %v4967_v61 = vadd.f32 %v7575_v13, %v4717_v4  ;;  %v5214_v42 = vadd.f32 %v5125_v25, %v4964_v28  ;;  %v6349_v4 = vld [vmem:[%s7844_s17 + $0x3e] sm:$0xff] }
 0x3da   : > { %v4885_v40 = vpop.f32.mrf.mxu1 }
 0x3db   : > { %v9657_v41 = vpop.f32.mrf.mxu0  ;;  %v4966_v15 = vadd.f32 %v4885_v40, %v4716_v49  ;;  %v5217_v53 = vadd.f32 %v7604_v57, %v4967_v61 }
 0x3dc   : > { %v7578_v2 = vpop.f32.mrf.mxu1 }
 0x3dd   : > { %v4969_v13 = vadd.f32 %v7578_v2, %v4719_v23  ;;  %v9670_v49 = vpop.f32.mrf.mxu0  ;;  %v5216_v7 = vadd.f32 %v5135_v59, %v4966_v15 }
 0x3de   : > { %v4895_v55 = vpop.f32.mrf.mxu1 }
 0x3df   : > { %v4968_v34 = vadd.f32 %v4895_v55, %v4718_v5  ;;  %v5219_v55 = vadd.f32 %v7607_v46, %v4969_v13  ;;  %v5175_v15 = vpop.f32.mrf.mxu0  ;;  %v4722_v46 = vadd.f32 %v9562_v51, %v9591_v12 }
 0x3e0   : > { %v7581_v3 = vpop.f32.mrf.mxu1 }
 0x3e1   : > { %v5218_v5 = vadd.f32 %v9623_v47, %v4968_v34  ;;  %v4725_v47 = vadd.f32 %v9569_v9, %v9595_v29  ;;  %v4724_v34 = vadd.f32 %v9575_v21, %v9597_v44  ;;  %v6355_v9 = vld [vmem:[%s7844_s17 + $0x6e] sm:$0xff] }
 0x3e2   : > { %v9617_v58 = vpop.f32.mrf.mxu1 }
 0x3e4   : > { %v9619_v16 = vpop.f32.mrf.mxu1 }
 0x3e6   : > { %v9621_v31 = vpop.f32.mrf.mxu1 }
 0x3e8   : > { %v9625_v19 = vpop.f32.mrf.mxu1 }
 0x3ea   : > { %v9627_v24 = vpop.f32.mrf.mxu1 }
 0x3ec   : > { %v9632_v35 = vpop.f32.mrf.mxu1 }
 0x3ee   : > { %v9634_v27 = vpop.f32.mrf.mxu1 }
 0x3f0   : > { %v9638_v54 = vpop.f32.mrf.mxu1 }
 0x3f2   : > { %v9643_v11 = vpop.f32.mrf.mxu1 }
 0x3f4   : > { %v9649_v50 = vpop.f32.mrf.mxu1 }
 0x3f6   : > { %v9655_v6 = vpop.f32.mrf.mxu1 }
 0x3f7   : > { %9815 = vst [vmem:[#allocation7_spill] sm:$0xff] %v9655_v6  ;;  %v4721_v6 = vadd.f32 %v9550_v14, %v9583_v37  ;;  %v4720_v14 = vadd.f32 %v9554_v45, %v9585_v32  ;;  %v6351_v37 = vld [vmem:[%s7844_s17 + $0x4e] sm:$0xff] }
 0x3f8   : > { %v7630_v17 = vpop.f32.mrf.mxu1 }
 0x3f9   : > { %v5465_v0 = vadd.f32 %v7630_v17, %v5215_v52  ;;  %v4971_v57 = vadd.f32 %v7581_v3, %v4721_v6  ;;  %v4970_v23 = vadd.f32 %v9617_v58, %v4720_v14  ;;  %v4723_v3 = vadd.f32 %v9558_v39, %v9589_v43  ;;  %v6350_v6 = vld [vmem:[%s7844_s17 + $0x46] sm:$0xff] }
 0x3fa   : > { %v5375_v22 = vpop.f32.mrf.mxu1  ;;  %v6354_v14 = vld [vmem:[%s7844_s17 + $0x66] sm:$0xff] }
 0x3fb   : > { %v5490_v40 = vadd.f32 %v9662_v36, %v5465_v0  ;;  %v5464_v30 = vadd.f32 %v5375_v22, %v5214_v42  ;;  %v5221_v22 = vadd.f32 %v9630_v60, %v4971_v57  ;;  %v4973_v39 = vadd.f32 %v9619_v16, %v4723_v3 }
 0x3fc   : > { %v7633_v63 = vpop.f32.mrf.mxu1  ;;  %v5220_v12 = vadd.f32 %v9636_v1, %v4970_v23  ;;  %v4972_v60 = vadd.f32 %v9621_v31, %v4722_v46  ;;  %v4974_v57 = vadd.f32 %v9627_v24, %v4724_v34 }
 0x3fd   : > { %v5526_v28 = vadd.f32 %v6349_v4, %v5490_v40  ;;  %v5489_v25 = vadd.f32 %v9662_v36, %v5464_v30  ;;  %v5467_v61 = vadd.f32 %v7633_v63, %v5217_v53  ;;  %v6353_v4 = vld [vmem:[%s7844_s17 + $0x5e] sm:$0xff]  ;;  %v7619_v30 = vpop.f32.mrf.mxu0  ;;  %v6352_v53 = vld [vmem:[%s7844_s17 + $0x56] sm:$0xff] }
 0x3fe   : > { %v5385_v2 = vpop.f32.mrf.mxu1 }
 0x3ff   : > { %5544 = vst.msk [vmem:[%s9677_s19 + $0x8] sm:$0xff] %vm358_vm2, %v5526_v28  ;;  %v5525_v52 = vadd.f32 %v6348_v26, %v5489_v25  ;;  %v5492_v17 = vadd.f32 %v9662_v36, %v5467_v61  ;;  %v5466_v59 = vadd.f32 %v5385_v2, %v5216_v7  ;;  %v4975_v7 = vadd.f32 %v9625_v19, %v4725_v47  ;;  %v5185_v61 = vpop.f32.mrf.mxu0 }
 0x400   : > { %v7636_v0 = vpop.f32.mrf.mxu1  ;;  %v5223_v25 = vadd.f32 %v9647_v33, %v4973_v39  ;;  %v4727_v19 = vadd.f32 %v9581_v48, %v9601_v62  ;;  %v4726_v33 = vadd.f32 %v9587_v56, %v9603_v10  ;;  %v5224_v10 = vadd.f32 %v5175_v15, %v4974_v57  ;;  %v9817_v39 = vld [vmem:[#allocation3_spill] sm:$0xff]  ;;  %v6363_v57 = vld [vmem:[%s7844_s17 + $0xae] sm:$0xff] }
 0x401   : > { %5543 = vst.msk [vmem:[%s9677_s19] sm:$0xff] %vm358_vm2, %v5525_v52  ;;  %v5528_v45 = vadd.f32 %v6351_v37, %v5492_v17  ;;  %v5491_v32 = vadd.f32 %v9662_v36, %v5466_v59  ;;  %v5469_v42 = vadd.f32 %v7636_v0, %v5219_v55  ;;  %v5222_v52 = vadd.f32 %v9657_v41, %v4972_v60  ;;  %v6357_v17 = vld [vmem:[%s7844_s17 + $0x7e] sm:$0xff]  ;;  %v7622_v3 = vpop.f32.mrf.mxu0 }
 0x402   : > { %v5395_v58 = vpop.f32.mrf.mxu1  ;;  %v5225_v59 = vadd.f32 %v9670_v49, %v4975_v7  ;;  %v4977_v48 = vadd.f32 %v9632_v35, %v4727_v19  ;;  %v4729_v41 = vadd.f32 %v9593_v20, %v9607_v38  ;;  %v4976_v0 = vadd.f32 %v9634_v27, %v4726_v33 }
 0x403   : > { %5546 = vst.msk [vmem:[%s9677_s19 + $0x18] sm:$0xff] %vm358_vm2, %v5528_v45  ;;  %v5527_v43 = vadd.f32 %v6350_v6, %v5491_v32  ;;  %v5494_v13 = vadd.f32 %v9662_v36, %v5469_v42  ;;  %v5468_v40 = vadd.f32 %v5395_v58, %v5218_v5  ;;  %v6356_v6 = vld [vmem:[%s7844_s17 + $0x76] sm:$0xff]  ;;  %v4728_v42 = vadd.f32 %v9599_v18, %v9609_v8  ;;  %v6359_v5 = vld [vmem:[%s7844_s17 + $0x8e] sm:$0xff] }
 0x404   : > { %v7639_v51 = vpop.f32.mrf.mxu1  ;;  %v4979_v32 = vadd.f32 %v9638_v54, %v4729_v41  ;;  %v5227_v46 = vadd.f32 %v7619_v30, %v4977_v48  ;;  %v5226_v47 = vadd.f32 %v5185_v61, %v4976_v0  ;;  %v9819_v30 = vld [vmem:[#allocation4_spill] sm:$0xff] }
 0x405   : > { %5545 = vst.msk [vmem:[%s9677_s19 + $0x10] sm:$0xff] %vm358_vm2, %v5527_v43  ;;  %v5530_v16 = vadd.f32 %v6353_v4, %v5494_v13  ;;  %v5493_v26 = vadd.f32 %v9662_v36, %v5468_v40  ;;  %v5471_v63 = vadd.f32 %v7639_v51, %v5221_v22  ;;  %v5195_v4 = vpop.f32.mrf.mxu0  ;;  %v4978_v58 = vadd.f32 %v9643_v11, %v4728_v42  ;;  %v9816_v22 = vld [vmem:[#allocation5_spill] sm:$0xff] }
 0x406   : > { %v5405_v29 = vpop.f32.mrf.mxu1  ;;  %v4731_v54 = vadd.f32 %v9817_v39, %v9816_v22  ;;  %v6358_v43 = vld [vmem:[%s7844_s17 + $0x86] sm:$0xff]  ;;  %v5229_v11 = vadd.f32 %v7622_v3, %v4979_v32 }
 0x407   : > { %5548 = vst.msk [vmem:[%s9677_s19 + $0x28] sm:$0xff] %vm358_vm2, %v5530_v16  ;;  %v5529_v1 = vadd.f32 %v6352_v53, %v5493_v26  ;;  %v5496_v31 = vadd.f32 %v9662_v36, %v5471_v63  ;;  %v5470_v28 = vadd.f32 %v5405_v29, %v5220_v12  ;;  %v9818_v53 = vld [vmem:[#allocation6_spill] sm:$0xff]  ;;  %v6361_v12 = vld [vmem:[%s7844_s17 + $0x9e] sm:$0xff]  ;;  %v7625_v34 = vpop.f32.mrf.mxu0 }
 0x408   : > { %v7642_v21 = vpop.f32.mrf.mxu1  ;;  %v4730_v51 = vadd.f32 %v9819_v30, %v9818_v53  ;;  %v4981_v16 = vadd.f32 %v9649_v50, %v4731_v54 }
 0x409   : > { %5547 = vst.msk [vmem:[%s9677_s19 + $0x20] sm:$0xff] %vm358_vm2, %v5529_v1  ;;  %v5532_v44 = vadd.f32 %v6355_v9, %v5496_v31  ;;  %v5495_v37 = vadd.f32 %v9662_v36, %v5470_v28  ;;  %v5473_v2 = vadd.f32 %v7642_v21, %v5223_v25  ;;  %v6360_v9 = vld [vmem:[%s7844_s17 + $0x96] sm:$0xff]  ;;  %v5228_v1 = vadd.f32 %v5195_v4, %v4978_v58 }
 0x40a   : > { %v5415_v24 = vpop.f32.mrf.mxu1  ;;  %v9820_v31 = vld [vmem:[#allocation7_spill] sm:$0xff] }
 0x40b   : > { %5550 = vst.msk [vmem:[%s9677_s19 + $0x38] sm:$0xff] %vm358_vm2, %v5532_v44  ;;  %v5531_v62 = vadd.f32 %v6354_v14, %v5495_v37  ;;  %v5498_v55 = vadd.f32 %v9662_v36, %v5473_v2  ;;  %v5472_v23 = vadd.f32 %v5415_v24, %v5222_v52  ;;  %v4980_v28 = vadd.f32 %v9820_v31, %v4730_v51  ;;  %v5205_v2 = vpop.f32.mrf.mxu0  ;;  %v6362_v52 = vld [vmem:[%s7844_s17 + $0xa6] sm:$0xff] }
 0x40c   : > { %v7645_v56 = vpop.f32.mrf.mxu1  ;;  %v5231_v37 = vadd.f32 %v7625_v34, %v4981_v16 }
 0x40d   : > { %5549 = vst.msk [vmem:[%s9677_s19 + $0x30] sm:$0xff] %vm358_vm2, %v5531_v62  ;;  %v5534_v35 = vadd.f32 %v6357_v17, %v5498_v55  ;;  %v5497_v49 = vadd.f32 %v9662_v36, %v5472_v23  ;;  %v5475_v45 = vadd.f32 %v7645_v56, %v5225_v59  ;;  %v5230_v48 = vadd.f32 %v5205_v2, %v4980_v28  ;;  %v6365_v62 = vld [vmem:[%s7844_s17 + $0xbe] sm:$0xff] }
 0x40e   : > { %v5425_v20 = vpop.f32.mrf.mxu1 }
 0x40f   : > { %5552 = vst.msk [vmem:[%s9677_s19 + $0x48] sm:$0xff] %vm358_vm2, %v5534_v35  ;;  %v5533_v38 = vadd.f32 %v6356_v6, %v5497_v49  ;;  %v5500_v27 = vadd.f32 %v9662_v36, %v5475_v45  ;;  %v5474_v15 = vadd.f32 %v5425_v20, %v5224_v10  ;;  %v6364_v6 = vld [vmem:[%s7844_s17 + $0xb6] sm:$0xff] }
 0x410   : > { %v7648_v13 = vpop.f32.mrf.mxu1 }
 0x411   : > { %5551 = vst.msk [vmem:[%s9677_s19 + $0x40] sm:$0xff] %vm358_vm2, %v5533_v38  ;;  %v5536_v18 = vadd.f32 %v6359_v5, %v5500_v27  ;;  %v5499_v8 = vadd.f32 %v9662_v36, %v5474_v15  ;;  %v5477_v40 = vadd.f32 %v7648_v13, %v5227_v46 }
 0x412   : > { %v5435_v60 = vpop.f32.mrf.mxu1 }
 0x413   : > { %5554 = vst.msk [vmem:[%s9677_s19 + $0x58] sm:$0xff] %vm358_vm2, %v5536_v18  ;;  %v5535_v26 = vadd.f32 %v6358_v43, %v5499_v8  ;;  %v5502_v63 = vadd.f32 %v9662_v36, %v5477_v40  ;;  %v5476_v7 = vadd.f32 %v5435_v60, %v5226_v47 }
 0x414   : > { %v7651_v29 = vpop.f32.mrf.mxu1 }
 0x415   : > { %5553 = vst.msk [vmem:[%s9677_s19 + $0x50] sm:$0xff] %vm358_vm2, %v5535_v26  ;;  %v5538_v25 = vadd.f32 %v6361_v12, %v5502_v63  ;;  %v5501_v50 = vadd.f32 %v9662_v36, %v5476_v7  ;;  %v5479_v61 = vadd.f32 %v7651_v29, %v5229_v11 }
 0x416   : > { %v5445_v19 = vpop.f32.mrf.mxu1 }
 0x417   : > { %5556 = vst.msk [vmem:[%s9677_s19 + $0x68] sm:$0xff] %vm358_vm2, %v5538_v25  ;;  %v5537_v14 = vadd.f32 %v6360_v9, %v5501_v50  ;;  %v5504_v21 = vadd.f32 %v9662_v36, %v5479_v61  ;;  %v5478_v44 = vadd.f32 %v5445_v19, %v5228_v1 }
 0x418   : > { %v7654_v33 = vpop.f32.mrf.mxu1 }
 0x419   : > { %5555 = vst.msk [vmem:[%s9677_s19 + $0x60] sm:$0xff] %vm358_vm2, %v5537_v14  ;;  %v5540_v17 = vadd.f32 %v6363_v57, %v5504_v21  ;;  %v5503_v24 = vadd.f32 %v9662_v36, %v5478_v44  ;;  %v5481_v59 = vadd.f32 %v7654_v33, %v5231_v37 }
 0x41a   : > { %v5455_v55 = vpop.f32.mrf.mxu1 }
 0x41b   : > { %5558 = vst.msk [vmem:[%s9677_s19 + $0x78] sm:$0xff] %vm358_vm2, %v5540_v17  ;;  %v5539_v23 = vadd.f32 %v6362_v52, %v5503_v24  ;;  %v5506_v3 = vadd.f32 %v9662_v36, %v5481_v59  ;;  %v5480_v41 = vadd.f32 %v5455_v55, %v5230_v48 }
 0x41d   : > { %5557 = vst.msk [vmem:[%s9677_s19 + $0x70] sm:$0xff] %vm358_vm2, %v5539_v23  ;;  %v5542_v56 = vadd.f32 %v6365_v62, %v5506_v3  ;;  %v5505_v10 = vadd.f32 %v9662_v36, %v5480_v41 }
 0x41f   : > { %5560 = vst.msk [vmem:[%s9677_s19 + $0x88] sm:$0xff] %vm358_vm2, %v5542_v56  ;;  %v5541_v0 = vadd.f32 %v6364_v6, %v5505_v10 }
 0x421   : > { %5559 = vst.msk [vmem:[%s9677_s19 + $0x80] sm:$0xff] %vm358_vm2, %v5541_v0 }
 0x422 PF: > { %s17_s28 = sadd.s32 1, %s7742_s28   ;;  %s9821_s24 = smov %s7734_s26 }
 0x423   : > { %p14_p7 = scmp.ge.s32.totalorder %s17_s28, 6   ;;  %s9822_s25 = smov %s7738_s27 }
 0x424   : > { %s9823_s26 = smov %s9826_s29  ;;  %s9824_s27 = smov %s9830_s30 }
 0x425   :  { %16 = sbr.rel (!%p14_p7) target bundleno = 3 (0x3), region = 104 }

</bundles_post_ra>
